<compile_context>
chip_gen: v5e
topology: v5e:2x2
jax: 0.10.0
libtpu: 0.0.40
codegen_flags: <defaults>
</compile_context>

<pallas_src>
import functools

import jax
import jax.numpy as jnp
from jax.experimental import pallas as pl
from jax.experimental.pallas import tpu as pltpu


def residual_block_kernel(x_ref, w1_ref, b1_ref, w2_ref, b2_ref, o_ref,
                          xpad_ref, h1pad_ref, *, H, W, K, scaling_factor):
    # x_ref    : (1, H, W, Cin)      unpadded NHWC input block
    # w1_ref   : (K, K, Cin, Cmid)   HWIO
    # b1_ref   : (1, Cmid)
    # w2_ref   : (K, K, Cmid, Cout)  HWIO
    # b2_ref   : (1, Cout)
    # o_ref    : (1, Cout, H*W)      lane-dense, flattened-NCHW output block
    # xpad_ref : (H+2p, W+2p, Cin)   VMEM scratch, zero halo for conv1
    # h1pad_ref: (H+2p, W+2p, Cmid)  VMEM scratch, zero halo for conv2
    p = (K - 1) // 2
    Cin = x_ref.shape[-1]
    Cmid = w1_ref.shape[-1]
    Cout = w2_ref.shape[-1]
    HW = H * W

    x = x_ref[0]                                     # (H, W, Cin), model dtype

    # ---- conv1: realize the zero halo in VMEM (no HBM pad, no jnp.pad) ----
    xpad_ref[...] = jnp.zeros(xpad_ref.shape, xpad_ref.dtype)
    xpad_ref[p:p + H, p:p + W, :] = x

    # f32 accumulator initialized with the broadcast bias (saves a VPU pass).
    acc1 = jnp.broadcast_to(b1_ref[...].astype(jnp.float32), (HW, Cmid))
    for ky in range(K):
        for kx in range(K):
            patch = xpad_ref[ky:ky + H, kx:kx + W, :].reshape(HW, Cin)
            acc1 = acc1 + jnp.dot(patch, w1_ref[ky, kx],
                                  preferred_element_type=jnp.float32)
    h1 = jnp.maximum(acc1, 0.0)                      # (HW, Cmid), f32

    # ---- conv2: intermediate written into the padded VMEM scratch ----
    h1pad_ref[...] = jnp.zeros(h1pad_ref.shape, h1pad_ref.dtype)
    h1pad_ref[p:p + H, p:p + W, :] = h1.reshape(H, W, Cmid).astype(h1pad_ref.dtype)

    acc2 = jnp.broadcast_to(b2_ref[...].astype(jnp.float32), (HW, Cout))
    for ky in range(K):
        for kx in range(K):
            patch = h1pad_ref[ky:ky + H, kx:kx + W, :].reshape(HW, Cmid)
            acc2 = acc2 + jnp.dot(patch, w2_ref[ky, kx],
                                  preferred_element_type=jnp.float32)

    # ---- residual (identity shortcut, stride=1) + final ReLU, in f32 ----
    res = x.reshape(HW, Cin).astype(jnp.float32)
    out = jnp.maximum(acc2 + scaling_factor * res, 0.0)        # (HW, Cout)

    # ---- lane-dense store: (Cout, HW), minor dim is a multiple of 128 ----
    # Transpose done as an identity matmul on the (idle) MXU instead of an
    # XLU relayout of a lane-sparse array: out_t[c, q] = out[q, c].
    rows = jax.lax.broadcasted_iota(jnp.int32, (Cout, Cout), 0)
    cols = jax.lax.broadcasted_iota(jnp.int32, (Cout, Cout), 1)
    ident = (rows == cols).astype(jnp.float32)
    out_t = jax.lax.dot_general(ident, out, (((1,), (1,)), ((), ())),
                                preferred_element_type=jnp.float32)
    o_ref[0] = out_t.astype(o_ref.dtype)


def residual_block_pallas(x_nchw, w1_oihw, b1, w2_oihw, b2, scaling_factor=1.0):
    """x_nchw: (N, C, H, W); w*: (Cout, Cin, K, K); b*: (Cout,) PyTorch layouts."""
    N, C, H, W = x_nchw.shape
    K = w1_oihw.shape[-1]
    p = (K - 1) // 2
    Cmid = w1_oihw.shape[0]
    Cout = w2_oihw.shape[0]
    assert w1_oihw.shape[1] == C and w2_oihw.shape[1] == Cmid
    assert Cout == C, "identity shortcut (stride=1) requires Cout == Cin"

    # Layout glue (plain JAX): NCHW -> NHWC input, OIHW -> HWIO weights.
    x_nhwc = jnp.transpose(x_nchw, (0, 2, 3, 1))
    w1 = jnp.transpose(w1_oihw, (2, 3, 1, 0)).astype(x_nchw.dtype)  # (K,K,C,Cmid)
    w2 = jnp.transpose(w2_oihw, (2, 3, 1, 0)).astype(x_nchw.dtype)  # (K,K,Cmid,Cout)
    b1_2d = b1.reshape(1, Cmid)
    b2_2d = b2.reshape(1, Cout)

    kernel = functools.partial(residual_block_kernel, H=H, W=W, K=K,
                               scaling_factor=float(scaling_factor))

    out_flat = pl.pallas_call(
        kernel,
        out_shape=jax.ShapeDtypeStruct((N, Cout, H * W), x_nchw.dtype),
        grid_spec=pltpu.PrefetchScalarGridSpec(
            num_scalar_prefetch=0,
            grid=(N,),                    # one (small) image per grid step
            in_specs=[
                pl.BlockSpec((1, H, W, C), lambda n: (n, 0, 0, 0)),
                pl.BlockSpec((K, K, C, Cmid), lambda n: (0, 0, 0, 0)),
                pl.BlockSpec((1, Cmid), lambda n: (0, 0)),
                pl.BlockSpec((K, K, Cmid, Cout), lambda n: (0, 0, 0, 0)),
                pl.BlockSpec((1, Cout), lambda n: (0, 0)),
            ],
            out_specs=pl.BlockSpec((1, Cout, H * W), lambda n: (n, 0, 0)),
            scratch_shapes=[
                pltpu.VMEM((H + 2 * p, W + 2 * p, C), x_nchw.dtype),
                pltpu.VMEM((H + 2 * p, W + 2 * p, Cmid), x_nchw.dtype),
            ],
        ),
        compiler_params=pltpu.CompilerParams(
            dimension_semantics=("parallel",)),
    )(x_nhwc, w1, b1_2d, w2, b2_2d)

    # (N, Cout, H*W) is flattened NCHW already -> free reshape, no transpose.
    return out_flat.reshape(N, Cout, H, W)


def residual_block_reference(x_nchw, w1, b1, w2, b2, scaling_factor=1.0):
    """Pure-JAX reference using lax.conv (matches PyTorch Conv2d semantics)."""
    dn = ("NCHW", "OIHW", "NCHW")
    h1 = jax.lax.conv_general_dilated(x_nchw, w1, (1, 1), ((1, 1), (1, 1)),
                                      dimension_numbers=dn)
    h1 = jax.nn.relu(h1 + b1[None, :, None, None])
    h2 = jax.lax.conv_general_dilated(h1, w2, (1, 1), ((1, 1), (1, 1)),
                                      dimension_numbers=dn)
    h2 = h2 + b2[None, :, None, None]
    return jax.nn.relu(h2 + scaling_factor * x_nchw)


if __name__ == "__main__":
    # Module config implied by defaults: stride=1 -> out_channels=in_channels,
    # kernel_size=3, identity shortcut, scaling_factor=1.0.
    N, C, H, W = 2, 4, 16, 16
    K = 3
    scaling_factor = 1.0

    key = jax.random.PRNGKey(0)
    kx, kw1, kb1, kw2, kb2 = jax.random.split(key, 5)

    x = jax.random.normal(kx, (N, C, H, W), jnp.float32)

    # conv1: kaiming_normal (a=0 for ReLU): std = sqrt(2 / fan_in), fan_in = C*K*K
    fan_in = C * K * K
    w1 = jax.random.normal(kw1, (C, C, K, K), jnp.float32) * jnp.sqrt(2.0 / fan_in)
    b1 = jax.random.normal(kb1, (C,), jnp.float32) * (1.0 / jnp.sqrt(fan_in))
    # conv2: init_type=None -> PyTorch default init; deterministic normal stand-in.
    w2 = jax.random.normal(kw2, (C, C, K, K), jnp.float32) * (1.0 / jnp.sqrt(fan_in))
    b2 = jax.random.normal(kb2, (C,), jnp.float32) * (1.0 / jnp.sqrt(fan_in))

    out = residual_block_pallas(x, w1, b1, w2, b2, scaling_factor)
    out = jax.block_until_ready(out)

    ref = residual_block_reference(x, w1, b1, w2, b2, scaling_factor)
    ref = jax.block_until_ready(ref)

    assert out.shape == (N, C, H, W)
    assert jnp.allclose(out, ref, rtol=1e-4, atol=1e-4), "mismatch vs reference"
    print("KERNEL_OK")
</pallas_src>

<mosaic_0001>
module attributes {stable_mosaic.version = 11 : i64} {
  func.func @residual_block_kernel(%arg0: i32, %arg1: memref<1x16x16x4xf32, #tpu.memory_space<vmem>>, %arg2: memref<3x3x4x4xf32, #tpu.memory_space<vmem>>, %arg3: memref<1x4xf32, #tpu.memory_space<vmem>>, %arg4: memref<3x3x4x4xf32, #tpu.memory_space<vmem>>, %arg5: memref<1x4xf32, #tpu.memory_space<vmem>>, %arg6: memref<1x4x256xf32, #tpu.memory_space<vmem>>, %arg7: memref<18x18x4xf32, #tpu.memory_space<vmem>>, %arg8: memref<18x18x4xf32, #tpu.memory_space<vmem>>) attributes {dimension_semantics = [#tpu.dimension_semantics<parallel>], iteration_bounds = array<i64: 2>, scalar_prefetch = 0 : i64, scratch_operands = 2 : i64, tpu.core_type = #tpu.core_type<tc>, window_params = [{transform_indices = @transform_0, window_bounds = array<i64: 1, 16, 16, 4>}, {pipeline_mode = #tpu.pipeline_mode<synchronous>, transform_indices = @transform_1, window_bounds = array<i64: 3, 3, 4, 4>}, {pipeline_mode = #tpu.pipeline_mode<synchronous>, transform_indices = @transform_2, window_bounds = array<i64: 1, 4>}, {pipeline_mode = #tpu.pipeline_mode<synchronous>, transform_indices = @transform_3, window_bounds = array<i64: 3, 3, 4, 4>}, {pipeline_mode = #tpu.pipeline_mode<synchronous>, transform_indices = @transform_4, window_bounds = array<i64: 1, 4>}, {transform_indices = @transform_5, window_bounds = array<i64: 1, 4, 256>}]} {
    %c0 = arith.constant 0 : index
    %c0_0 = arith.constant 0 : index
    %c0_1 = arith.constant 0 : index
    %c0_2 = arith.constant 0 : index
    %0 = vector.load %arg1[%c0, %c0_0, %c0_1, %c0_2] : memref<1x16x16x4xf32, #tpu.memory_space<vmem>>, vector<1x16x16x4xf32>
    %1 = vector.shape_cast %0 : vector<1x16x16x4xf32> to vector<16x16x4xf32>
    %cst = arith.constant 0.000000e+00 : f32
    %2 = vector.broadcast %cst : f32 to vector<18x18x4xf32>
    %c0_3 = arith.constant 0 : index
    %c0_4 = arith.constant 0 : index
    %c0_5 = arith.constant 0 : index
    %3 = vector.load %arg7[%c0_3, %c0_4, %c0_5] : memref<18x18x4xf32, #tpu.memory_space<vmem>>, vector<18x18x4xf32>
    tpu.vector_store %arg7[%c0_3, %c0_4, %c0_5], %2 {strides = array<i32>} : memref<18x18x4xf32, #tpu.memory_space<vmem>>, vector<18x18x4xf32>,
    %c1 = arith.constant 1 : index
    %c1_6 = arith.constant 1 : index
    %c0_7 = arith.constant 0 : index
    %4 = vector.load %arg7[%c1, %c1_6, %c0_7] : memref<18x18x4xf32, #tpu.memory_space<vmem>>, vector<16x16x4xf32>
    tpu.vector_store %arg7[%c1, %c1_6, %c0_7], %1 {strides = array<i32>} : memref<18x18x4xf32, #tpu.memory_space<vmem>>, vector<16x16x4xf32>,
    %c0_8 = arith.constant 0 : index
    %c0_9 = arith.constant 0 : index
    %5 = vector.load %arg3[%c0_8, %c0_9] : memref<1x4xf32, #tpu.memory_space<vmem>>, vector<1x4xf32>
    %6 = vector.shape_cast %5 : vector<1x4xf32> to vector<1x4xf32>
    %7 = vector.broadcast %6 : vector<1x4xf32> to vector<256x4xf32>
    %c0_10 = arith.constant 0 : index
    %c0_11 = arith.constant 0 : index
    %c0_12 = arith.constant 0 : index
    %8 = vector.load %arg7[%c0_10, %c0_11, %c0_12] : memref<18x18x4xf32, #tpu.memory_space<vmem>>, vector<16x16x4xf32>
    %9 = vector.shape_cast %8 : vector<16x16x4xf32> to vector<256x4xf32>
    %c0_13 = arith.constant 0 : index
    %c0_14 = arith.constant 0 : index
    %c0_15 = arith.constant 0 : index
    %c0_16 = arith.constant 0 : index
    %10 = vector.load %arg2[%c0_13, %c0_14, %c0_15, %c0_16] : memref<3x3x4x4xf32, #tpu.memory_space<vmem>>, vector<1x1x4x4xf32>
    %11 = vector.shape_cast %10 : vector<1x1x4x4xf32> to vector<4x4xf32>
    %cst_17 = arith.constant dense<0.000000e+00> : vector<256x4xf32>
    %12 = tpu.matmul %9, %11, %cst_17 {dimension_numbers = #tpu.dot_dimension_numbers<[1], [0], [0], [1], [0, 0, 1, 1], [], []>} : vector<256x4xf32>, vector<4x4xf32>, vector<256x4xf32> -> vector<256x4xf32>
    %13 = arith.addf %7, %12 : vector<256x4xf32>
    %c0_18 = arith.constant 0 : index
    %c1_19 = arith.constant 1 : index
    %c0_20 = arith.constant 0 : index
    %14 = vector.load %arg7[%c0_18, %c1_19, %c0_20] : memref<18x18x4xf32, #tpu.memory_space<vmem>>, vector<16x16x4xf32>
    %15 = vector.shape_cast %14 : vector<16x16x4xf32> to vector<256x4xf32>
    %c0_21 = arith.constant 0 : index
    %c1_22 = arith.constant 1 : index
    %c0_23 = arith.constant 0 : index
    %c0_24 = arith.constant 0 : index
    %16 = vector.load %arg2[%c0_21, %c1_22, %c0_23, %c0_24] : memref<3x3x4x4xf32, #tpu.memory_space<vmem>>, vector<1x1x4x4xf32>
    %17 = vector.shape_cast %16 : vector<1x1x4x4xf32> to vector<4x4xf32>
    %cst_25 = arith.constant dense<0.000000e+00> : vector<256x4xf32>
    %18 = tpu.matmul %15, %17, %cst_25 {dimension_numbers = #tpu.dot_dimension_numbers<[1], [0], [0], [1], [0, 0, 1, 1], [], []>} : vector<256x4xf32>, vector<4x4xf32>, vector<256x4xf32> -> vector<256x4xf32>
    %19 = arith.addf %13, %18 : vector<256x4xf32>
    %c0_26 = arith.constant 0 : index
    %c2 = arith.constant 2 : index
    %c0_27 = arith.constant 0 : index
    %20 = vector.load %arg7[%c0_26, %c2, %c0_27] : memref<18x18x4xf32, #tpu.memory_space<vmem>>, vector<16x16x4xf32>
    %21 = vector.shape_cast %20 : vector<16x16x4xf32> to vector<256x4xf32>
    %c0_28 = arith.constant 0 : index
    %c2_29 = arith.constant 2 : index
    %c0_30 = arith.constant 0 : index
    %c0_31 = arith.constant 0 : index
    %22 = vector.load %arg2[%c0_28, %c2_29, %c0_30, %c0_31] : memref<3x3x4x4xf32, #tpu.memory_space<vmem>>, vector<1x1x4x4xf32>
    %23 = vector.shape_cast %22 : vector<1x1x4x4xf32> to vector<4x4xf32>
    %cst_32 = arith.constant dense<0.000000e+00> : vector<256x4xf32>
    %24 = tpu.matmul %21, %23, %cst_32 {dimension_numbers = #tpu.dot_dimension_numbers<[1], [0], [0], [1], [0, 0, 1, 1], [], []>} : vector<256x4xf32>, vector<4x4xf32>, vector<256x4xf32> -> vector<256x4xf32>
    %25 = arith.addf %19, %24 : vector<256x4xf32>
    %c1_33 = arith.constant 1 : index
    %c0_34 = arith.constant 0 : index
    %c0_35 = arith.constant 0 : index
    %26 = vector.load %arg7[%c1_33, %c0_34, %c0_35] : memref<18x18x4xf32, #tpu.memory_space<vmem>>, vector<16x16x4xf32>
    %27 = vector.shape_cast %26 : vector<16x16x4xf32> to vector<256x4xf32>
    %c1_36 = arith.constant 1 : index
    %c0_37 = arith.constant 0 : index
    %c0_38 = arith.constant 0 : index
    %c0_39 = arith.constant 0 : index
    %28 = vector.load %arg2[%c1_36, %c0_37, %c0_38, %c0_39] : memref<3x3x4x4xf32, #tpu.memory_space<vmem>>, vector<1x1x4x4xf32>
    %29 = vector.shape_cast %28 : vector<1x1x4x4xf32> to vector<4x4xf32>
    %cst_40 = arith.constant dense<0.000000e+00> : vector<256x4xf32>
    %30 = tpu.matmul %27, %29, %cst_40 {dimension_numbers = #tpu.dot_dimension_numbers<[1], [0], [0], [1], [0, 0, 1, 1], [], []>} : vector<256x4xf32>, vector<4x4xf32>, vector<256x4xf32> -> vector<256x4xf32>
    %31 = arith.addf %25, %30 : vector<256x4xf32>
    %c1_41 = arith.constant 1 : index
    %c1_42 = arith.constant 1 : index
    %c0_43 = arith.constant 0 : index
    %32 = vector.load %arg7[%c1_41, %c1_42, %c0_43] : memref<18x18x4xf32, #tpu.memory_space<vmem>>, vector<16x16x4xf32>
    %33 = vector.shape_cast %32 : vector<16x16x4xf32> to vector<256x4xf32>
    %c1_44 = arith.constant 1 : index
    %c1_45 = arith.constant 1 : index
    %c0_46 = arith.constant 0 : index
    %c0_47 = arith.constant 0 : index
    %34 = vector.load %arg2[%c1_44, %c1_45, %c0_46, %c0_47] : memref<3x3x4x4xf32, #tpu.memory_space<vmem>>, vector<1x1x4x4xf32>
    %35 = vector.shape_cast %34 : vector<1x1x4x4xf32> to vector<4x4xf32>
    %cst_48 = arith.constant dense<0.000000e+00> : vector<256x4xf32>
    %36 = tpu.matmul %33, %35, %cst_48 {dimension_numbers = #tpu.dot_dimension_numbers<[1], [0], [0], [1], [0, 0, 1, 1], [], []>} : vector<256x4xf32>, vector<4x4xf32>, vector<256x4xf32> -> vector<256x4xf32>
    %37 = arith.addf %31, %36 : vector<256x4xf32>
    %c1_49 = arith.constant 1 : index
    %c2_50 = arith.constant 2 : index
    %c0_51 = arith.constant 0 : index
    %38 = vector.load %arg7[%c1_49, %c2_50, %c0_51] : memref<18x18x4xf32, #tpu.memory_space<vmem>>, vector<16x16x4xf32>
    %39 = vector.shape_cast %38 : vector<16x16x4xf32> to vector<256x4xf32>
    %c1_52 = arith.constant 1 : index
    %c2_53 = arith.constant 2 : index
    %c0_54 = arith.constant 0 : index
    %c0_55 = arith.constant 0 : index
    %40 = vector.load %arg2[%c1_52, %c2_53, %c0_54, %c0_55] : memref<3x3x4x4xf32, #tpu.memory_space<vmem>>, vector<1x1x4x4xf32>
    %41 = vector.shape_cast %40 : vector<1x1x4x4xf32> to vector<4x4xf32>
    %cst_56 = arith.constant dense<0.000000e+00> : vector<256x4xf32>
    %42 = tpu.matmul %39, %41, %cst_56 {dimension_numbers = #tpu.dot_dimension_numbers<[1], [0], [0], [1], [0, 0, 1, 1], [], []>} : vector<256x4xf32>, vector<4x4xf32>, vector<256x4xf32> -> vector<256x4xf32>
    %43 = arith.addf %37, %42 : vector<256x4xf32>
    %c2_57 = arith.constant 2 : index
    %c0_58 = arith.constant 0 : index
    %c0_59 = arith.constant 0 : index
    %44 = vector.load %arg7[%c2_57, %c0_58, %c0_59] : memref<18x18x4xf32, #tpu.memory_space<vmem>>, vector<16x16x4xf32>
    %45 = vector.shape_cast %44 : vector<16x16x4xf32> to vector<256x4xf32>
    %c2_60 = arith.constant 2 : index
    %c0_61 = arith.constant 0 : index
    %c0_62 = arith.constant 0 : index
    %c0_63 = arith.constant 0 : index
    %46 = vector.load %arg2[%c2_60, %c0_61, %c0_62, %c0_63] : memref<3x3x4x4xf32, #tpu.memory_space<vmem>>, vector<1x1x4x4xf32>
    %47 = vector.shape_cast %46 : vector<1x1x4x4xf32> to vector<4x4xf32>
    %cst_64 = arith.constant dense<0.000000e+00> : vector<256x4xf32>
    %48 = tpu.matmul %45, %47, %cst_64 {dimension_numbers = #tpu.dot_dimension_numbers<[1], [0], [0], [1], [0, 0, 1, 1], [], []>} : vector<256x4xf32>, vector<4x4xf32>, vector<256x4xf32> -> vector<256x4xf32>
    %49 = arith.addf %43, %48 : vector<256x4xf32>
    %c2_65 = arith.constant 2 : index
    %c1_66 = arith.constant 1 : index
    %c0_67 = arith.constant 0 : index
    %50 = vector.load %arg7[%c2_65, %c1_66, %c0_67] : memref<18x18x4xf32, #tpu.memory_space<vmem>>, vector<16x16x4xf32>
    %51 = vector.shape_cast %50 : vector<16x16x4xf32> to vector<256x4xf32>
    %c2_68 = arith.constant 2 : index
    %c1_69 = arith.constant 1 : index
    %c0_70 = arith.constant 0 : index
    %c0_71 = arith.constant 0 : index
    %52 = vector.load %arg2[%c2_68, %c1_69, %c0_70, %c0_71] : memref<3x3x4x4xf32, #tpu.memory_space<vmem>>, vector<1x1x4x4xf32>
    %53 = vector.shape_cast %52 : vector<1x1x4x4xf32> to vector<4x4xf32>
    %cst_72 = arith.constant dense<0.000000e+00> : vector<256x4xf32>
    %54 = tpu.matmul %51, %53, %cst_72 {dimension_numbers = #tpu.dot_dimension_numbers<[1], [0], [0], [1], [0, 0, 1, 1], [], []>} : vector<256x4xf32>, vector<4x4xf32>, vector<256x4xf32> -> vector<256x4xf32>
    %55 = arith.addf %49, %54 : vector<256x4xf32>
    %c2_73 = arith.constant 2 : index
    %c2_74 = arith.constant 2 : index
    %c0_75 = arith.constant 0 : index
    %56 = vector.load %arg7[%c2_73, %c2_74, %c0_75] : memref<18x18x4xf32, #tpu.memory_space<vmem>>, vector<16x16x4xf32>
    %57 = vector.shape_cast %56 : vector<16x16x4xf32> to vector<256x4xf32>
    %c2_76 = arith.constant 2 : index
    %c2_77 = arith.constant 2 : index
    %c0_78 = arith.constant 0 : index
    %c0_79 = arith.constant 0 : index
    %58 = vector.load %arg2[%c2_76, %c2_77, %c0_78, %c0_79] : memref<3x3x4x4xf32, #tpu.memory_space<vmem>>, vector<1x1x4x4xf32>
    %59 = vector.shape_cast %58 : vector<1x1x4x4xf32> to vector<4x4xf32>
    %cst_80 = arith.constant dense<0.000000e+00> : vector<256x4xf32>
    %60 = tpu.matmul %57, %59, %cst_80 {dimension_numbers = #tpu.dot_dimension_numbers<[1], [0], [0], [1], [0, 0, 1, 1], [], []>} : vector<256x4xf32>, vector<4x4xf32>, vector<256x4xf32> -> vector<256x4xf32>
    %61 = arith.addf %55, %60 : vector<256x4xf32>
    %cst_81 = arith.constant 0.000000e+00 : f32
    %62 = vector.broadcast %cst_81 : f32 to vector<256x4xf32>
    %63 = arith.maximumf %61, %62 : vector<256x4xf32>
    %cst_82 = arith.constant 0.000000e+00 : f32
    %64 = vector.broadcast %cst_82 : f32 to vector<18x18x4xf32>
    %c0_83 = arith.constant 0 : index
    %c0_84 = arith.constant 0 : index
    %c0_85 = arith.constant 0 : index
    %65 = vector.load %arg8[%c0_83, %c0_84, %c0_85] : memref<18x18x4xf32, #tpu.memory_space<vmem>>, vector<18x18x4xf32>
    tpu.vector_store %arg8[%c0_83, %c0_84, %c0_85], %64 {strides = array<i32>} : memref<18x18x4xf32, #tpu.memory_space<vmem>>, vector<18x18x4xf32>,
    %66 = vector.shape_cast %63 : vector<256x4xf32> to vector<16x16x4xf32>
    %c1_86 = arith.constant 1 : index
    %c1_87 = arith.constant 1 : index
    %c0_88 = arith.constant 0 : index
    %67 = vector.load %arg8[%c1_86, %c1_87, %c0_88] : memref<18x18x4xf32, #tpu.memory_space<vmem>>, vector<16x16x4xf32>
    tpu.vector_store %arg8[%c1_86, %c1_87, %c0_88], %66 {strides = array<i32>} : memref<18x18x4xf32, #tpu.memory_space<vmem>>, vector<16x16x4xf32>,
    %c0_89 = arith.constant 0 : index
    %c0_90 = arith.constant 0 : index
    %68 = vector.load %arg5[%c0_89, %c0_90] : memref<1x4xf32, #tpu.memory_space<vmem>>, vector<1x4xf32>
    %69 = vector.shape_cast %68 : vector<1x4xf32> to vector<1x4xf32>
    %70 = vector.broadcast %69 : vector<1x4xf32> to vector<256x4xf32>
    %c0_91 = arith.constant 0 : index
    %c0_92 = arith.constant 0 : index
    %c0_93 = arith.constant 0 : index
    %71 = vector.load %arg8[%c0_91, %c0_92, %c0_93] : memref<18x18x4xf32, #tpu.memory_space<vmem>>, vector<16x16x4xf32>
    %72 = vector.shape_cast %71 : vector<16x16x4xf32> to vector<256x4xf32>
    %c0_94 = arith.constant 0 : index
    %c0_95 = arith.constant 0 : index
    %c0_96 = arith.constant 0 : index
    %c0_97 = arith.constant 0 : index
    %73 = vector.load %arg4[%c0_94, %c0_95, %c0_96, %c0_97] : memref<3x3x4x4xf32, #tpu.memory_space<vmem>>, vector<1x1x4x4xf32>
    %74 = vector.shape_cast %73 : vector<1x1x4x4xf32> to vector<4x4xf32>
    %cst_98 = arith.constant dense<0.000000e+00> : vector<256x4xf32>
    %75 = tpu.matmul %72, %74, %cst_98 {dimension_numbers = #tpu.dot_dimension_numbers<[1], [0], [0], [1], [0, 0, 1, 1], [], []>} : vector<256x4xf32>, vector<4x4xf32>, vector<256x4xf32> -> vector<256x4xf32>
    %76 = arith.addf %70, %75 : vector<256x4xf32>
    %c0_99 = arith.constant 0 : index
    %c1_100 = arith.constant 1 : index
    %c0_101 = arith.constant 0 : index
    %77 = vector.load %arg8[%c0_99, %c1_100, %c0_101] : memref<18x18x4xf32, #tpu.memory_space<vmem>>, vector<16x16x4xf32>
    %78 = vector.shape_cast %77 : vector<16x16x4xf32> to vector<256x4xf32>
    %c0_102 = arith.constant 0 : index
    %c1_103 = arith.constant 1 : index
    %c0_104 = arith.constant 0 : index
    %c0_105 = arith.constant 0 : index
    %79 = vector.load %arg4[%c0_102, %c1_103, %c0_104, %c0_105] : memref<3x3x4x4xf32, #tpu.memory_space<vmem>>, vector<1x1x4x4xf32>
    %80 = vector.shape_cast %79 : vector<1x1x4x4xf32> to vector<4x4xf32>
    %cst_106 = arith.constant dense<0.000000e+00> : vector<256x4xf32>
    %81 = tpu.matmul %78, %80, %cst_106 {dimension_numbers = #tpu.dot_dimension_numbers<[1], [0], [0], [1], [0, 0, 1, 1], [], []>} : vector<256x4xf32>, vector<4x4xf32>, vector<256x4xf32> -> vector<256x4xf32>
    %82 = arith.addf %76, %81 : vector<256x4xf32>
    %c0_107 = arith.constant 0 : index
    %c2_108 = arith.constant 2 : index
    %c0_109 = arith.constant 0 : index
    %83 = vector.load %arg8[%c0_107, %c2_108, %c0_109] : memref<18x18x4xf32, #tpu.memory_space<vmem>>, vector<16x16x4xf32>
    %84 = vector.shape_cast %83 : vector<16x16x4xf32> to vector<256x4xf32>
    %c0_110 = arith.constant 0 : index
    %c2_111 = arith.constant 2 : index
    %c0_112 = arith.constant 0 : index
    %c0_113 = arith.constant 0 : index
    %85 = vector.load %arg4[%c0_110, %c2_111, %c0_112, %c0_113] : memref<3x3x4x4xf32, #tpu.memory_space<vmem>>, vector<1x1x4x4xf32>
    %86 = vector.shape_cast %85 : vector<1x1x4x4xf32> to vector<4x4xf32>
    %cst_114 = arith.constant dense<0.000000e+00> : vector<256x4xf32>
    %87 = tpu.matmul %84, %86, %cst_114 {dimension_numbers = #tpu.dot_dimension_numbers<[1], [0], [0], [1], [0, 0, 1, 1], [], []>} : vector<256x4xf32>, vector<4x4xf32>, vector<256x4xf32> -> vector<256x4xf32>
    %88 = arith.addf %82, %87 : vector<256x4xf32>
    %c1_115 = arith.constant 1 : index
    %c0_116 = arith.constant 0 : index
    %c0_117 = arith.constant 0 : index
    %89 = vector.load %arg8[%c1_115, %c0_116, %c0_117] : memref<18x18x4xf32, #tpu.memory_space<vmem>>, vector<16x16x4xf32>
    %90 = vector.shape_cast %89 : vector<16x16x4xf32> to vector<256x4xf32>
    %c1_118 = arith.constant 1 : index
    %c0_119 = arith.constant 0 : index
    %c0_120 = arith.constant 0 : index
    %c0_121 = arith.constant 0 : index
    %91 = vector.load %arg4[%c1_118, %c0_119, %c0_120, %c0_121] : memref<3x3x4x4xf32, #tpu.memory_space<vmem>>, vector<1x1x4x4xf32>
    %92 = vector.shape_cast %91 : vector<1x1x4x4xf32> to vector<4x4xf32>
    %cst_122 = arith.constant dense<0.000000e+00> : vector<256x4xf32>
    %93 = tpu.matmul %90, %92, %cst_122 {dimension_numbers = #tpu.dot_dimension_numbers<[1], [0], [0], [1], [0, 0, 1, 1], [], []>} : vector<256x4xf32>, vector<4x4xf32>, vector<256x4xf32> -> vector<256x4xf32>
    %94 = arith.addf %88, %93 : vector<256x4xf32>
    %c1_123 = arith.constant 1 : index
    %c1_124 = arith.constant 1 : index
    %c0_125 = arith.constant 0 : index
    %95 = vector.load %arg8[%c1_123, %c1_124, %c0_125] : memref<18x18x4xf32, #tpu.memory_space<vmem>>, vector<16x16x4xf32>
    %96 = vector.shape_cast %95 : vector<16x16x4xf32> to vector<256x4xf32>
    %c1_126 = arith.constant 1 : index
    %c1_127 = arith.constant 1 : index
    %c0_128 = arith.constant 0 : index
    %c0_129 = arith.constant 0 : index
    %97 = vector.load %arg4[%c1_126, %c1_127, %c0_128, %c0_129] : memref<3x3x4x4xf32, #tpu.memory_space<vmem>>, vector<1x1x4x4xf32>
    %98 = vector.shape_cast %97 : vector<1x1x4x4xf32> to vector<4x4xf32>
    %cst_130 = arith.constant dense<0.000000e+00> : vector<256x4xf32>
    %99 = tpu.matmul %96, %98, %cst_130 {dimension_numbers = #tpu.dot_dimension_numbers<[1], [0], [0], [1], [0, 0, 1, 1], [], []>} : vector<256x4xf32>, vector<4x4xf32>, vector<256x4xf32> -> vector<256x4xf32>
    %100 = arith.addf %94, %99 : vector<256x4xf32>
    %c1_131 = arith.constant 1 : index
    %c2_132 = arith.constant 2 : index
    %c0_133 = arith.constant 0 : index
    %101 = vector.load %arg8[%c1_131, %c2_132, %c0_133] : memref<18x18x4xf32, #tpu.memory_space<vmem>>, vector<16x16x4xf32>
    %102 = vector.shape_cast %101 : vector<16x16x4xf32> to vector<256x4xf32>
    %c1_134 = arith.constant 1 : index
    %c2_135 = arith.constant 2 : index
    %c0_136 = arith.constant 0 : index
    %c0_137 = arith.constant 0 : index
    %103 = vector.load %arg4[%c1_134, %c2_135, %c0_136, %c0_137] : memref<3x3x4x4xf32, #tpu.memory_space<vmem>>, vector<1x1x4x4xf32>
    %104 = vector.shape_cast %103 : vector<1x1x4x4xf32> to vector<4x4xf32>
    %cst_138 = arith.constant dense<0.000000e+00> : vector<256x4xf32>
    %105 = tpu.matmul %102, %104, %cst_138 {dimension_numbers = #tpu.dot_dimension_numbers<[1], [0], [0], [1], [0, 0, 1, 1], [], []>} : vector<256x4xf32>, vector<4x4xf32>, vector<256x4xf32> -> vector<256x4xf32>
    %106 = arith.addf %100, %105 : vector<256x4xf32>
    %c2_139 = arith.constant 2 : index
    %c0_140 = arith.constant 0 : index
    %c0_141 = arith.constant 0 : index
    %107 = vector.load %arg8[%c2_139, %c0_140, %c0_141] : memref<18x18x4xf32, #tpu.memory_space<vmem>>, vector<16x16x4xf32>
    %108 = vector.shape_cast %107 : vector<16x16x4xf32> to vector<256x4xf32>
    %c2_142 = arith.constant 2 : index
    %c0_143 = arith.constant 0 : index
    %c0_144 = arith.constant 0 : index
    %c0_145 = arith.constant 0 : index
    %109 = vector.load %arg4[%c2_142, %c0_143, %c0_144, %c0_145] : memref<3x3x4x4xf32, #tpu.memory_space<vmem>>, vector<1x1x4x4xf32>
    %110 = vector.shape_cast %109 : vector<1x1x4x4xf32> to vector<4x4xf32>
    %cst_146 = arith.constant dense<0.000000e+00> : vector<256x4xf32>
    %111 = tpu.matmul %108, %110, %cst_146 {dimension_numbers = #tpu.dot_dimension_numbers<[1], [0], [0], [1], [0, 0, 1, 1], [], []>} : vector<256x4xf32>, vector<4x4xf32>, vector<256x4xf32> -> vector<256x4xf32>
    %112 = arith.addf %106, %111 : vector<256x4xf32>
    %c2_147 = arith.constant 2 : index
    %c1_148 = arith.constant 1 : index
    %c0_149 = arith.constant 0 : index
    %113 = vector.load %arg8[%c2_147, %c1_148, %c0_149] : memref<18x18x4xf32, #tpu.memory_space<vmem>>, vector<16x16x4xf32>
    %114 = vector.shape_cast %113 : vector<16x16x4xf32> to vector<256x4xf32>
    %c2_150 = arith.constant 2 : index
    %c1_151 = arith.constant 1 : index
    %c0_152 = arith.constant 0 : index
    %c0_153 = arith.constant 0 : index
    %115 = vector.load %arg4[%c2_150, %c1_151, %c0_152, %c0_153] : memref<3x3x4x4xf32, #tpu.memory_space<vmem>>, vector<1x1x4x4xf32>
    %116 = vector.shape_cast %115 : vector<1x1x4x4xf32> to vector<4x4xf32>
    %cst_154 = arith.constant dense<0.000000e+00> : vector<256x4xf32>
    %117 = tpu.matmul %114, %116, %cst_154 {dimension_numbers = #tpu.dot_dimension_numbers<[1], [0], [0], [1], [0, 0, 1, 1], [], []>} : vector<256x4xf32>, vector<4x4xf32>, vector<256x4xf32> -> vector<256x4xf32>
    %118 = arith.addf %112, %117 : vector<256x4xf32>
    %c2_155 = arith.constant 2 : index
    %c2_156 = arith.constant 2 : index
    %c0_157 = arith.constant 0 : index
    %119 = vector.load %arg8[%c2_155, %c2_156, %c0_157] : memref<18x18x4xf32, #tpu.memory_space<vmem>>, vector<16x16x4xf32>
    %120 = vector.shape_cast %119 : vector<16x16x4xf32> to vector<256x4xf32>
    %c2_158 = arith.constant 2 : index
    %c2_159 = arith.constant 2 : index
    %c0_160 = arith.constant 0 : index
    %c0_161 = arith.constant 0 : index
    %121 = vector.load %arg4[%c2_158, %c2_159, %c0_160, %c0_161] : memref<3x3x4x4xf32, #tpu.memory_space<vmem>>, vector<1x1x4x4xf32>
    %122 = vector.shape_cast %121 : vector<1x1x4x4xf32> to vector<4x4xf32>
    %cst_162 = arith.constant dense<0.000000e+00> : vector<256x4xf32>
    %123 = tpu.matmul %120, %122, %cst_162 {dimension_numbers = #tpu.dot_dimension_numbers<[1], [0], [0], [1], [0, 0, 1, 1], [], []>} : vector<256x4xf32>, vector<4x4xf32>, vector<256x4xf32> -> vector<256x4xf32>
    %124 = arith.addf %118, %123 : vector<256x4xf32>
    %125 = vector.shape_cast %1 : vector<16x16x4xf32> to vector<256x4xf32>
    %cst_163 = arith.constant 1.000000e+00 : f32
    %126 = vector.broadcast %cst_163 : f32 to vector<256x4xf32>
    %127 = arith.mulf %126, %125 : vector<256x4xf32>
    %128 = arith.addf %124, %127 : vector<256x4xf32>
    %cst_164 = arith.constant 0.000000e+00 : f32
    %129 = vector.broadcast %cst_164 : f32 to vector<256x4xf32>
    %130 = arith.maximumf %128, %129 : vector<256x4xf32>
    %131 = tpu.iota {dimensions = array<i32: 0>} : vector<4x4xi32>
    %132 = tpu.iota {dimensions = array<i32: 1>} : vector<4x4xi32>
    %133 = arith.cmpi eq, %131, %132 : vector<4x4xi32>
    %134 = arith.extui %133 : vector<4x4xi1> to vector<4x4xi32>
    %135 = arith.sitofp %134 : vector<4x4xi32> to vector<4x4xf32>
    %cst_165 = arith.constant dense<0.000000e+00> : vector<4x256xf32>
    %136 = tpu.matmul %135, %130, %cst_165 {dimension_numbers = #tpu.dot_dimension_numbers<[1], [1], [0], [0], [0, 0, 1, 0], [], []>} : vector<4x4xf32>, vector<256x4xf32>, vector<4x256xf32> -> vector<4x256xf32>
    %c0_166 = arith.constant 0 : index
    %c0_167 = arith.constant 0 : index
    %c0_168 = arith.constant 0 : index
    %137 = vector.load %arg6[%c0_166, %c0_167, %c0_168] : memref<1x4x256xf32, #tpu.memory_space<vmem>>, vector<1x4x256xf32>
    %138 = vector.shape_cast %137 : vector<1x4x256xf32> to vector<4x256xf32>
    %139 = vector.shape_cast %136 : vector<4x256xf32> to vector<1x4x256xf32>
    tpu.vector_store %arg6[%c0_166, %c0_167, %c0_168], %139 {strides = array<i32>} : memref<1x4x256xf32, #tpu.memory_space<vmem>>, vector<1x4x256xf32>,
    return
  }
  func.func @transform_0(%arg0: i32) -> (i32, i32, i32, i32) {
    %c0_i32 = arith.constant 0 : i32
    %c0_i32_0 = arith.constant 0 : i32
    %c0_i32_1 = arith.constant 0 : i32
    %c0_i32_2 = arith.constant 0 : i32
    return %arg0, %c0_i32, %c0_i32_0, %c0_i32_1 : i32, i32, i32, i32
  }
  func.func @transform_1(%arg0: i32) -> (i32, i32, i32, i32) {
    %c0_i32 = arith.constant 0 : i32
    %c0_i32_0 = arith.constant 0 : i32
    %c0_i32_1 = arith.constant 0 : i32
    %c0_i32_2 = arith.constant 0 : i32
    %c0_i32_3 = arith.constant 0 : i32
    return %c0_i32, %c0_i32_0, %c0_i32_1, %c0_i32_2 : i32, i32, i32, i32
  }
  func.func @transform_2(%arg0: i32) -> (i32, i32) {
    %c0_i32 = arith.constant 0 : i32
    %c0_i32_0 = arith.constant 0 : i32
    %c0_i32_1 = arith.constant 0 : i32
    return %c0_i32, %c0_i32_0 : i32, i32
  }
  func.func @transform_3(%arg0: i32) -> (i32, i32, i32, i32) {
    %c0_i32 = arith.constant 0 : i32
    %c0_i32_0 = arith.constant 0 : i32
    %c0_i32_1 = arith.constant 0 : i32
    %c0_i32_2 = arith.constant 0 : i32
    %c0_i32_3 = arith.constant 0 : i32
    return %c0_i32, %c0_i32_0, %c0_i32_1, %c0_i32_2 : i32, i32, i32, i32
  }
  func.func @transform_4(%arg0: i32) -> (i32, i32) {
    %c0_i32 = arith.constant 0 : i32
    %c0_i32_0 = arith.constant 0 : i32
    %c0_i32_1 = arith.constant 0 : i32
    return %c0_i32, %c0_i32_0 : i32, i32
  }
  func.func @transform_5(%arg0: i32) -> (i32, i32, i32) {
    %c0_i32 = arith.constant 0 : i32
    %c0_i32_0 = arith.constant 0 : i32
    %c0_i32_1 = arith.constant 0 : i32
    return %arg0, %c0_i32, %c0_i32_0 : i32, i32, i32
  }
}

</mosaic_0001>

<bundles_post_ra>
// kernel: tpu_custom_call.1
= control target key start
LH: loop header
LB: loop body
LE: loop exit
PB: predicated region body
PF: predicated region fallthrough
CT: control target
= control target key end

     0   :  { %10 = vsyncpa [#allocation5], 0  ;;  %s9650_s0 = inlined_call_operand.vmem [shape: f32[2,16,16,4], index: 0, kind: input, shape index: {}]   ;;  %s9651_s1 = inlined_call_operand.vmem [shape: f32[3,3,4,4], index: 1, kind: input, shape index: {}]   ;;  %s9652_s2 = inlined_call_operand.vmem [shape: f32[1,4], index: 2, kind: input, shape index: {}]   ;;  %s9653_s3 = inlined_call_operand.vmem [shape: f32[3,3,4,4], index: 3, kind: input, shape index: {}]   ;;  %s9654_s4 = inlined_call_operand.vmem [shape: f32[1,4], index: 4, kind: input, shape index: {}]   ;;  %s9655_s5 = inlined_call_operand.hbm [shape: f32[2,4,256], index: 5, kind: output, shape index: {}]  }
   0x1   :  { %12 = vsyncpa [#allocation5 + $0x1], 0  ;;  %s6566_s18 = smov 0   ;;  %s6568_s19 = smov 0  }
   0x2   :  { %s6570_s20 = smov 0   ;;  %s6572_s21 = smov 0  }
   0x3 LB: > { %s6587_s22 = sadd.s32 4294967295, %s6533_s21   ;;  %s5768_s23 = sadd.s32 4294967294, %s6533_s21   ;;  %s6533_s21 = sphi %s6572_s21, %s10144_s21   ;;  %s6529_s20 = sphi %s6570_s20, %s10143_s20   ;;  %s6525_s19 = sphi %s6568_s19, %s10142_s19   ;;  %s6521_s18 = sphi %s6566_s18, %s10141_s18  }
   0x4   : > { %s6591_s24 = sadd.s32 1, %s6533_s21   ;;  %s135_s25 = sadd.s32 1, %s6529_s20 }
   0x5   : > { %s132_s26 = ssub.s32 %s6533_s21, %s6591_s24  ;;  %p145_p0 = scmp.ne.s32.totalorder %s6529_s20, %s6525_s19 }
   0x6   : > { %p133_p1 = scmp.eq.s32.totalorder %s132_s26, 0  ;;  %p146_p2 = scmp.eq.s32.totalorder %s6587_s22, 1 }
   0x7   : > { %p151_p3 = scmp.ne.s32.totalorder %s6525_s19, %s6521_s18  ;;  %p152_p4 = scmp.eq.s32.totalorder %s5768_s23, 1 }
   0x8   : > { %s6602_s27 = scalar_select %p133_p1, %s6529_s20, %s135_s25  }
   0x9   : > { %p6604_p5 = por %p146_p2, %p145_p0  ;;  %p6608_p6 = por %p152_p4, %p151_p3 }
   0xa   : > { %p5771_p7 = scmp.ge.s32.totalorder %s6533_s21, 1  ;;  %p190_p8 = scmp.lt.s32.totalorder %s6533_s21, 3 }
   0xc   : > { %p191_p9 = pnand %p5771_p7, %p190_p8 }
   0xe   : > { %194 = sbr.rel (%p191_p9) target bundleno = 1736 (0x6c8), region = 40 }
  0x13   : > { %v380_v0 = vld [vmem:[%s9651_s1] sm:$0xf]  ;;  %vm477_vm0 = vcmask 1043456   ;;  %vm255_vm1 = vcmask 31744   ;;  %v9656_v1 = vmov 0.0   ;;  %p218_p10 = scmp.lt.s32.totalorder %s6587_s22, 1 }
  0x14   : > { %5775 = vmatpush.msk.msra.mxu0 %vm477_vm0, %v380_v0  ;;  %256 = vst.msk [vmem:[#allocation2] sm:$0xff] %vm255_vm1, %v9656_v1  ;;  %v5808_v2 = vld [vmem:[%s9651_s1 + $0x4] sm:$0xf]  ;;  %6427 = vmatpush.msk.msra.mxu2 %vm477_vm0, %v380_v0  ;;  %vm258_vm2 = vcmask 25600   ;;  %s215_s23 = sand.u32 1, %s6525_s19   ;;  %s6426_s26 = sshll.u32 %s6587_s22, 3 }
  0x15   : > { %257 = vst.msk [vmem:[#allocation2 + $0x8] sm:$0xff] %vm255_vm1, %v9656_v1  ;;  %5809 = vmatpush.msk.msra.mxu1 %vm477_vm0, %v5808_v2  ;;  %6428 = vmatpush.msk.msra.mxu3 %vm477_vm0, %v5808_v2  ;;  %s219_s9 = scalar_select %p218_p10, %s6587_s22, 1 }
  0x16   : > { %260 = vst.msk [vmem:[#allocation2 + $0x18] sm:$0xff] %vm255_vm1, %v9656_v1  ;;  %s5772_s25 = sshll.u32 %s215_s23, 3  ;;  %s5704_s7 = scalar_lea.hbm %s9655_s5, %s6426_s26 }
  0x17   : > { %261 = vst.msk [vmem:[#allocation2 + $0x20] sm:$0xff] %vm255_vm1, %v9656_v1  ;;  %s6425_s10 = sshll.u32 %s219_s9, 8  ;;  %s217_s8 = scalar_lea.vmem [#allocation4], %s5772_s25 }
  0x18   : > { %263 = vst.msk [vmem:[#allocation2 + $0x30] sm:$0xff] %vm255_vm1, %v9656_v1  ;;  %s6768_s13 = scalar_lea.vmem %s9650_s0, %s6425_s10  ;;  %s5706_s9 = sshll.u32 %s217_s8, 4  ;;  %s5707_s9 = int_to_ptr.vmem [resolvable:$true] %s5706_s9 }
  0x19   : > { %264 = vst.msk [vmem:[#allocation2 + $0x38] sm:$0xff] %vm255_vm1, %v9656_v1  ;;  %v6777_v6 = vld [vmem:[%s6768_s13 + $0x70] sm:$0xff]  ;;  %v6782_v7 = vld [vmem:[%s6768_s13 + $0x78] sm:$0xff]  ;;  %v6866_v11 = vld [vmem:[%s6768_s13 + $0x80] sm:$0xff]  ;;  %s5708_s10 = sshll.u32 %s5704_s7, 4  ;;  %s5693_s11 = scalar_lea.sflag [#allocation5], %s215_s23  ;;  %s5709_s10 = int_to_ptr.hbm [resolvable:$true] %s5708_s10 }
  0x1a   : > { %266 = vst.msk [vmem:[#allocation2 + $0x48] sm:$0xff] %vm255_vm1, %v9656_v1  ;;  %v6871_v12 = vld [vmem:[%s6768_s13] sm:$0xff]  ;;  %v6876_v13 = vld [vmem:[%s6768_s13 + $0x88] sm:$0xff]  ;;  %v6886_v15 = vld [vmem:[%s6768_s13 + $0x90] sm:$0xff]  ;;  %s6485_s12 = sshra.s32 %s5709_s10, 4  ;;  %s6491_s15 = scalar_lea.hbm %s9655_s5, 16  ;;  %s6486_s12 = int_to_ptr.hbm [resolvable:$true] %s6485_s12 }
  0x1b   : > { %v348_v3 = vld [vmem:[#allocation2] sm:$0xff]  ;;  %267 = vst.msk [vmem:[#allocation2 + $0x50] sm:$0xff] %vm255_vm1, %v9656_v1  ;;  %v6881_v14 = vld [vmem:[%s6768_s13 + $0x8] sm:$0xff]  ;;  %v6891_v16 = vld [vmem:[%s6768_s13 + $0x10] sm:$0xff]  ;;  %s6487_s22 = scalar_lea.hbm %s6486_s12, 8  ;;  %p6492_p0 = scmp.lt.s32.totalorder %s6486_s12, %s9655_s5 }
  0x1c   : > { %5776 = vmatmul.msk.f32.vlgmr.msra.gmra.mxu0 %vm255_vm1, %v348_v3  ;;  %269 = vst.msk [vmem:[#allocation2 + $0x60] sm:$0xff] %vm255_vm1, %v9656_v1  ;;  %v626_v4 = vld [vmem:[#allocation2 + $0x1] sm:$0xff]  ;;  %v6896_v17 = vld [vmem:[%s6768_s13 + $0x98] sm:$0xff]  ;;  %v6954_v31 = vld [vmem:[%s6768_s13 + $0xb0] sm:$0xff]  ;;  %p6488_p11 = scmp.ne.s32.totalorder %s6486_s12, %s6487_s22  ;;  %p6493_p1 = scmp.lt.s32.totalorder %s6491_s15, %s6487_s22 }
  0x1d   : > { %270 = vst.msk [vmem:[#allocation2 + $0x68] sm:$0xff] %vm255_vm1, %v9656_v1  ;;  %5810 = vmatmul.msk.f32.vlgmr.msra.gmra.mxu1 %vm255_vm1, %v626_v4  ;;  %v349_v5 = vld [vmem:[#allocation2 + $0x8] sm:$0xff]  ;;  %v6901_v18 = vld [vmem:[%s6768_s13 + $0x18] sm:$0xff]  ;;  %v6906_v19 = vld [vmem:[%s6768_s13 + $0xa0] sm:$0xff] }
  0x1e   : > { %272 = vst.msk [vmem:[#allocation2 + $0x78] sm:$0xff] %vm255_vm1, %v9656_v1  ;;  %v6911_v20 = vld [vmem:[%s6768_s13 + $0x20] sm:$0xff]  ;;  %v6920_v23 = vld [vmem:[%s6768_s13 + $0xa8] sm:$0xff]  ;;  %v6967_v32 = vld [vmem:[%s6768_s13 + $0x30] sm:$0xff]  ;;  %p6489_p12 = pnand %p6488_p11, %p6604_p5  ;;  %p6494_p2 = por %p6493_p1, %p6492_p0 }
  0x1f   : > { %273 = vst.msk [vmem:[#allocation2 + $0x80] sm:$0xff] %vm255_vm1, %v9656_v1  ;;  %v6939_v26 = vld [vmem:[%s6768_s13 + $0x28] sm:$0xff]  ;;  %v6980_v37 = vld [vmem:[%s6768_s13 + $0xb8] sm:$0xff]  ;;  %v7006_v43 = vld [vmem:[%s6768_s13 + $0xc0] sm:$0xff] }
  0x20   : > { %275 = vst.msk [vmem:[#allocation2 + $0x90] sm:$0xff] %vm255_vm1, %v9656_v1  ;;  %v6993_v38 = vld [vmem:[%s6768_s13 + $0x38] sm:$0xff]  ;;  %v7019_v44 = vld [vmem:[%s6768_s13 + $0x40] sm:$0xff]  ;;  %v7032_v49 = vld [vmem:[%s6768_s13 + $0xc8] sm:$0xff]  ;;  %p6490_p13 = pneg %p6489_p12 }
  0x21   : > { %276 = vst.msk [vmem:[#allocation2 + $0x98] sm:$0xff] %vm255_vm1, %v9656_v1  ;;  %v7045_v50 = vld [vmem:[%s6768_s13 + $0x48] sm:$0xff]  ;;  %v7058_v55 = vld [vmem:[%s6768_s13 + $0xd0] sm:$0xff]  ;;  %v7084_v61 = vld [vmem:[%s6768_s13 + $0xd8] sm:$0xff] }
  0x22   : > { %278 = vst.msk [vmem:[#allocation2 + $0xa8] sm:$0xff] %vm255_vm1, %v9656_v1  ;;  %v7071_v56 = vld [vmem:[%s6768_s13 + $0x50] sm:$0xff]  ;;  %v7097_v62 = vld [vmem:[%s6768_s13 + $0x58] sm:$0xff]  ;;  %v7110_v4 = vld [vmem:[%s6768_s13 + $0xe0] sm:$0xff]  ;;  %p6495_p3 = pnand %p6494_p2, %p6490_p13 }
  0x23   : > { %279 = vst.msk [vmem:[#allocation2 + $0xb0] sm:$0xff] %vm255_vm1, %v9656_v1 }
  0x24   : > { %281 = vst.msk [vmem:[#allocation2 + $0xc0] sm:$0xff] %vm255_vm1, %v9656_v1  ;;  %5777 = vmatmul.msk.f32.gmra.mxu0 %vm255_vm1, %v349_v5  ;;  %v7123_v5 = vld [vmem:[%s6768_s13 + $0x60] sm:$0xff] }
  0x25   : > { %282 = vst.msk [vmem:[#allocation2 + $0xc8] sm:$0xff] %vm255_vm1, %v9656_v1 }
  0x26   : > { %284 = vst.msk [vmem:[#allocation2 + $0xd8] sm:$0xff] %vm255_vm1, %v9656_v1 }
  0x27   : > { %285 = vst.msk [vmem:[#allocation2 + $0xe0] sm:$0xff] %vm255_vm1, %v9656_v1 }
  0x28   : > { %287 = vst.msk [vmem:[#allocation2 + $0xf0] sm:$0xff] %vm255_vm1, %v9656_v1 }
  0x29   : > { %288 = vst.msk [vmem:[#allocation2 + $0xf8] sm:$0xff] %vm255_vm1, %v9656_v1 }
  0x2a   : > { %290 = vst.msk [vmem:[#allocation2 + $0x108] sm:$0xff] %vm255_vm1, %v9656_v1 }
  0x2b   : > { %291 = vst.msk [vmem:[#allocation2 + $0x110] sm:$0xff] %vm255_vm1, %v9656_v1 }
  0x2c   : > { %293 = vst.msk [vmem:[#allocation2 + $0x120] sm:$0xff] %vm255_vm1, %v9656_v1 }
  0x2d   : > { %294 = vst.msk [vmem:[#allocation2 + $0x128] sm:$0xff] %vm255_vm1, %v9656_v1 }
  0x2e   : > { %296 = vst.msk [vmem:[#allocation2 + $0x138] sm:$0xff] %vm255_vm1, %v9656_v1 }
  0x2f   : > { %297 = vst.msk [vmem:[#allocation2 + $0x140] sm:$0xff] %vm255_vm1, %v9656_v1 }
  0x30   : > { %299 = vst.msk [vmem:[#allocation2 + $0x150] sm:$0xff] %vm255_vm1, %v9656_v1 }
  0x31   : > { %300 = vst.msk [vmem:[#allocation2 + $0x158] sm:$0xff] %vm255_vm1, %v9656_v1 }
  0x32   : > { %302 = vst.msk [vmem:[#allocation2 + $0x168] sm:$0xff] %vm255_vm1, %v9656_v1 }
  0x33   : > { %303 = vst.msk [vmem:[#allocation2 + $0x170] sm:$0xff] %vm255_vm1, %v9656_v1 }
  0x34   : > { %305 = vst.msk [vmem:[#allocation2 + $0x180] sm:$0xff] %vm255_vm1, %v9656_v1 }
  0x35   : > { %306 = vst.msk [vmem:[#allocation2 + $0x188] sm:$0xff] %vm255_vm1, %v9656_v1 }
  0x36   : > { %308 = vst.msk [vmem:[#allocation2 + $0x198] sm:$0xff] %vm255_vm1, %v9656_v1 }
  0x37   : > { %309 = vst.msk [vmem:[#allocation2 + $0x1a0] sm:$0xff] %vm255_vm1, %v9656_v1 }
  0x38   : > { %2883 = vst.msk [vmem:[#allocation3] sm:$0xff] %vm255_vm1, %v9656_v1 }
  0x39   : > { %2884 = vst.msk [vmem:[#allocation3 + $0x8] sm:$0xff] %vm255_vm1, %v9656_v1 }
  0x3a   : > { %2886 = vst.msk [vmem:[#allocation3 + $0x18] sm:$0xff] %vm255_vm1, %v9656_v1 }
  0x3b   : > { %2887 = vst.msk [vmem:[#allocation3 + $0x20] sm:$0xff] %vm255_vm1, %v9656_v1 }
  0x3c   : > { %2889 = vst.msk [vmem:[#allocation3 + $0x30] sm:$0xff] %vm255_vm1, %v9656_v1 }
  0x3d   : > { %2890 = vst.msk [vmem:[#allocation3 + $0x38] sm:$0xff] %vm255_vm1, %v9656_v1 }
  0x3e   : > { %2892 = vst.msk [vmem:[#allocation3 + $0x48] sm:$0xff] %vm255_vm1, %v9656_v1 }
  0x3f   : > { %2893 = vst.msk [vmem:[#allocation3 + $0x50] sm:$0xff] %vm255_vm1, %v9656_v1 }
  0x40   : > { %2895 = vst.msk [vmem:[#allocation3 + $0x60] sm:$0xff] %vm255_vm1, %v9656_v1 }
  0x41   : > { %2896 = vst.msk [vmem:[#allocation3 + $0x68] sm:$0xff] %vm255_vm1, %v9656_v1 }
  0x42   : > { %2898 = vst.msk [vmem:[#allocation3 + $0x78] sm:$0xff] %vm255_vm1, %v9656_v1 }
  0x43   : > { %2899 = vst.msk [vmem:[#allocation3 + $0x80] sm:$0xff] %vm255_vm1, %v9656_v1 }
  0x44   : > { %2901 = vst.msk [vmem:[#allocation3 + $0x90] sm:$0xff] %vm255_vm1, %v9656_v1 }
  0x45   : > { %2902 = vst.msk [vmem:[#allocation3 + $0x98] sm:$0xff] %vm255_vm1, %v9656_v1 }
  0x46   : > { %2904 = vst.msk [vmem:[#allocation3 + $0xa8] sm:$0xff] %vm255_vm1, %v9656_v1 }
  0x47   : > { %2905 = vst.msk [vmem:[#allocation3 + $0xb0] sm:$0xff] %vm255_vm1, %v9656_v1 }
  0x48   : > { %2907 = vst.msk [vmem:[#allocation3 + $0xc0] sm:$0xff] %vm255_vm1, %v9656_v1 }
  0x49   : > { %2908 = vst.msk [vmem:[#allocation3 + $0xc8] sm:$0xff] %vm255_vm1, %v9656_v1 }
  0x4a   : > { %2910 = vst.msk [vmem:[#allocation3 + $0xd8] sm:$0xff] %vm255_vm1, %v9656_v1 }
  0x4b   : > { %2911 = vst.msk [vmem:[#allocation3 + $0xe0] sm:$0xff] %vm255_vm1, %v9656_v1 }
  0x4c   : > { %2913 = vst.msk [vmem:[#allocation3 + $0xf0] sm:$0xff] %vm255_vm1, %v9656_v1 }
  0x4d   : > { %2914 = vst.msk [vmem:[#allocation3 + $0xf8] sm:$0xff] %vm255_vm1, %v9656_v1 }
  0x4e   : > { %2916 = vst.msk [vmem:[#allocation3 + $0x108] sm:$0xff] %vm255_vm1, %v9656_v1 }
  0x4f   : > { %2917 = vst.msk [vmem:[#allocation3 + $0x110] sm:$0xff] %vm255_vm1, %v9656_v1 }
  0x50   : > { %2919 = vst.msk [vmem:[#allocation3 + $0x120] sm:$0xff] %vm255_vm1, %v9656_v1 }
  0x51   : > { %2920 = vst.msk [vmem:[#allocation3 + $0x128] sm:$0xff] %vm255_vm1, %v9656_v1 }
  0x52   : > { %2922 = vst.msk [vmem:[#allocation3 + $0x138] sm:$0xff] %vm255_vm1, %v9656_v1 }
  0x53   : > { %2923 = vst.msk [vmem:[#allocation3 + $0x140] sm:$0xff] %vm255_vm1, %v9656_v1 }
  0x54   : > { %2925 = vst.msk [vmem:[#allocation3 + $0x150] sm:$0xff] %vm255_vm1, %v9656_v1 }
  0x55   : > { %2926 = vst.msk [vmem:[#allocation3 + $0x158] sm:$0xff] %vm255_vm1, %v9656_v1 }
  0x56   : > { %2928 = vst.msk [vmem:[#allocation3 + $0x168] sm:$0xff] %vm255_vm1, %v9656_v1 }
  0x57   : > { %2929 = vst.msk [vmem:[#allocation3 + $0x170] sm:$0xff] %vm255_vm1, %v9656_v1 }
  0x58   : > { %2931 = vst.msk [vmem:[#allocation3 + $0x180] sm:$0xff] %vm255_vm1, %v9656_v1 }
  0x59   : > { %2932 = vst.msk [vmem:[#allocation3 + $0x188] sm:$0xff] %vm255_vm1, %v9656_v1 }
  0x5a   : > { %2934 = vst.msk [vmem:[#allocation3 + $0x198] sm:$0xff] %vm255_vm1, %v9656_v1 }
  0x5b   : > { %9736 = vst [vmem:[#allocation7_spill] sm:$0xff] %v6777_v6 }
  0x5c   : > { %2935 = vst.msk [vmem:[#allocation3 + $0x1a0] sm:$0xff] %vm255_vm1, %v9656_v1 }
  0x5d   : > { %9737 = vst [vmem:[#allocation8_spill] sm:$0xff] %v6782_v7 }
  0x5e   : > { %283 = vst.msk [vmem:[#allocation2 + $0xd0] sm:$0x3] %vm258_vm2, %v9656_v1 }
  0x5f   : > { %326 = vst.msk [vmem:[#allocation2 + $0xc1] sm:$0xff] %vm255_vm1, %v6777_v6 }
  0x60   : > { %327 = vst.msk [vmem:[#allocation2 + $0xc9] sm:$0xff] %vm255_vm1, %v6782_v7 }
  0x61   : > { %259 = vst.msk [vmem:[#allocation2 + $0x10] sm:$0x3] %vm258_vm2, %v9656_v1 }
  0x62   : > { %262 = vst.msk [vmem:[#allocation2 + $0x28] sm:$0x3] %vm258_vm2, %v9656_v1 }
  0x63   : > { %265 = vst.msk [vmem:[#allocation2 + $0x40] sm:$0x3] %vm258_vm2, %v9656_v1 }
  0x64   : > { %268 = vst.msk [vmem:[#allocation2 + $0x58] sm:$0x3] %vm258_vm2, %v9656_v1 }
  0x65   : > { %271 = vst.msk [vmem:[#allocation2 + $0x70] sm:$0x3] %vm258_vm2, %v9656_v1 }
  0x66   : > { %274 = vst.msk [vmem:[#allocation2 + $0x88] sm:$0x3] %vm258_vm2, %v9656_v1  ;;  %v7255_v6 = vld [vmem:[#allocation2 + $0xc1] sm:$0xff] }
  0x67   : > { %v6802_v8 = vld [vmem:[#allocation2 + $0xc8] sm:$0xff]  ;;  %277 = vst.msk [vmem:[#allocation2 + $0xa0] sm:$0x3] %vm258_vm2, %v9656_v1 }
  0x68   : > { %v6806_v9 = vld [vmem:[#allocation2 + $0xc9] sm:$0xff]  ;;  %5793 = vmatmul.msk.f32.vlgmr.msra.gmra.mxu2 %vm255_vm1, %v6802_v8  ;;  %280 = vst.msk [vmem:[#allocation2 + $0xb8] sm:$0x3] %vm258_vm2, %v9656_v1 }
  0x69   : > { %5827 = vmatmul.msk.f32.vlgmr.msra.gmra.mxu3 %vm255_vm1, %v6806_v9  ;;  %v627_v10 = vld [vmem:[#allocation2 + $0x9] sm:$0xff]  ;;  %286 = vst.msk [vmem:[#allocation2 + $0xe8] sm:$0x3] %vm258_vm2, %v9656_v1 }
  0x6a   : > { %5811 = vmatmul.msk.f32.gmra.mxu1 %vm255_vm1, %v627_v10  ;;  %289 = vst.msk [vmem:[#allocation2 + $0x100] sm:$0x3] %vm258_vm2, %v9656_v1 }
  0x6b   : > { %292 = vst.msk [vmem:[#allocation2 + $0x118] sm:$0x3] %vm258_vm2, %v9656_v1 }
  0x6c   : > { %295 = vst.msk [vmem:[#allocation2 + $0x130] sm:$0x3] %vm258_vm2, %v9656_v1 }
  0x6d   : > { %298 = vst.msk [vmem:[#allocation2 + $0x148] sm:$0x3] %vm258_vm2, %v9656_v1 }
  0x6e   : > { %301 = vst.msk [vmem:[#allocation2 + $0x160] sm:$0x3] %vm258_vm2, %v9656_v1 }
  0x6f   : > { %304 = vst.msk [vmem:[#allocation2 + $0x178] sm:$0x3] %vm258_vm2, %v9656_v1 }
  0x70   : > { %307 = vst.msk [vmem:[#allocation2 + $0x190] sm:$0x3] %vm258_vm2, %v9656_v1 }
  0x71   : > { %310 = vst.msk [vmem:[#allocation2 + $0x1a8] sm:$0x3] %vm258_vm2, %v9656_v1 }
  0x72   : > { %2885 = vst.msk [vmem:[#allocation3 + $0x10] sm:$0x3] %vm258_vm2, %v9656_v1 }
  0x73   : > { %2888 = vst.msk [vmem:[#allocation3 + $0x28] sm:$0x3] %vm258_vm2, %v9656_v1 }
  0x74   : > { %2891 = vst.msk [vmem:[#allocation3 + $0x40] sm:$0x3] %vm258_vm2, %v9656_v1 }
  0x75   : > { %2894 = vst.msk [vmem:[#allocation3 + $0x58] sm:$0x3] %vm258_vm2, %v9656_v1 }
  0x76   : > { %2897 = vst.msk [vmem:[#allocation3 + $0x70] sm:$0x3] %vm258_vm2, %v9656_v1 }
  0x77   : > { %2900 = vst.msk [vmem:[#allocation3 + $0x88] sm:$0x3] %vm258_vm2, %v9656_v1 }
  0x78   : > { %2903 = vst.msk [vmem:[#allocation3 + $0xa0] sm:$0x3] %vm258_vm2, %v9656_v1 }
  0x79   : > { %2906 = vst.msk [vmem:[#allocation3 + $0xb8] sm:$0x3] %vm258_vm2, %v9656_v1 }
  0x7a   : > { %2909 = vst.msk [vmem:[#allocation3 + $0xd0] sm:$0x3] %vm258_vm2, %v9656_v1 }
  0x7b   : > { %2912 = vst.msk [vmem:[#allocation3 + $0xe8] sm:$0x3] %vm258_vm2, %v9656_v1 }
  0x7c   : > { %2915 = vst.msk [vmem:[#allocation3 + $0x100] sm:$0x3] %vm258_vm2, %v9656_v1 }
  0x7d   : > { %2918 = vst.msk [vmem:[#allocation3 + $0x118] sm:$0x3] %vm258_vm2, %v9656_v1 }
  0x7e   : > { %2921 = vst.msk [vmem:[#allocation3 + $0x130] sm:$0x3] %vm258_vm2, %v9656_v1 }
  0x7f   : > { %2924 = vst.msk [vmem:[#allocation3 + $0x148] sm:$0x3] %vm258_vm2, %v9656_v1 }
  0x80   : > { %2927 = vst.msk [vmem:[#allocation3 + $0x160] sm:$0x3] %vm258_vm2, %v9656_v1 }
  0x81   : > { %2930 = vst.msk [vmem:[#allocation3 + $0x178] sm:$0x3] %vm258_vm2, %v9656_v1 }
  0x82   : > { %9738 = vst [vmem:[#allocation9_spill] sm:$0xff] %v6866_v11 }
  0x83   : > { %2933 = vst.msk [vmem:[#allocation3 + $0x190] sm:$0x3] %vm258_vm2, %v9656_v1 }
  0x84   : > { %9739 = vst [vmem:[#allocation10_spill] sm:$0xff] %v6871_v12 }
  0x85   : > { %2936 = vst.msk [vmem:[#allocation3 + $0x1a8] sm:$0x3] %vm258_vm2, %v9656_v1 }
  0x86   : > { %9740 = vst [vmem:[#allocation11_spill] sm:$0xff] %v6876_v13 }
  0x87   : > { %328 = vst.msk [vmem:[#allocation2 + $0xd9] sm:$0xff] %vm255_vm1, %v6866_v11 }
  0x88   : > { %9741 = vst [vmem:[#allocation12_spill] sm:$0xff] %v6881_v14 }
  0x89   : > { %312 = vst.msk [vmem:[#allocation2 + $0x19] sm:$0xff] %vm255_vm1, %v6871_v12 }
  0x8a   : > { %9742 = vst [vmem:[#allocation13_spill] sm:$0xff] %v6886_v15 }
  0x8b   : > { %329 = vst.msk [vmem:[#allocation2 + $0xe1] sm:$0xff] %vm255_vm1, %v6876_v13 }
  0x8c   : > { %9743 = vst [vmem:[#allocation14_spill] sm:$0xff] %v6891_v16 }
  0x8d   : > { %313 = vst.msk [vmem:[#allocation2 + $0x21] sm:$0xff] %vm255_vm1, %v6881_v14 }
  0x8e   : > { %9744 = vst [vmem:[#allocation15_spill] sm:$0xff] %v6896_v17  ;;  %v6913_v21 = vld [vmem:[#allocation2 + $0xd8] sm:$0xff] }
  0x8f   : > { %330 = vst.msk [vmem:[#allocation2 + $0xf1] sm:$0xff] %vm255_vm1, %v6886_v15  ;;  %v6915_v22 = vld [vmem:[#allocation2 + $0xd9] sm:$0xff]  ;;  %5794 = vmatmul.msk.f32.gmra.mxu2 %vm255_vm1, %v6913_v21  ;;  %v7136_v15 = vld [vmem:[%s6768_s13 + $0xe8] sm:$0xff] }
  0x90   : > { %9745 = vst [vmem:[#allocation16_spill] sm:$0xff] %v6901_v18  ;;  %5828 = vmatmul.msk.f32.gmra.mxu3 %vm255_vm1, %v6915_v22  ;;  %v6926_v24 = vld [vmem:[#allocation2 + $0x18] sm:$0xff] }
  0x91   : > { %314 = vst.msk [vmem:[#allocation2 + $0x31] sm:$0xff] %vm255_vm1, %v6891_v16  ;;  %v6928_v25 = vld [vmem:[#allocation2 + $0x19] sm:$0xff]  ;;  %5778 = vmatmul.msk.f32.gmra.mxu0 %vm255_vm1, %v6926_v24  ;;  %v5910_v16 = vld [vmem:[%s9651_s1 + $0x10] sm:$0xf] }
  0x92   : > { %9746 = vst [vmem:[#allocation17_spill] sm:$0xff] %v6906_v19  ;;  %5812 = vmatmul.msk.f32.gmra.mxu1 %vm255_vm1, %v6928_v25  ;;  %v6945_v27 = vld [vmem:[#allocation2 + $0xe0] sm:$0xff]  ;;  %5911 = vmatpush.msk.msrb.mxu0 %vm477_vm0, %v5910_v16 }
  0x93   : > { %331 = vst.msk [vmem:[#allocation2 + $0xf9] sm:$0xff] %vm255_vm1, %v6896_v17  ;;  %v6947_v28 = vld [vmem:[#allocation2 + $0xe1] sm:$0xff] }
  0x94   : > { %9747 = vst [vmem:[#allocation18_spill] sm:$0xff] %v6911_v20  ;;  %v6949_v29 = vld [vmem:[#allocation2 + $0x20] sm:$0xff]  ;;  %v7149_v17 = vld [vmem:[%s6768_s13 + $0x68] sm:$0xff] }
  0x95   : > { %315 = vst.msk [vmem:[#allocation2 + $0x39] sm:$0xff] %vm255_vm1, %v6901_v18  ;;  %v6951_v30 = vld [vmem:[#allocation2 + $0x21] sm:$0xff]  ;;  %v5944_v18 = vld [vmem:[%s9651_s1 + $0x14] sm:$0xf] }
  0x96   : > { %9748 = vst [vmem:[#allocation19_spill] sm:$0xff] %v6920_v23  ;;  %v6971_v33 = vld [vmem:[#allocation2 + $0xf0] sm:$0xff]  ;;  %5945 = vmatpush.msk.msrb.mxu1 %vm477_vm0, %v5944_v18 }
  0x97   : > { %332 = vst.msk [vmem:[#allocation2 + $0x109] sm:$0xff] %vm255_vm1, %v6906_v19  ;;  %5795 = vmatmul.msk.f32.gmra.mxu2 %vm255_vm1, %v6945_v27  ;;  %v6973_v34 = vld [vmem:[#allocation2 + $0xf1] sm:$0xff] }
  0x98   : > { %316 = vst.msk [vmem:[#allocation2 + $0x49] sm:$0xff] %vm255_vm1, %v6911_v20  ;;  %5829 = vmatmul.msk.f32.gmra.mxu3 %vm255_vm1, %v6947_v28  ;;  %v6975_v35 = vld [vmem:[#allocation2 + $0x30] sm:$0xff] }
  0x99   : > { %9749 = vst [vmem:[#allocation20_spill] sm:$0xff] %v6939_v26  ;;  %5779 = vmatmul.msk.f32.gmra.mxu0 %vm255_vm1, %v6949_v29  ;;  %v6977_v36 = vld [vmem:[#allocation2 + $0x31] sm:$0xff] }
  0x9a   : > { %333 = vst.msk [vmem:[#allocation2 + $0x111] sm:$0xff] %vm255_vm1, %v6920_v23  ;;  %5813 = vmatmul.msk.f32.gmra.mxu1 %vm255_vm1, %v6951_v30  ;;  %v6997_v39 = vld [vmem:[#allocation2 + $0xf8] sm:$0xff] }
  0x9b   : > { %317 = vst.msk [vmem:[#allocation2 + $0x51] sm:$0xff] %vm255_vm1, %v6939_v26  ;;  %v6999_v40 = vld [vmem:[#allocation2 + $0xf9] sm:$0xff] }
  0x9c   : > { %9750 = vst [vmem:[#allocation21_spill] sm:$0xff] %v6954_v31  ;;  %v7001_v41 = vld [vmem:[#allocation2 + $0x38] sm:$0xff] }
  0x9d   : > { %334 = vst.msk [vmem:[#allocation2 + $0x121] sm:$0xff] %vm255_vm1, %v6954_v31  ;;  %v7003_v42 = vld [vmem:[#allocation2 + $0x39] sm:$0xff] }
  0x9e   : > { %9751 = vst [vmem:[#allocation22_spill] sm:$0xff] %v6967_v32  ;;  %v7023_v45 = vld [vmem:[#allocation2 + $0x108] sm:$0xff] }
  0x9f   : > { %318 = vst.msk [vmem:[#allocation2 + $0x61] sm:$0xff] %vm255_vm1, %v6967_v32  ;;  %5796 = vmatmul.msk.f32.gmra.mxu2 %vm255_vm1, %v6971_v33  ;;  %v7025_v46 = vld [vmem:[#allocation2 + $0x109] sm:$0xff] }
  0xa0   : > { %9752 = vst [vmem:[#allocation23_spill] sm:$0xff] %v6980_v37  ;;  %5830 = vmatmul.msk.f32.gmra.mxu3 %vm255_vm1, %v6973_v34  ;;  %v7027_v47 = vld [vmem:[#allocation2 + $0x48] sm:$0xff] }
  0xa1   : > { %335 = vst.msk [vmem:[#allocation2 + $0x129] sm:$0xff] %vm255_vm1, %v6980_v37  ;;  %5780 = vmatmul.msk.f32.gmra.mxu0 %vm255_vm1, %v6975_v35  ;;  %v7029_v48 = vld [vmem:[#allocation2 + $0x49] sm:$0xff]  ;;  %v7051_v52 = vld [vmem:[#allocation2 + $0x111] sm:$0xff] }
  0xa2   : > { %5814 = vmatmul.msk.f32.gmra.mxu1 %vm255_vm1, %v6977_v36  ;;  %9753 = vst [vmem:[#allocation24_spill] sm:$0xff] %v6993_v38  ;;  %v7049_v51 = vld [vmem:[#allocation2 + $0x110] sm:$0xff] }
  0xa3   : > { %319 = vst.msk [vmem:[#allocation2 + $0x69] sm:$0xff] %vm255_vm1, %v6993_v38  ;;  %v7053_v53 = vld [vmem:[#allocation2 + $0x50] sm:$0xff] }
  0xa4   : > { %9754 = vst [vmem:[#allocation25_spill] sm:$0xff] %v7006_v43  ;;  %v7055_v54 = vld [vmem:[#allocation2 + $0x51] sm:$0xff]  ;;  %v7075_v57 = vld [vmem:[#allocation2 + $0x120] sm:$0xff] }
  0xa5   : > { %336 = vst.msk [vmem:[#allocation2 + $0x139] sm:$0xff] %vm255_vm1, %v7006_v43  ;;  %v7077_v58 = vld [vmem:[#allocation2 + $0x121] sm:$0xff] }
  0xa6   : > { %9755 = vst [vmem:[#allocation26_spill] sm:$0xff] %v7019_v44  ;;  %v7079_v59 = vld [vmem:[#allocation2 + $0x60] sm:$0xff]  ;;  %v5842_v43 = vld [vmem:[%s9651_s1 + $0x8] sm:$0xf] }
  0xa7   : > { %5797 = vmatmul.msk.f32.gmra.mxu2 %vm255_vm1, %v6997_v39  ;;  %320 = vst.msk [vmem:[#allocation2 + $0x79] sm:$0xff] %vm255_vm1, %v7019_v44  ;;  %v7081_v60 = vld [vmem:[#allocation2 + $0x61] sm:$0xff] }
  0xa8   : > { %5831 = vmatmul.msk.f32.gmra.mxu3 %vm255_vm1, %v6999_v40  ;;  %9756 = vst [vmem:[#allocation27_spill] sm:$0xff] %v7032_v49  ;;  %v7101_v63 = vld [vmem:[#allocation2 + $0x128] sm:$0xff]  ;;  %5843 = vmatpush.msk.msrb.mxu2 %vm477_vm0, %v5842_v43 }
  0xa9   : > { %5781 = vmatmul.msk.f32.gmra.mxu0 %vm255_vm1, %v7001_v41  ;;  %337 = vst.msk [vmem:[#allocation2 + $0x141] sm:$0xff] %vm255_vm1, %v7032_v49  ;;  %v7103_v0 = vld [vmem:[#allocation2 + $0x129] sm:$0xff] }
  0xaa   : > { %5815 = vmatmul.msk.f32.gmra.mxu1 %vm255_vm1, %v7003_v42  ;;  %9757 = vst [vmem:[#allocation28_spill] sm:$0xff] %v7045_v50  ;;  %v7105_v2 = vld [vmem:[#allocation2 + $0x68] sm:$0xff] }
  0xab   : > { %321 = vst.msk [vmem:[#allocation2 + $0x81] sm:$0xff] %vm255_vm1, %v7045_v50  ;;  %v7107_v3 = vld [vmem:[#allocation2 + $0x69] sm:$0xff] }
  0xac   : > { %9758 = vst [vmem:[#allocation29_spill] sm:$0xff] %v7058_v55  ;;  %v7127_v10 = vld [vmem:[#allocation2 + $0x138] sm:$0xff]  ;;  %v5876_v49 = vld [vmem:[%s9651_s1 + $0xc] sm:$0xf] }
  0xad   : > { %338 = vst.msk [vmem:[#allocation2 + $0x151] sm:$0xff] %vm255_vm1, %v7058_v55  ;;  %v7129_v1 = vld [vmem:[#allocation2 + $0x139] sm:$0xff]  ;;  %5877 = vmatpush.msk.msrb.mxu3 %vm477_vm0, %v5876_v49 }
  0xae   : > { %9759 = vst [vmem:[#allocation30_spill] sm:$0xff] %v7071_v56  ;;  %v7131_v11 = vld [vmem:[#allocation2 + $0x78] sm:$0xff] }
  0xaf   : > { %5798 = vmatmul.msk.f32.gmra.mxu2 %vm255_vm1, %v7023_v45  ;;  %322 = vst.msk [vmem:[#allocation2 + $0x91] sm:$0xff] %vm255_vm1, %v7071_v56  ;;  %v7133_v13 = vld [vmem:[#allocation2 + $0x79] sm:$0xff]  ;;  %v7249_v56 = vpop.f32.mrf.mxu0 }
  0xb0   : > { %5832 = vmatmul.msk.f32.gmra.mxu3 %vm255_vm1, %v7025_v46  ;;  %9760 = vst [vmem:[#allocation31_spill] sm:$0xff] %v7084_v61  ;;  %v7153_v19 = vld [vmem:[#allocation2 + $0x140] sm:$0xff] }
  0xb1   : > { %5782 = vmatmul.msk.f32.gmra.mxu0 %vm255_vm1, %v7027_v47  ;;  %339 = vst.msk [vmem:[#allocation2 + $0x159] sm:$0xff] %vm255_vm1, %v7084_v61  ;;  %v7155_v23 = vld [vmem:[#allocation2 + $0x141] sm:$0xff] }
  0xb2   : > { %5816 = vmatmul.msk.f32.gmra.mxu1 %vm255_vm1, %v7029_v48  ;;  %9761 = vst [vmem:[#allocation32_spill] sm:$0xff] %v7097_v62  ;;  %v7157_v31 = vld [vmem:[#allocation2 + $0x80] sm:$0xff] }
  0xb3   : > { %323 = vst.msk [vmem:[#allocation2 + $0x99] sm:$0xff] %vm255_vm1, %v7097_v62  ;;  %v7159_v37 = vld [vmem:[#allocation2 + $0x81] sm:$0xff]  ;;  %v7251_v62 = vpop.f32.mrf.mxu1 }
  0xb4   : > { %9762 = vst [vmem:[#allocation33_spill] sm:$0xff] %v7110_v4  ;;  %v7177_v55 = vld [vmem:[#allocation2 + $0x150] sm:$0xff] }
  0xb5   : > { %340 = vst.msk [vmem:[#allocation2 + $0x169] sm:$0xff] %vm255_vm1, %v7110_v4  ;;  %v7179_v61 = vld [vmem:[#allocation2 + $0x151] sm:$0xff] }
  0xb6   : > { %9763 = vst [vmem:[#allocation34_spill] sm:$0xff] %v7123_v5  ;;  %v7181_v4 = vld [vmem:[#allocation2 + $0x90] sm:$0xff] }
  0xb7   : > { %5799 = vmatmul.msk.f32.gmra.mxu2 %vm255_vm1, %v7049_v51  ;;  %324 = vst.msk [vmem:[#allocation2 + $0xa9] sm:$0xff] %vm255_vm1, %v7123_v5  ;;  %v904_v5 = vld [vmem:[#allocation2 + $0x2] sm:$0xff]  ;;  %v7264_v7 = vpop.f32.mrf.mxu0 }
  0xb8   : > { %5833 = vmatmul.msk.f32.gmra.mxu3 %vm255_vm1, %v7051_v52  ;;  %9764 = vst [vmem:[#allocation35_spill] sm:$0xff] %v7136_v15  ;;  %v7193_v43 = vld [vmem:[#allocation2 + $0x158] sm:$0xff] }
  0xb9   : > { %5783 = vmatmul.msk.f32.gmra.mxu0 %vm255_vm1, %v7053_v53  ;;  %341 = vst.msk [vmem:[#allocation2 + $0x171] sm:$0xff] %vm255_vm1, %v7136_v15  ;;  %v7183_v15 = vld [vmem:[#allocation2 + $0x91] sm:$0xff]  ;;  %v7195_v49 = vld [vmem:[#allocation2 + $0x159] sm:$0xff] }
  0xba   : > { %5817 = vmatmul.msk.f32.gmra.mxu1 %vm255_vm1, %v7055_v54  ;;  %9765 = vst [vmem:[#allocation36_spill] sm:$0xff] %v7149_v17  ;;  %v7197_v12 = vld [vmem:[#allocation2 + $0x98] sm:$0xff] }
  0xbb   : > { %325 = vst.msk [vmem:[#allocation2 + $0xb1] sm:$0xff] %vm255_vm1, %v7149_v17  ;;  %v7199_v14 = vld [vmem:[#allocation2 + $0x99] sm:$0xff] }
  0xbc   : > { %9766 = vst [vmem:[#allocation37_spill] sm:$0xff] %v7155_v23  ;;  %v7217_v20 = vld [vmem:[#allocation2 + $0x168] sm:$0xff]  ;;  %v7253_v17 = vld [vmem:[#allocation2 + $0xc0] sm:$0xff] }
  0xbd   : > { %9767 = vst [vmem:[#allocation38_spill] sm:$0xff] %v7179_v61  ;;  %v7219_v26 = vld [vmem:[#allocation2 + $0x169] sm:$0xff] }
  0xbe   : > { %9768 = vst [vmem:[#allocation39_spill] sm:$0xff] %v7193_v43  ;;  %v7221_v32 = vld [vmem:[#allocation2 + $0xa8] sm:$0xff] }
  0xbf   : > { %5800 = vmatmul.msk.f32.gmra.mxu2 %vm255_vm1, %v7075_v57  ;;  %9769 = vst [vmem:[#allocation40_spill] sm:$0xff] %v7195_v49  ;;  %v7223_v38 = vld [vmem:[#allocation2 + $0xa9] sm:$0xff] }
  0xc0   : > { %5834 = vmatmul.msk.f32.gmra.mxu3 %vm255_vm1, %v7077_v58  ;;  %9770 = vst [vmem:[#allocation41_spill] sm:$0xff] %v7217_v20  ;;  %v7233_v16 = vld [vmem:[#allocation2 + $0x170] sm:$0xff] }
  0xc1   : > { %5784 = vmatmul.msk.f32.gmra.mxu0 %vm255_vm1, %v7079_v59  ;;  %9771 = vst [vmem:[#allocation42_spill] sm:$0xff] %v7219_v26  ;;  %v7235_v18 = vld [vmem:[#allocation2 + $0x171] sm:$0xff] }
  0xc2   : > { %5818 = vmatmul.msk.f32.gmra.mxu1 %vm255_vm1, %v7081_v60  ;;  %9772 = vst [vmem:[#allocation43_spill] sm:$0xff] %v7233_v16  ;;  %v7237_v44 = vld [vmem:[#allocation2 + $0xb0] sm:$0xff] }
  0xc3   : > { %9773 = vst [vmem:[#allocation44_spill] sm:$0xff] %v7235_v18  ;;  %v7239_v50 = vld [vmem:[#allocation2 + $0xb1] sm:$0xff] }
  0xc7   : > { %5801 = vmatmul.msk.f32.gmra.mxu2 %vm255_vm1, %v7101_v63 }
  0xc8   : > { %5835 = vmatmul.msk.f32.gmra.mxu3 %vm255_vm1, %v7103_v0 }
  0xc9   : > { %5785 = vmatmul.msk.f32.gmra.mxu0 %vm255_vm1, %v7105_v2 }
  0xca   : > { %5819 = vmatmul.msk.f32.gmra.mxu1 %vm255_vm1, %v7107_v3 }
  0xcf   : > { %5802 = vmatmul.msk.f32.gmra.mxu2 %vm255_vm1, %v7127_v10 }
  0xd0   : > { %5836 = vmatmul.msk.f32.gmra.mxu3 %vm255_vm1, %v7129_v1 }
  0xd1   : > { %5786 = vmatmul.msk.f32.gmra.mxu0 %vm255_vm1, %v7131_v11 }
  0xd2   : > { %5820 = vmatmul.msk.f32.gmra.mxu1 %vm255_vm1, %v7133_v13 }
  0xd7   : > { %5803 = vmatmul.msk.f32.gmra.mxu2 %vm255_vm1, %v7153_v19 }
  0xd8   : > { %5837 = vmatmul.msk.f32.gmra.mxu3 %vm255_vm1, %v7155_v23 }
  0xd9   : > { %5787 = vmatmul.msk.f32.gmra.mxu0 %vm255_vm1, %v7157_v31 }
  0xda   : > { %5821 = vmatmul.msk.f32.gmra.mxu1 %vm255_vm1, %v7159_v37 }
  0xdf   : > { %5804 = vmatmul.msk.f32.gmra.mxu2 %vm255_vm1, %v7177_v55 }
  0xe0   : > { %5838 = vmatmul.msk.f32.gmra.mxu3 %vm255_vm1, %v7179_v61  ;;  %v1739_v61 = vld [vmem:[#allocation2 + $0x22] sm:$0xff] }
  0xe1   : > { %5788 = vmatmul.msk.f32.gmra.mxu0 %vm255_vm1, %v7181_v4 }
  0xe2   : > { %5822 = vmatmul.msk.f32.gmra.mxu1 %vm255_vm1, %v7183_v15 }
  0xe7   : > { %5805 = vmatmul.msk.f32.gmra.mxu2 %vm255_vm1, %v7193_v43 }
  0xe8   : > { %5839 = vmatmul.msk.f32.gmra.mxu3 %vm255_vm1, %v7195_v49 }
  0xe9   : > { %5789 = vmatmul.msk.f32.gmra.mxu0 %vm255_vm1, %v7197_v12 }
  0xea   : > { %5823 = vmatmul.msk.f32.gmra.mxu1 %vm255_vm1, %v7199_v14 }
  0xef   : > { %5806 = vmatmul.msk.f32.gmra.mxu2 %vm255_vm1, %v7217_v20 }
  0xf0   : > { %5840 = vmatmul.msk.f32.gmra.mxu3 %vm255_vm1, %v7219_v26  ;;  %v905_v26 = vld [vmem:[#allocation2 + $0xa] sm:$0xff] }
  0xf1   : > { %5790 = vmatmul.msk.f32.gmra.mxu0 %vm255_vm1, %v7221_v32 }
  0xf2   : > { %5824 = vmatmul.msk.f32.gmra.mxu1 %vm255_vm1, %v7223_v38 }
  0xf7   : > { %5807 = vmatmul.msk.f32.gmra.mxu2 %vm255_vm1, %v7233_v16  ;;  %v1738_v16 = vld [vmem:[#allocation2 + $0x1a] sm:$0xff] }
  0xf8   : > { %5841 = vmatmul.msk.f32.gmra.mxu3 %vm255_vm1, %v7235_v18  ;;  %v7266_v18 = vpop.f32.mrf.mxu1 }
  0xf9   : > { %5791 = vmatmul.msk.f32.gmra.mxu0 %vm255_vm1, %v7237_v44 }
  0xfa   : > { %5825 = vmatmul.msk.f32.gmra.mxu1 %vm255_vm1, %v7239_v50 }
  0xff   : > { %5844 = vmatmul.msk.f32.vlgmr.msrb.gmra.mxu2 %vm255_vm1, %v904_v5  ;;  %v7275_v5 = vpop.f32.mrf.mxu3 }
 0x100   : > { %5878 = vmatmul.msk.f32.vlgmr.msrb.gmra.mxu3 %vm255_vm1, %v6926_v24  ;;  %v7273_v24 = vpop.f32.mrf.mxu2  ;;  %9775 = vst [vmem:[#allocation46_spill] sm:$0xff] %v7275_v5 }
 0x101   : > { %5792 = vmatmul.msk.f32.gmra.mxu0 %vm255_vm1, %v7253_v17  ;;  %9774 = vst [vmem:[#allocation45_spill] sm:$0xff] %v7273_v24 }
 0x102   : > { %5826 = vmatmul.msk.f32.gmra.mxu1 %vm255_vm1, %v7255_v6 }
 0x107   : > { %5845 = vmatmul.msk.f32.gmra.mxu2 %vm255_vm1, %v905_v26 }
 0x108   : > { %5879 = vmatmul.msk.f32.gmra.mxu3 %vm255_vm1, %v6949_v29 }
 0x109   : > { %5912 = vmatmul.msk.f32.vlgmr.msrb.gmra.mxu0 %vm255_vm1, %v6928_v25  ;;  %v7291_v25 = vld [vmem:[%s9652_s2] ss:$0 sm:$0xff] }
 0x10a   : > { %5946 = vmatmul.msk.f32.vlgmr.msrb.gmra.mxu1 %vm255_vm1, %v1738_v16 }
 0x10e   : > { %v7278_v49 = vpop.f32.mrf.mxu0 }
 0x10f   : > { %v7280_v20 = vpop.f32.mrf.mxu1  ;;  %5846 = vmatmul.msk.f32.gmra.mxu2 %vm255_vm1, %v1738_v16 }
 0x110   : > { %5880 = vmatmul.msk.f32.gmra.mxu3 %vm255_vm1, %v6975_v35  ;;  %v7300_v35 = vld [vmem:[#allocation2 + $0x32] sm:$0xff] }
 0x111   : > { %5913 = vmatmul.msk.f32.gmra.mxu0 %vm255_vm1, %v6951_v30  ;;  %9777 = vst [vmem:[#allocation48_spill] sm:$0xff] %v7300_v35 }
 0x112   : > { %5947 = vmatmul.msk.f32.gmra.mxu1 %vm255_vm1, %v1739_v61  ;;  %v552_v26 = vpop.f32.mrf.mxu2 }
 0x113   : > { %v830_v29 = vpop.f32.mrf.mxu3  ;;  %v612_v5 = vadd.f32 %v7291_v25, %v552_v26 }
 0x115   : > { %v7294_v24 = vadd.f32 %v830_v29, %v612_v5 }
 0x116   : > { %v7296_v16 = vpop.f32.mrf.mxu0 }
 0x117   : > { %9776 = vst [vmem:[#allocation47_spill] sm:$0xff] %v7294_v24  ;;  %v7298_v43 = vpop.f32.mrf.mxu1  ;;  %5847 = vmatmul.msk.f32.gmra.mxu2 %vm255_vm1, %v1739_v61  ;;  %v7316_v61 = vld [vmem:[#allocation2 + $0x3a] sm:$0xff] }
 0x118   : > { %5881 = vmatmul.msk.f32.gmra.mxu3 %vm255_vm1, %v7001_v41  ;;  %9779 = vst [vmem:[#allocation50_spill] sm:$0xff] %v7316_v61 }
 0x119   : > { %5914 = vmatmul.msk.f32.gmra.mxu0 %vm255_vm1, %v6977_v36 }
 0x11a   : > { %5948 = vmatmul.msk.f32.gmra.mxu1 %vm255_vm1, %v7300_v35  ;;  %v555_v30 = vpop.f32.mrf.mxu2 }
 0x11b   : > { %v833_v5 = vpop.f32.mrf.mxu3  ;;  %v613_v26 = vadd.f32 %v7291_v25, %v555_v30 }
 0x11d   : > { %v7310_v29 = vadd.f32 %v833_v5, %v613_v26 }
 0x11e   : > { %v7312_v24 = vpop.f32.mrf.mxu0 }
 0x11f   : > { %9778 = vst [vmem:[#allocation49_spill] sm:$0xff] %v7310_v29  ;;  %v7314_v23 = vpop.f32.mrf.mxu1  ;;  %5848 = vmatmul.msk.f32.gmra.mxu2 %vm255_vm1, %v7300_v35  ;;  %v7333_v35 = vld [vmem:[#allocation2 + $0x4a] sm:$0xff] }
 0x120   : > { %5882 = vmatmul.msk.f32.gmra.mxu3 %vm255_vm1, %v7027_v47  ;;  %9781 = vst [vmem:[#allocation52_spill] sm:$0xff] %v7333_v35 }
 0x121   : > { %5915 = vmatmul.msk.f32.gmra.mxu0 %vm255_vm1, %v7003_v42 }
 0x122   : > { %5949 = vmatmul.msk.f32.gmra.mxu1 %vm255_vm1, %v7316_v61  ;;  %v558_v36 = vpop.f32.mrf.mxu2 }
 0x123   : > { %v836_v41 = vpop.f32.mrf.mxu3  ;;  %v614_v30 = vadd.f32 %v7291_v25, %v558_v36 }
 0x125   : > { %v7327_v5 = vadd.f32 %v836_v41, %v614_v30 }
 0x126   : > { %v7329_v26 = vpop.f32.mrf.mxu0 }
 0x127   : > { %9780 = vst [vmem:[#allocation51_spill] sm:$0xff] %v7327_v5  ;;  %v7331_v29 = vpop.f32.mrf.mxu1  ;;  %5849 = vmatmul.msk.f32.gmra.mxu2 %vm255_vm1, %v7316_v61  ;;  %v7350_v61 = vld [vmem:[#allocation2 + $0x52] sm:$0xff] }
 0x128   : > { %5883 = vmatmul.msk.f32.gmra.mxu3 %vm255_vm1, %v7053_v53  ;;  %9783 = vst [vmem:[#allocation54_spill] sm:$0xff] %v7350_v61 }
 0x129   : > { %5916 = vmatmul.msk.f32.gmra.mxu0 %vm255_vm1, %v7029_v48 }
 0x12a   : > { %5950 = vmatmul.msk.f32.gmra.mxu1 %vm255_vm1, %v7333_v35  ;;  %v561_v42 = vpop.f32.mrf.mxu2 }
 0x12b   : > { %v839_v47 = vpop.f32.mrf.mxu3  ;;  %v615_v36 = vadd.f32 %v7291_v25, %v561_v42 }
 0x12d   : > { %v7344_v41 = vadd.f32 %v839_v47, %v615_v36 }
 0x12e   : > { %v7346_v30 = vpop.f32.mrf.mxu0 }
 0x12f   : > { %9782 = vst [vmem:[#allocation53_spill] sm:$0xff] %v7344_v41  ;;  %v7348_v5 = vpop.f32.mrf.mxu1  ;;  %5850 = vmatmul.msk.f32.gmra.mxu2 %vm255_vm1, %v7333_v35  ;;  %v7367_v35 = vld [vmem:[#allocation2 + $0x62] sm:$0xff] }
 0x130   : > { %5884 = vmatmul.msk.f32.gmra.mxu3 %vm255_vm1, %v7079_v59  ;;  %9785 = vst [vmem:[#allocation56_spill] sm:$0xff] %v7367_v35 }
 0x131   : > { %5917 = vmatmul.msk.f32.gmra.mxu0 %vm255_vm1, %v7055_v54 }
 0x132   : > { %5951 = vmatmul.msk.f32.gmra.mxu1 %vm255_vm1, %v7350_v61  ;;  %v564_v48 = vpop.f32.mrf.mxu2 }
 0x133   : > { %v842_v53 = vpop.f32.mrf.mxu3  ;;  %v616_v42 = vadd.f32 %v7291_v25, %v564_v48 }
 0x135   : > { %v7361_v47 = vadd.f32 %v842_v53, %v616_v42 }
 0x136   : > { %v7363_v36 = vpop.f32.mrf.mxu0 }
 0x137   : > { %9784 = vst [vmem:[#allocation55_spill] sm:$0xff] %v7361_v47  ;;  %v7365_v41 = vpop.f32.mrf.mxu1  ;;  %5851 = vmatmul.msk.f32.gmra.mxu2 %vm255_vm1, %v7350_v61  ;;  %v7384_v61 = vld [vmem:[#allocation2 + $0x6a] sm:$0xff] }
 0x138   : > { %5885 = vmatmul.msk.f32.gmra.mxu3 %vm255_vm1, %v7105_v2  ;;  %9787 = vst [vmem:[#allocation58_spill] sm:$0xff] %v7384_v61 }
 0x139   : > { %5918 = vmatmul.msk.f32.gmra.mxu0 %vm255_vm1, %v7081_v60 }
 0x13a   : > { %5952 = vmatmul.msk.f32.gmra.mxu1 %vm255_vm1, %v7367_v35  ;;  %v567_v54 = vpop.f32.mrf.mxu2 }
 0x13b   : > { %v845_v59 = vpop.f32.mrf.mxu3  ;;  %v617_v48 = vadd.f32 %v7291_v25, %v567_v54 }
 0x13d   : > { %v7378_v53 = vadd.f32 %v845_v59, %v617_v48 }
 0x13e   : > { %v7380_v42 = vpop.f32.mrf.mxu0 }
 0x13f   : > { %9786 = vst [vmem:[#allocation57_spill] sm:$0xff] %v7378_v53  ;;  %v7382_v47 = vpop.f32.mrf.mxu1  ;;  %5852 = vmatmul.msk.f32.gmra.mxu2 %vm255_vm1, %v7367_v35  ;;  %v7401_v35 = vld [vmem:[#allocation2 + $0x7a] sm:$0xff] }
 0x140   : > { %5886 = vmatmul.msk.f32.gmra.mxu3 %vm255_vm1, %v7131_v11  ;;  %9789 = vst [vmem:[#allocation60_spill] sm:$0xff] %v7401_v35 }
 0x141   : > { %5919 = vmatmul.msk.f32.gmra.mxu0 %vm255_vm1, %v7107_v3 }
 0x142   : > { %5953 = vmatmul.msk.f32.gmra.mxu1 %vm255_vm1, %v7384_v61  ;;  %v570_v60 = vpop.f32.mrf.mxu2 }
 0x143   : > { %v848_v2 = vpop.f32.mrf.mxu3  ;;  %v618_v54 = vadd.f32 %v7291_v25, %v570_v60 }
 0x145   : > { %v7395_v59 = vadd.f32 %v848_v2, %v618_v54 }
 0x146   : > { %v7397_v48 = vpop.f32.mrf.mxu0 }
 0x147   : > { %9788 = vst [vmem:[#allocation59_spill] sm:$0xff] %v7395_v59  ;;  %v7399_v53 = vpop.f32.mrf.mxu1  ;;  %5853 = vmatmul.msk.f32.gmra.mxu2 %vm255_vm1, %v7384_v61  ;;  %v7418_v61 = vld [vmem:[#allocation2 + $0x82] sm:$0xff] }
 0x148   : > { %5887 = vmatmul.msk.f32.gmra.mxu3 %vm255_vm1, %v7157_v31  ;;  %9791 = vst [vmem:[#allocation62_spill] sm:$0xff] %v7418_v61 }
 0x149   : > { %5920 = vmatmul.msk.f32.gmra.mxu0 %vm255_vm1, %v7133_v13 }
 0x14a   : > { %5954 = vmatmul.msk.f32.gmra.mxu1 %vm255_vm1, %v7401_v35  ;;  %v573_v11 = vpop.f32.mrf.mxu2 }
 0x14b   : > { %v851_v3 = vpop.f32.mrf.mxu3  ;;  %v619_v60 = vadd.f32 %v7291_v25, %v573_v11 }
 0x14d   : > { %v7412_v2 = vadd.f32 %v851_v3, %v619_v60 }
 0x14e   : > { %v7414_v54 = vpop.f32.mrf.mxu0 }
 0x14f   : > { %9790 = vst [vmem:[#allocation61_spill] sm:$0xff] %v7412_v2  ;;  %v7416_v59 = vpop.f32.mrf.mxu1  ;;  %5854 = vmatmul.msk.f32.gmra.mxu2 %vm255_vm1, %v7401_v35  ;;  %v7435_v35 = vld [vmem:[#allocation2 + $0x92] sm:$0xff] }
 0x150   : > { %5888 = vmatmul.msk.f32.gmra.mxu3 %vm255_vm1, %v7181_v4  ;;  %9793 = vst [vmem:[#allocation64_spill] sm:$0xff] %v7435_v35 }
 0x151   : > { %5921 = vmatmul.msk.f32.gmra.mxu0 %vm255_vm1, %v7159_v37 }
 0x152   : > { %5955 = vmatmul.msk.f32.gmra.mxu1 %vm255_vm1, %v7418_v61  ;;  %v576_v13 = vpop.f32.mrf.mxu2 }
 0x153   : > { %v854_v31 = vpop.f32.mrf.mxu3  ;;  %v620_v11 = vadd.f32 %v7291_v25, %v576_v13 }
 0x155   : > { %v7429_v3 = vadd.f32 %v854_v31, %v620_v11 }
 0x156   : > { %v7431_v60 = vpop.f32.mrf.mxu0 }
 0x157   : > { %9792 = vst [vmem:[#allocation63_spill] sm:$0xff] %v7429_v3  ;;  %v7433_v2 = vpop.f32.mrf.mxu1  ;;  %5855 = vmatmul.msk.f32.gmra.mxu2 %vm255_vm1, %v7418_v61  ;;  %v7452_v61 = vld [vmem:[#allocation2 + $0x9a] sm:$0xff] }
 0x158   : > { %5889 = vmatmul.msk.f32.gmra.mxu3 %vm255_vm1, %v7197_v12  ;;  %9795 = vst [vmem:[#allocation66_spill] sm:$0xff] %v7452_v61 }
 0x159   : > { %5922 = vmatmul.msk.f32.gmra.mxu0 %vm255_vm1, %v7183_v15 }
 0x15a   : > { %5956 = vmatmul.msk.f32.gmra.mxu1 %vm255_vm1, %v7435_v35  ;;  %v579_v37 = vpop.f32.mrf.mxu2 }
 0x15b   : > { %v857_v4 = vpop.f32.mrf.mxu3  ;;  %v621_v13 = vadd.f32 %v7291_v25, %v579_v37 }
 0x15d   : > { %v7446_v31 = vadd.f32 %v857_v4, %v621_v13 }
 0x15e   : > { %v7448_v11 = vpop.f32.mrf.mxu0 }
 0x15f   : > { %9794 = vst [vmem:[#allocation65_spill] sm:$0xff] %v7446_v31  ;;  %v7450_v3 = vpop.f32.mrf.mxu1  ;;  %5856 = vmatmul.msk.f32.gmra.mxu2 %vm255_vm1, %v7435_v35  ;;  %v7469_v35 = vld [vmem:[#allocation2 + $0xaa] sm:$0xff] }
 0x160   : > { %5890 = vmatmul.msk.f32.gmra.mxu3 %vm255_vm1, %v7221_v32  ;;  %9797 = vst [vmem:[#allocation68_spill] sm:$0xff] %v7469_v35 }
 0x161   : > { %5923 = vmatmul.msk.f32.gmra.mxu0 %vm255_vm1, %v7199_v14 }
 0x162   : > { %5957 = vmatmul.msk.f32.gmra.mxu1 %vm255_vm1, %v7452_v61  ;;  %v582_v12 = vpop.f32.mrf.mxu2 }
 0x163   : > { %v860_v15 = vpop.f32.mrf.mxu3  ;;  %v622_v37 = vadd.f32 %v7291_v25, %v582_v12 }
 0x165   : > { %v7463_v4 = vadd.f32 %v860_v15, %v622_v37 }
 0x166   : > { %v7465_v13 = vpop.f32.mrf.mxu0 }
 0x167   : > { %9796 = vst [vmem:[#allocation67_spill] sm:$0xff] %v7463_v4  ;;  %v7467_v31 = vpop.f32.mrf.mxu1  ;;  %5857 = vmatmul.msk.f32.gmra.mxu2 %vm255_vm1, %v7452_v61  ;;  %v7486_v61 = vld [vmem:[#allocation2 + $0xb2] sm:$0xff] }
 0x168   : > { %5891 = vmatmul.msk.f32.gmra.mxu3 %vm255_vm1, %v7237_v44  ;;  %9799 = vst [vmem:[#allocation70_spill] sm:$0xff] %v7486_v61 }
 0x169   : > { %5924 = vmatmul.msk.f32.gmra.mxu0 %vm255_vm1, %v7223_v38 }
 0x16a   : > { %5958 = vmatmul.msk.f32.gmra.mxu1 %vm255_vm1, %v7469_v35  ;;  %v585_v14 = vpop.f32.mrf.mxu2 }
 0x16b   : > { %v863_v32 = vpop.f32.mrf.mxu3  ;;  %v623_v12 = vadd.f32 %v7291_v25, %v585_v14 }
 0x16d   : > { %v7480_v15 = vadd.f32 %v863_v32, %v623_v12 }
 0x16e   : > { %v7482_v37 = vpop.f32.mrf.mxu0 }
 0x16f   : > { %9798 = vst [vmem:[#allocation69_spill] sm:$0xff] %v7480_v15  ;;  %v7484_v4 = vpop.f32.mrf.mxu1  ;;  %5858 = vmatmul.msk.f32.gmra.mxu2 %vm255_vm1, %v7469_v35  ;;  %v7503_v35 = vld [vmem:[#allocation2 + $0xc2] sm:$0xff] }
 0x170   : > { %5892 = vmatmul.msk.f32.gmra.mxu3 %vm255_vm1, %v7253_v17  ;;  %9801 = vst [vmem:[#allocation72_spill] sm:$0xff] %v7503_v35 }
 0x171   : > { %5925 = vmatmul.msk.f32.gmra.mxu0 %vm255_vm1, %v7239_v50 }
 0x172   : > { %5959 = vmatmul.msk.f32.gmra.mxu1 %vm255_vm1, %v7486_v61  ;;  %v588_v38 = vpop.f32.mrf.mxu2 }
 0x173   : > { %v866_v44 = vpop.f32.mrf.mxu3  ;;  %v624_v14 = vadd.f32 %v7291_v25, %v588_v38 }
 0x175   : > { %v7497_v32 = vadd.f32 %v866_v44, %v624_v14  ;;  %v594_v44 = vadd.f32 %v7291_v25, %v7249_v56 }
 0x176   : > { %v7499_v12 = vpop.f32.mrf.mxu0 }
 0x177   : > { %9800 = vst [vmem:[#allocation71_spill] sm:$0xff] %v7497_v32  ;;  %v7501_v15 = vpop.f32.mrf.mxu1  ;;  %5859 = vmatmul.msk.f32.gmra.mxu2 %vm255_vm1, %v7486_v61 }
 0x178   : > { %5893 = vmatmul.msk.f32.gmra.mxu3 %vm255_vm1, %v6802_v8  ;;  %v7522_v8 = vld [vmem:[#allocation2 + $0xca] sm:$0xff] }
 0x179   : > { %5926 = vmatmul.msk.f32.gmra.mxu0 %vm255_vm1, %v7255_v6  ;;  %v872_v6 = vadd.f32 %v7251_v62, %v594_v44 }
 0x17a   : > { %5960 = vmatmul.msk.f32.gmra.mxu1 %vm255_vm1, %v7503_v35  ;;  %v591_v17 = vpop.f32.mrf.mxu2 }
 0x17b   : > { %v869_v50 = vpop.f32.mrf.mxu3  ;;  %v625_v38 = vadd.f32 %v7291_v25, %v591_v17 }
 0x17d   : > { %v7516_v14 = vadd.f32 %v869_v50, %v625_v38  ;;  %v595_v38 = vadd.f32 %v7291_v25, %v7264_v7 }
 0x17e   : > { %v7518_v32 = vpop.f32.mrf.mxu0 }
 0x17f   : > { %9802 = vst [vmem:[#allocation73_spill] sm:$0xff] %v7516_v14  ;;  %v7520_v61 = vpop.f32.mrf.mxu1  ;;  %5860 = vmatmul.msk.f32.gmra.mxu2 %vm255_vm1, %v7503_v35  ;;  %v873_v7 = vadd.f32 %v7266_v18, %v595_v38 }
 0x180   : > { %9803 = vst [vmem:[#allocation74_spill] sm:$0xff] %v7518_v32  ;;  %5894 = vmatmul.msk.f32.gmra.mxu3 %vm255_vm1, %v6913_v21  ;;  %v7535_v32 = vld [vmem:[#allocation2 + $0xda] sm:$0xff] }
 0x181   : > { %9804 = vst [vmem:[#allocation75_spill] sm:$0xff] %v7520_v61  ;;  %5927 = vmatmul.msk.f32.gmra.mxu0 %vm255_vm1, %v6806_v9 }
 0x182   : > { %5961 = vmatmul.msk.f32.gmra.mxu1 %vm255_vm1, %v7522_v8  ;;  %v1054_v56 = vpop.f32.mrf.mxu2 }
 0x183   : > { %v1332_v17 = vpop.f32.mrf.mxu3  ;;  %v1150_v50 = vadd.f32 %v1054_v56, %v872_v6 }
 0x185   : > { %v1428_v14 = vadd.f32 %v1332_v17, %v1150_v50 }
 0x186   : > { %v1610_v61 = vpop.f32.mrf.mxu0 }
 0x187   : > { %v1888_v35 = vpop.f32.mrf.mxu1  ;;  %v1706_v21 = vadd.f32 %v1610_v61, %v1428_v14  ;;  %5861 = vmatmul.msk.f32.gmra.mxu2 %vm255_vm1, %v7522_v8  ;;  %v596_v61 = vadd.f32 %v7291_v25, %v7278_v49 }
 0x188   : > { %5895 = vmatmul.msk.f32.gmra.mxu3 %vm255_vm1, %v6945_v27  ;;  %v7550_v27 = vld [vmem:[#allocation2 + $0xe2] sm:$0xff] }
 0x189   : > { %5928 = vmatmul.msk.f32.gmra.mxu0 %vm255_vm1, %v6915_v22  ;;  %v7546_v9 = vadd.f32 %v1888_v35, %v1706_v21  ;;  %v874_v22 = vadd.f32 %v7280_v20, %v596_v61  ;;  %v597_v21 = vadd.f32 %v7291_v25, %v7296_v16 }
 0x18a   : > { %5962 = vmatmul.msk.f32.gmra.mxu1 %vm255_vm1, %v7535_v32  ;;  %v1057_v62 = vpop.f32.mrf.mxu2 }
 0x18b   : > { %v1335_v44 = vpop.f32.mrf.mxu3  ;;  %v1151_v6 = vadd.f32 %v1057_v62, %v873_v7  ;;  %v875_v20 = vadd.f32 %v7298_v43, %v597_v21 }
 0x18d   : > { %v1429_v14 = vadd.f32 %v1335_v44, %v1151_v6 }
 0x18e   : > { %v1613_v56 = vpop.f32.mrf.mxu0 }
 0x18f   : > { %v1891_v17 = vpop.f32.mrf.mxu1  ;;  %v1707_v50 = vadd.f32 %v1613_v56, %v1429_v14  ;;  %5862 = vmatmul.msk.f32.gmra.mxu2 %vm255_vm1, %v7535_v32  ;;  %v598_v56 = vadd.f32 %v7291_v25, %v7312_v24  ;;  %v5978_v24 = vld [vmem:[%s9651_s1 + $0x18] sm:$0xf] }
 0x190   : > { %5896 = vmatmul.msk.f32.gmra.mxu3 %vm255_vm1, %v6971_v33  ;;  %v7565_v33 = vld [vmem:[#allocation2 + $0xf2] sm:$0xff]  ;;  %5979 = vmatpush.msk.msra.mxu2 %vm477_vm0, %v5978_v24 }
 0x191   : > { %5929 = vmatmul.msk.f32.gmra.mxu0 %vm255_vm1, %v6947_v28  ;;  %v7561_v49 = vadd.f32 %v1891_v17, %v1707_v50 }
 0x192   : > { %5963 = vmatmul.msk.f32.gmra.mxu1 %vm255_vm1, %v7550_v27  ;;  %v1060_v18 = vpop.f32.mrf.mxu2 }
 0x193   : > { %v1338_v35 = vpop.f32.mrf.mxu3  ;;  %v1152_v38 = vadd.f32 %v1060_v18, %v874_v22 }
 0x195   : > { %v1430_v7 = vadd.f32 %v1338_v35, %v1152_v38 }
 0x196   : > { %v1616_v62 = vpop.f32.mrf.mxu0 }
 0x197   : > { %v1894_v44 = vpop.f32.mrf.mxu1  ;;  %v1708_v6 = vadd.f32 %v1616_v62, %v1430_v7  ;;  %5863 = vmatmul.msk.f32.gmra.mxu2 %vm255_vm1, %v7550_v27 }
 0x198   : > { %5897 = vmatmul.msk.f32.gmra.mxu3 %vm255_vm1, %v6997_v39  ;;  %v7580_v39 = vld [vmem:[#allocation2 + $0xfa] sm:$0xff] }
 0x199   : > { %5930 = vmatmul.msk.f32.gmra.mxu0 %vm255_vm1, %v6973_v34  ;;  %v7576_v28 = vadd.f32 %v1894_v44, %v1708_v6  ;;  %v876_v34 = vadd.f32 %v7314_v23, %v598_v56  ;;  %v7599_v44 = vld [vmem:[#allocation2 + $0x10a] sm:$0xff]  ;;  %v6012_v23 = vld [vmem:[%s9651_s1 + $0x1c] sm:$0xf]  ;;  %v600_v56 = vadd.f32 %v7291_v25, %v7346_v30 }
 0x19a   : > { %5964 = vmatmul.msk.f32.gmra.mxu1 %vm255_vm1, %v7565_v33  ;;  %v1063_v16 = vpop.f32.mrf.mxu2  ;;  %6013 = vmatpush.msk.msra.mxu3 %vm477_vm0, %v6012_v23 }
 0x19b   : > { %v1341_v61 = vpop.f32.mrf.mxu3  ;;  %v1153_v14 = vadd.f32 %v1063_v16, %v875_v20  ;;  %v878_v30 = vadd.f32 %v7348_v5, %v600_v56 }
 0x19d   : > { %v1431_v17 = vadd.f32 %v1341_v61, %v1153_v14 }
 0x19e   : > { %v1619_v50 = vpop.f32.mrf.mxu0 }
 0x19f   : > { %v1897_v22 = vpop.f32.mrf.mxu1  ;;  %v1709_v18 = vadd.f32 %v1619_v50, %v1431_v17  ;;  %5864 = vmatmul.msk.f32.gmra.mxu2 %vm255_vm1, %v7565_v33 }
 0x1a0   : > { %5898 = vmatmul.msk.f32.gmra.mxu3 %vm255_vm1, %v7023_v45  ;;  %v599_v45 = vadd.f32 %v7291_v25, %v7329_v26 }
 0x1a1   : > { %5931 = vmatmul.msk.f32.gmra.mxu0 %vm255_vm1, %v6999_v40  ;;  %v7591_v43 = vadd.f32 %v1897_v22, %v1709_v18 }
 0x1a2   : > { %5965 = vmatmul.msk.f32.gmra.mxu1 %vm255_vm1, %v7580_v39  ;;  %v1066_v35 = vpop.f32.mrf.mxu2  ;;  %v877_v26 = vadd.f32 %v7331_v29, %v599_v45 }
 0x1a3   : > { %v1344_v38 = vpop.f32.mrf.mxu3  ;;  %v1154_v21 = vadd.f32 %v1066_v35, %v876_v34 }
 0x1a5   : > { %v1432_v40 = vadd.f32 %v1344_v38, %v1154_v21  ;;  %v601_v38 = vadd.f32 %v7291_v25, %v7363_v36 }
 0x1a6   : > { %v1622_v7 = vpop.f32.mrf.mxu0 }
 0x1a7   : > { %v1900_v62 = vpop.f32.mrf.mxu1  ;;  %v1710_v6 = vadd.f32 %v1622_v7, %v1432_v40  ;;  %5865 = vmatmul.msk.f32.gmra.mxu2 %vm255_vm1, %v7580_v39 }
 0x1a8   : > { %5899 = vmatmul.msk.f32.gmra.mxu3 %vm255_vm1, %v7049_v51  ;;  %v7618_v51 = vld [vmem:[#allocation2 + $0x112] sm:$0xff] }
 0x1a9   : > { %5932 = vmatmul.msk.f32.gmra.mxu0 %vm255_vm1, %v7025_v46  ;;  %v7614_v20 = vadd.f32 %v1900_v62, %v1710_v6  ;;  %v6046_v46 = vld [vmem:[%s9651_s1 + $0x20] sm:$0xf]  ;;  %v602_v6 = vadd.f32 %v7291_v25, %v7380_v42 }
 0x1aa   : > { %5966 = vmatmul.msk.f32.gmra.mxu1 %vm255_vm1, %v7599_v44  ;;  %v1069_v16 = vpop.f32.mrf.mxu2  ;;  %6047 = vmatpush.msk.msra.mxu0 %vm477_vm0, %v6046_v46 }
 0x1ab   : > { %v1347_v61 = vpop.f32.mrf.mxu3  ;;  %v1155_v14 = vadd.f32 %v1069_v16, %v877_v26 }
 0x1ad   : > { %v1433_v17 = vadd.f32 %v1347_v61, %v1155_v14  ;;  %v7652_v61 = vld [vmem:[#allocation2 + $0x12a] sm:$0xff] }
 0x1ae   : > { %v1625_v50 = vpop.f32.mrf.mxu0 }
 0x1af   : > { %v1903_v22 = vpop.f32.mrf.mxu1  ;;  %v1711_v29 = vadd.f32 %v1625_v50, %v1433_v17  ;;  %5866 = vmatmul.msk.f32.gmra.mxu2 %vm255_vm1, %v7599_v44  ;;  %v603_v50 = vadd.f32 %v7291_v25, %v7397_v48 }
 0x1b0   : > { %5900 = vmatmul.msk.f32.gmra.mxu3 %vm255_vm1, %v7075_v57  ;;  %v7637_v57 = vld [vmem:[#allocation2 + $0x122] sm:$0xff] }
 0x1b1   : > { %5933 = vmatmul.msk.f32.gmra.mxu0 %vm255_vm1, %v7051_v52  ;;  %v7633_v18 = vadd.f32 %v1903_v22, %v1711_v29  ;;  %v879_v52 = vadd.f32 %v7365_v41, %v601_v38  ;;  %v880_v41 = vadd.f32 %v7382_v47, %v602_v6  ;;  %v881_v47 = vadd.f32 %v7399_v53, %v603_v50  ;;  %v7696_v38 = vld [vmem:[%s6768_s13 + $0xf8] sm:$0xff] }
 0x1b2   : > { %5967 = vmatmul.msk.f32.gmra.mxu1 %vm255_vm1, %v7618_v51  ;;  %v1072_v34 = vpop.f32.mrf.mxu2  ;;  %9806 = vst [vmem:[#allocation77_spill] sm:$0xff] %v7696_v38  ;;  %v607_v50 = vadd.f32 %v7291_v25, %v7465_v13 }
 0x1b3   : > { %v1350_v24 = vpop.f32.mrf.mxu3  ;;  %v1156_v35 = vadd.f32 %v1072_v34, %v878_v30  ;;  %v604_v34 = vadd.f32 %v7291_v25, %v7414_v54  ;;  %343 = vst.msk [vmem:[#allocation2 + $0x189] sm:$0xff] %vm255_vm1, %v7696_v38 }
 0x1b5   : > { %v1434_v21 = vadd.f32 %v1350_v24, %v1156_v35  ;;  %v7693_v35 = vld [vmem:[#allocation2 + $0x142] sm:$0xff]  ;;  %v882_v53 = vadd.f32 %v7416_v59, %v604_v34 }
 0x1b6   : > { %v1628_v45 = vpop.f32.mrf.mxu0  ;;  %v9813_v34 = vld [vmem:[#allocation42_spill] sm:$0xff] }
 0x1b7   : > { %v1906_v40 = vpop.f32.mrf.mxu1  ;;  %v1712_v7 = vadd.f32 %v1628_v45, %v1434_v21  ;;  %5867 = vmatmul.msk.f32.gmra.mxu2 %vm255_vm1, %v7618_v51 }
 0x1b8   : > { %5901 = vmatmul.msk.f32.gmra.mxu3 %vm255_vm1, %v7101_v63 }
 0x1b9   : > { %5934 = vmatmul.msk.f32.gmra.mxu0 %vm255_vm1, %v7077_v58  ;;  %v7648_v5 = vadd.f32 %v1906_v40, %v1712_v7  ;;  %v605_v40 = vadd.f32 %v7291_v25, %v7431_v60 }
 0x1ba   : > { %5968 = vmatmul.msk.f32.gmra.mxu1 %vm255_vm1, %v7637_v57  ;;  %v1075_v36 = vpop.f32.mrf.mxu2 }
 0x1bb   : > { %v1353_v62 = vpop.f32.mrf.mxu3  ;;  %v1157_v23 = vadd.f32 %v1075_v36, %v879_v52  ;;  %v7715_v52 = vld [vmem:[#allocation2 + $0x152] sm:$0xff]  ;;  %v883_v59 = vadd.f32 %v7433_v2, %v605_v40 }
 0x1bc   : > { %v9808_v36 = vld [vmem:[#allocation39_spill] sm:$0xff] }
 0x1bd   : > { %v1435_v26 = vadd.f32 %v1353_v62, %v1157_v23  ;;  %v9809_v62 = vld [vmem:[#allocation38_spill] sm:$0xff] }
 0x1be   : > { %v1631_v16 = vpop.f32.mrf.mxu0 }
 0x1bf   : > { %v1909_v63 = vpop.f32.mrf.mxu1  ;;  %v1713_v58 = vadd.f32 %v1631_v16, %v1435_v26  ;;  %5868 = vmatmul.msk.f32.gmra.mxu2 %vm255_vm1, %v7637_v57  ;;  %v606_v26 = vadd.f32 %v7291_v25, %v7448_v11 }
 0x1c0   : > { %5902 = vmatmul.msk.f32.gmra.mxu3 %vm255_vm1, %v7127_v10  ;;  %v7671_v10 = vld [vmem:[#allocation2 + $0x13a] sm:$0xff] }
 0x1c1   : > { %5935 = vmatmul.msk.f32.gmra.mxu0 %vm255_vm1, %v7103_v0  ;;  %v7663_v42 = vadd.f32 %v1909_v63, %v1713_v58  ;;  %v7674_v0 = vld [vmem:[%s6768_s13 + $0xf0] sm:$0xff]  ;;  %v7732_v58 = vld [vmem:[#allocation2 + $0x15a] sm:$0xff]  ;;  %v884_v2 = vadd.f32 %v7450_v3, %v606_v26  ;;  %v885_v3 = vadd.f32 %v7467_v31, %v607_v50 }
 0x1c2   : > { %5969 = vmatmul.msk.f32.gmra.mxu1 %vm255_vm1, %v7652_v61  ;;  %v1078_v14 = vpop.f32.mrf.mxu2  ;;  %9805 = vst [vmem:[#allocation76_spill] sm:$0xff] %v7674_v0  ;;  %v9814_v31 = vld [vmem:[#allocation44_spill] sm:$0xff] }
 0x1c3   : > { %v1356_v56 = vpop.f32.mrf.mxu3  ;;  %v1158_v17 = vadd.f32 %v1078_v14, %v880_v41  ;;  %342 = vst.msk [vmem:[#allocation2 + $0x181] sm:$0xff] %vm255_vm1, %v7674_v0  ;;  %v9810_v41 = vld [vmem:[#allocation41_spill] sm:$0xff]  ;;  %v9811_v14 = vld [vmem:[#allocation40_spill] sm:$0xff] }
 0x1c4   : > { %v2295_v50 = vld [vmem:[#allocation2 + $0x31] sm:$0xff] }
 0x1c5   : > { %v7667_v22 = vadd.f32 %v1356_v56, %v1158_v17 }
 0x1c6   : > { %v7669_v46 = vpop.f32.mrf.mxu0 }
 0x1c7   : > { %5869 = vmatmul.msk.f32.gmra.mxu2 %vm255_vm1, %v7652_v61  ;;  %v7828_v0 = vpop.f32.mrf.mxu1 }
 0x1c8   : > { %5903 = vmatmul.msk.f32.gmra.mxu3 %vm255_vm1, %v7153_v19 }
 0x1c9   : > { %5936 = vmatmul.msk.f32.gmra.mxu0 %vm255_vm1, %v7129_v1  ;;  %v9807_v1 = vld [vmem:[#allocation37_spill] sm:$0xff] }
 0x1ca   : > { %5970 = vmatmul.msk.f32.gmra.mxu1 %vm255_vm1, %v7671_v10  ;;  %v1081_v48 = vpop.f32.mrf.mxu2 }
 0x1cb   : > { %v1359_v29 = vpop.f32.mrf.mxu3  ;;  %v1159_v30 = vadd.f32 %v1081_v48, %v881_v47 }
 0x1cd   : > { %v7689_v24 = vadd.f32 %v1359_v29, %v1159_v30  ;;  %v7749_v29 = vld [vmem:[#allocation2 + $0x16a] sm:$0xff] }
 0x1ce   : > { %v7691_v19 = vpop.f32.mrf.mxu0  ;;  %v9812_v30 = vld [vmem:[#allocation43_spill] sm:$0xff] }
 0x1cf   : > { %5870 = vmatmul.msk.f32.gmra.mxu2 %vm255_vm1, %v7671_v10 }
 0x1d0   : > { %5904 = vmatmul.msk.f32.gmra.mxu3 %vm255_vm1, %v7177_v55 }
 0x1d1   : > { %5937 = vmatmul.msk.f32.gmra.mxu0 %vm255_vm1, %v9807_v1 }
 0x1d2   : > { %5971 = vmatmul.msk.f32.gmra.mxu1 %vm255_vm1, %v7693_v35  ;;  %v1084_v54 = vpop.f32.mrf.mxu2 }
 0x1d3   : > { %v1362_v21 = vpop.f32.mrf.mxu3  ;;  %v1160_v45 = vadd.f32 %v1084_v54, %v882_v53  ;;  %v7760_v54 = vld [vmem:[#allocation2 + $0x180] sm:$0xff] }
 0x1d5   : > { %v7711_v7 = vadd.f32 %v1362_v21, %v1160_v45  ;;  %v608_v21 = vadd.f32 %v7291_v25, %v7482_v37 }
 0x1d6   : > { %v7713_v55 = vpop.f32.mrf.mxu0 }
 0x1d7   : > { %5871 = vmatmul.msk.f32.gmra.mxu2 %vm255_vm1, %v7693_v35  ;;  %v886_v37 = vadd.f32 %v7484_v4, %v608_v21 }
 0x1d8   : > { %5905 = vmatmul.msk.f32.gmra.mxu3 %vm255_vm1, %v9808_v36  ;;  %v7768_v36 = vld [vmem:[#allocation2 + $0x172] sm:$0xff] }
 0x1d9   : > { %5938 = vmatmul.msk.f32.gmra.mxu0 %vm255_vm1, %v9809_v62 }
 0x1da   : > { %5972 = vmatmul.msk.f32.gmra.mxu1 %vm255_vm1, %v7715_v52  ;;  %v1087_v60 = vpop.f32.mrf.mxu2 }
 0x1db   : > { %v1365_v23 = vpop.f32.mrf.mxu3  ;;  %v1161_v6 = vadd.f32 %v1087_v60, %v883_v59 }
 0x1dd   : > { %v7728_v16 = vadd.f32 %v1365_v23, %v1161_v6  ;;  %v7779_v23 = vld [vmem:[#allocation2 + $0x188] sm:$0xff]  ;;  %v609_v6 = vadd.f32 %v7291_v25, %v7499_v12 }
 0x1de   : > { %v7730_v63 = vpop.f32.mrf.mxu0 }
 0x1df   : > { %5872 = vmatmul.msk.f32.gmra.mxu2 %vm255_vm1, %v7715_v52  ;;  %v887_v4 = vadd.f32 %v7501_v15, %v609_v6  ;;  %v9818_v15 = vld [vmem:[#allocation75_spill] sm:$0xff]  ;;  %v9819_v6 = vld [vmem:[#allocation45_spill] sm:$0xff] }
 0x1e0   : > { %5906 = vmatmul.msk.f32.gmra.mxu3 %vm255_vm1, %v9810_v41 }
 0x1e1   : > { %5939 = vmatmul.msk.f32.gmra.mxu0 %vm255_vm1, %v9811_v14  ;;  %v7787_v14 = vld [vmem:[#allocation2 + $0x181] sm:$0xff] }
 0x1e2   : > { %5973 = vmatmul.msk.f32.gmra.mxu1 %vm255_vm1, %v7732_v58  ;;  %v1090_v11 = vpop.f32.mrf.mxu2 }
 0x1e3   : > { %v1368_v56 = vpop.f32.mrf.mxu3  ;;  %v1162_v17 = vadd.f32 %v1090_v11, %v884_v2  ;;  %v7789_v2 = vld [vmem:[#allocation2 + $0x182] sm:$0xff] }
 0x1e5   : > { %v7745_v47 = vadd.f32 %v1368_v56, %v1162_v17  ;;  %v2017_v17 = vld [vmem:[#allocation2 + $0x30] sm:$0xff] }
 0x1e6   : > { %v7747_v48 = vpop.f32.mrf.mxu0 }
 0x1e7   : > { %5873 = vmatmul.msk.f32.gmra.mxu2 %vm255_vm1, %v7732_v58 }
 0x1e8   : > { %5907 = vmatmul.msk.f32.gmra.mxu3 %vm255_vm1, %v9812_v30  ;;  %v9815_v30 = vld [vmem:[#allocation74_spill] sm:$0xff] }
 0x1e9   : > { %5940 = vmatmul.msk.f32.gmra.mxu0 %vm255_vm1, %v9813_v34  ;;  %v610_v34 = vadd.f32 %v7291_v25, %v9815_v30 }
 0x1ea   : > { %5974 = vmatmul.msk.f32.gmra.mxu1 %vm255_vm1, %v7749_v29  ;;  %v1093_v13 = vpop.f32.mrf.mxu2 }
 0x1eb   : > { %v1371_v1 = vpop.f32.mrf.mxu3  ;;  %v1163_v53 = vadd.f32 %v1093_v13, %v885_v3  ;;  %v888_v21 = vadd.f32 %v9818_v15, %v610_v34 }
 0x1ed   : > { %v7764_v45 = vadd.f32 %v1371_v1, %v1163_v53  ;;  %v7806_v1 = vld [vmem:[#allocation2 + $0x189] sm:$0xff] }
 0x1ee   : > { %v7766_v40 = vpop.f32.mrf.mxu0  ;;  %v7808_v53 = vld [vmem:[#allocation2 + $0x18a] sm:$0xff] }
 0x1ef   : > { %5874 = vmatmul.msk.f32.gmra.mxu2 %vm255_vm1, %v7749_v29 }
 0x1f0   : > { %5908 = vmatmul.msk.f32.gmra.mxu3 %vm255_vm1, %v7760_v54 }
 0x1f1   : > { %5941 = vmatmul.msk.f32.gmra.mxu0 %vm255_vm1, %v9814_v31 }
 0x1f2   : > { %5975 = vmatmul.msk.f32.gmra.mxu1 %vm255_vm1, %v7768_v36  ;;  %v1096_v62 = vpop.f32.mrf.mxu2 }
 0x1f3   : > { %v1374_v59 = vpop.f32.mrf.mxu3  ;;  %v1164_v60 = vadd.f32 %v1096_v62, %v886_v37 }
 0x1f5   : > { %v7783_v26 = vadd.f32 %v1374_v59, %v1164_v60  ;;  %v2018_v59 = vld [vmem:[#allocation2 + $0x38] sm:$0xff] }
 0x1f6   : > { %v7785_v41 = vpop.f32.mrf.mxu0  ;;  %v2296_v60 = vld [vmem:[#allocation2 + $0x39] sm:$0xff] }
 0x1f7   : > { %5875 = vmatmul.msk.f32.gmra.mxu2 %vm255_vm1, %v7768_v36 }
 0x1f8   : > { %5909 = vmatmul.msk.f32.gmra.mxu3 %vm255_vm1, %v7779_v23 }
 0x1f9   : > { %5942 = vmatmul.msk.f32.gmra.mxu0 %vm255_vm1, %v7787_v14 }
 0x1fa   : > { %5976 = vmatmul.msk.f32.gmra.mxu1 %vm255_vm1, %v7789_v2  ;;  %v1099_v12 = vpop.f32.mrf.mxu2 }
 0x1fb   : > { %v1377_v11 = vpop.f32.mrf.mxu3  ;;  %v1165_v56 = vadd.f32 %v1099_v12, %v887_v4  ;;  %v611_v4 = vadd.f32 %v7291_v25, %v9819_v6  ;;  %v9827_v6 = vld [vmem:[#allocation47_spill] sm:$0xff] }
 0x1fd   : > { %v7802_v3 = vadd.f32 %v1377_v11, %v1165_v56  ;;  %v9822_v56 = vld [vmem:[#allocation48_spill] sm:$0xff] }
 0x1fe   : > { %v7804_v13 = vpop.f32.mrf.mxu0 }
 0x1ff   : > { %9816 = vst [vmem:[#allocation37_spill] sm:$0xff] %v7802_v3  ;;  %5980 = vmatmul.msk.f32.vlgmr.msra.gmra.mxu2 %vm255_vm1, %v2017_v17  ;;  %v9823_v17 = vld [vmem:[#allocation46_spill] sm:$0xff] }
 0x200   : > { %9817 = vst [vmem:[#allocation39_spill] sm:$0xff] %v7804_v13  ;;  %6014 = vmatmul.msk.f32.vlgmr.msra.gmra.mxu3 %vm255_vm1, %v2295_v50  ;;  %v889_v50 = vadd.f32 %v9823_v17, %v611_v4  ;;  %v2298_v17 = vld [vmem:[#allocation2 + $0x51] sm:$0xff] }
 0x201   : > { %5943 = vmatmul.msk.f32.gmra.mxu0 %vm255_vm1, %v7806_v1 }
 0x202   : > { %5977 = vmatmul.msk.f32.gmra.mxu1 %vm255_vm1, %v7808_v53  ;;  %v1102_v31 = vpop.f32.mrf.mxu2 }
 0x203   : > { %v1380_v37 = vpop.f32.mrf.mxu3  ;;  %v1166_v62 = vadd.f32 %v1102_v31, %v888_v21  ;;  %v2019_v21 = vld [vmem:[#allocation2 + $0x48] sm:$0xff] }
 0x204   : > { %v2297_v31 = vld [vmem:[#allocation2 + $0x49] sm:$0xff] }
 0x205   : > { %v7819_v12 = vadd.f32 %v1380_v37, %v1166_v62  ;;  %v9826_v62 = vld [vmem:[#allocation50_spill] sm:$0xff] }
 0x206   : > { %v7821_v11 = vpop.f32.mrf.mxu0 }
 0x207   : > { %9820 = vst [vmem:[#allocation38_spill] sm:$0xff] %v7819_v12  ;;  %5981 = vmatmul.msk.f32.gmra.mxu2 %vm255_vm1, %v2018_v59  ;;  %v2302_v12 = vld [vmem:[#allocation2 + $0x81] sm:$0xff] }
 0x208   : > { %9821 = vst [vmem:[#allocation41_spill] sm:$0xff] %v7821_v11  ;;  %6015 = vmatmul.msk.f32.gmra.mxu3 %vm255_vm1, %v2296_v60  ;;  %v2024_v11 = vld [vmem:[#allocation2 + $0x80] sm:$0xff] }
 0x209   : > { %6048 = vmatmul.msk.f32.vlgmr.msra.gmra.mxu0 %vm255_vm1, %v9822_v56  ;;  %v2020_v56 = vld [vmem:[#allocation2 + $0x50] sm:$0xff] }
 0x20a   : > { %v1105_v30 = vpop.f32.mrf.mxu2 }
 0x20b   : > { %v1383_v34 = vpop.f32.mrf.mxu3  ;;  %v1167_v15 = vadd.f32 %v1105_v30, %v889_v50 }
 0x20d   : > { %v7830_v25 = vadd.f32 %v1383_v34, %v1167_v15  ;;  %v7843_v34 = vpop.f32.mrf.mxu1  ;;  %v9830_v15 = vld [vmem:[#allocation52_spill] sm:$0xff] }
 0x20e   : > { %v7832_v37 = vpop.f32.mrf.mxu0 }
 0x20f   : > { %9824 = vst [vmem:[#allocation40_spill] sm:$0xff] %v7830_v25  ;;  %5982 = vmatmul.msk.f32.gmra.mxu2 %vm255_vm1, %v2019_v21 }
 0x210   : > { %9825 = vst [vmem:[#allocation43_spill] sm:$0xff] %v7832_v37  ;;  %6016 = vmatmul.msk.f32.gmra.mxu3 %vm255_vm1, %v2297_v31 }
 0x211   : > { %6049 = vmatmul.msk.f32.gmra.mxu0 %vm255_vm1, %v9826_v62  ;;  %v9831_v62 = vld [vmem:[#allocation49_spill] sm:$0xff] }
 0x212   : > { %v1108_v59 = vpop.f32.mrf.mxu2 }
 0x213   : > { %v1386_v60 = vpop.f32.mrf.mxu3  ;;  %v1168_v4 = vadd.f32 %v1108_v59, %v9827_v6  ;;  %v2021_v59 = vld [vmem:[#allocation2 + $0x60] sm:$0xff] }
 0x214   : > { %v2299_v6 = vld [vmem:[#allocation2 + $0x61] sm:$0xff] }
 0x215   : > { %v7839_v50 = vadd.f32 %v1386_v60, %v1168_v4  ;;  %v9834_v4 = vld [vmem:[#allocation54_spill] sm:$0xff] }
 0x216   : > { %v7841_v30 = vpop.f32.mrf.mxu0 }
 0x217   : > { %9828 = vst [vmem:[#allocation42_spill] sm:$0xff] %v7839_v50  ;;  %5983 = vmatmul.msk.f32.gmra.mxu2 %vm255_vm1, %v2020_v56  ;;  %v7858_v56 = vpop.f32.mrf.mxu1 }
 0x218   : > { %9829 = vst [vmem:[#allocation44_spill] sm:$0xff] %v7841_v30  ;;  %6017 = vmatmul.msk.f32.gmra.mxu3 %vm255_vm1, %v2298_v17  ;;  %v9835_v30 = vld [vmem:[#allocation51_spill] sm:$0xff] }
 0x219   : > { %6050 = vmatmul.msk.f32.gmra.mxu0 %vm255_vm1, %v9830_v15 }
 0x21a   : > { %v1111_v21 = vpop.f32.mrf.mxu2 }
 0x21b   : > { %v1389_v31 = vpop.f32.mrf.mxu3  ;;  %v1169_v38 = vadd.f32 %v1111_v21, %v9831_v62  ;;  %v2022_v21 = vld [vmem:[#allocation2 + $0x68] sm:$0xff] }
 0x21c   : > { %v2300_v62 = vld [vmem:[#allocation2 + $0x69] sm:$0xff] }
 0x21d   : > { %v7850_v37 = vadd.f32 %v1389_v31, %v1169_v38  ;;  %v3006_v31 = vld [vmem:[%s9653_s3] sm:$0xf] }
 0x21e   : > { %v7852_v60 = vpop.f32.mrf.mxu0  ;;  %6080 = vmatpush.msk.msra.mxu1 %vm477_vm0, %v3006_v31 }
 0x21f   : > { %9832 = vst [vmem:[#allocation74_spill] sm:$0xff] %v7850_v37  ;;  %5984 = vmatmul.msk.f32.gmra.mxu2 %vm255_vm1, %v2021_v59  ;;  %v9838_v59 = vld [vmem:[#allocation56_spill] sm:$0xff] }
 0x220   : > { %9833 = vst [vmem:[#allocation75_spill] sm:$0xff] %v7852_v60  ;;  %6018 = vmatmul.msk.f32.gmra.mxu3 %vm255_vm1, %v2299_v6 }
 0x221   : > { %6051 = vmatmul.msk.f32.gmra.mxu0 %vm255_vm1, %v9834_v4  ;;  %v7873_v4 = vpop.f32.mrf.mxu1 }
 0x222   : > { %v1114_v17 = vpop.f32.mrf.mxu2 }
 0x223   : > { %v1392_v15 = vpop.f32.mrf.mxu3  ;;  %v1170_v50 = vadd.f32 %v1114_v17, %v9835_v30 }
 0x225   : > { %v7861_v25 = vadd.f32 %v1392_v15, %v1170_v50  ;;  %v9839_v50 = vld [vmem:[#allocation53_spill] sm:$0xff]  ;;  %v2023_v15 = vld [vmem:[#allocation2 + $0x78] sm:$0xff] }
 0x226   : > { %v7863_v38 = vpop.f32.mrf.mxu0 }
 0x227   : > { %9836 = vst [vmem:[#allocation45_spill] sm:$0xff] %v7861_v25  ;;  %5985 = vmatmul.msk.f32.gmra.mxu2 %vm255_vm1, %v2022_v21  ;;  %v9842_v21 = vld [vmem:[#allocation58_spill] sm:$0xff] }
 0x228   : > { %9837 = vst [vmem:[#allocation48_spill] sm:$0xff] %v7863_v38  ;;  %6019 = vmatmul.msk.f32.gmra.mxu3 %vm255_vm1, %v2300_v62  ;;  %v2301_v38 = vld [vmem:[#allocation2 + $0x79] sm:$0xff] }
 0x229   : > { %6052 = vmatmul.msk.f32.gmra.mxu0 %vm255_vm1, %v9838_v59  ;;  %v9843_v59 = vld [vmem:[#allocation55_spill] sm:$0xff] }
 0x22a   : > { %v1117_v30 = vpop.f32.mrf.mxu2 }
 0x22b   : > { %v1395_v6 = vpop.f32.mrf.mxu3  ;;  %v1171_v17 = vadd.f32 %v1117_v30, %v9839_v50  ;;  %v7885_v30 = vpop.f32.mrf.mxu1 }
 0x22d   : > { %v7876_v25 = vadd.f32 %v1395_v6, %v1171_v17 }
 0x22e   : > { %v7878_v60 = vpop.f32.mrf.mxu0 }
 0x22f   : > { %9840 = vst [vmem:[#allocation46_spill] sm:$0xff] %v7876_v25  ;;  %5986 = vmatmul.msk.f32.gmra.mxu2 %vm255_vm1, %v2023_v15 }
 0x230   : > { %9841 = vst [vmem:[#allocation50_spill] sm:$0xff] %v7878_v60  ;;  %6020 = vmatmul.msk.f32.gmra.mxu3 %vm255_vm1, %v2301_v38  ;;  %v9846_v38 = vld [vmem:[#allocation60_spill] sm:$0xff] }
 0x231   : > { %6053 = vmatmul.msk.f32.gmra.mxu0 %vm255_vm1, %v9842_v21  ;;  %v9847_v21 = vld [vmem:[#allocation57_spill] sm:$0xff] }
 0x232   : > { %v1120_v62 = vpop.f32.mrf.mxu2 }
 0x233   : > { %v1398_v31 = vpop.f32.mrf.mxu3  ;;  %v1172_v37 = vadd.f32 %v1120_v62, %v9843_v59  ;;  %v2025_v62 = vld [vmem:[#allocation2 + $0x90] sm:$0xff] }
 0x234   : > { %v2303_v59 = vld [vmem:[#allocation2 + $0x91] sm:$0xff] }
 0x235   : > { %v7887_v50 = vadd.f32 %v1398_v31, %v1172_v37  ;;  %v7900_v37 = vpop.f32.mrf.mxu1 }
 0x236   : > { %v7889_v6 = vpop.f32.mrf.mxu0 }
 0x237   : > { %9844 = vst [vmem:[#allocation47_spill] sm:$0xff] %v7887_v50  ;;  %5987 = vmatmul.msk.f32.gmra.mxu2 %vm255_vm1, %v2024_v11 }
 0x238   : > { %9845 = vst [vmem:[#allocation52_spill] sm:$0xff] %v7889_v6  ;;  %6021 = vmatmul.msk.f32.gmra.mxu3 %vm255_vm1, %v2302_v12  ;;  %v9850_v12 = vld [vmem:[#allocation62_spill] sm:$0xff] }
 0x239   : > { %6054 = vmatmul.msk.f32.gmra.mxu0 %vm255_vm1, %v9846_v38  ;;  %v9851_v38 = vld [vmem:[#allocation59_spill] sm:$0xff] }
 0x23a   : > { %v1123_v17 = vpop.f32.mrf.mxu2 }
 0x23b   : > { %v1401_v15 = vpop.f32.mrf.mxu3  ;;  %v1173_v60 = vadd.f32 %v1123_v17, %v9847_v21  ;;  %v2026_v17 = vld [vmem:[#allocation2 + $0x98] sm:$0xff] }
 0x23c   : > { %v2304_v21 = vld [vmem:[#allocation2 + $0x99] sm:$0xff] }
 0x23d   : > { %v7896_v25 = vadd.f32 %v1401_v15, %v1173_v60  ;;  %v9854_v15 = vld [vmem:[#allocation64_spill] sm:$0xff] }
 0x23e   : > { %v7898_v13 = vpop.f32.mrf.mxu0 }
 0x23f   : > { %9848 = vst [vmem:[#allocation49_spill] sm:$0xff] %v7896_v25  ;;  %5988 = vmatmul.msk.f32.gmra.mxu2 %vm255_vm1, %v2025_v62  ;;  %v7915_v62 = vpop.f32.mrf.mxu1 }
 0x240   : > { %9849 = vst [vmem:[#allocation54_spill] sm:$0xff] %v7898_v13  ;;  %6022 = vmatmul.msk.f32.gmra.mxu3 %vm255_vm1, %v2303_v59  ;;  %v9856_v13 = vld [vmem:[#allocation61_spill] sm:$0xff] }
 0x241   : > { %6055 = vmatmul.msk.f32.gmra.mxu0 %vm255_vm1, %v9850_v12  ;;  %9855 = vst [vmem:[#allocation53_spill] sm:$0xff] %v7915_v62 }
 0x242   : > { %v1126_v11 = vpop.f32.mrf.mxu2 }
 0x243   : > { %v1404_v31 = vpop.f32.mrf.mxu3  ;;  %v1174_v6 = vadd.f32 %v1126_v11, %v9851_v38  ;;  %v2027_v11 = vld [vmem:[#allocation2 + $0xa8] sm:$0xff] }
 0x244   : > { %v2305_v38 = vld [vmem:[#allocation2 + $0xa9] sm:$0xff] }
 0x245   : > { %v7907_v50 = vadd.f32 %v1404_v31, %v1174_v6  ;;  %v9859_v31 = vld [vmem:[#allocation66_spill] sm:$0xff] }
 0x246   : > { %v7909_v60 = vpop.f32.mrf.mxu0 }
 0x247   : > { %9852 = vst [vmem:[#allocation51_spill] sm:$0xff] %v7907_v50  ;;  %5989 = vmatmul.msk.f32.gmra.mxu2 %vm255_vm1, %v2026_v17 }
 0x248   : > { %9853 = vst [vmem:[#allocation56_spill] sm:$0xff] %v7909_v60  ;;  %6023 = vmatmul.msk.f32.gmra.mxu3 %vm255_vm1, %v2304_v21  ;;  %v9861_v60 = vld [vmem:[#allocation63_spill] sm:$0xff] }
 0x249   : > { %6056 = vmatmul.msk.f32.gmra.mxu0 %vm255_vm1, %v9854_v15  ;;  %v7926_v15 = vpop.f32.mrf.mxu1 }
 0x24a   : > { %v1129_v59 = vpop.f32.mrf.mxu2  ;;  %9860 = vst [vmem:[#allocation60_spill] sm:$0xff] %v7926_v15  ;;  %v2307_v15 = vld [vmem:[#allocation2 + $0xc1] sm:$0xff] }
 0x24b   : > { %v1407_v12 = vpop.f32.mrf.mxu3  ;;  %v1175_v25 = vadd.f32 %v1129_v59, %v9856_v13  ;;  %v2028_v13 = vld [vmem:[#allocation2 + $0xb0] sm:$0xff] }
 0x24c   : > { %v2306_v59 = vld [vmem:[#allocation2 + $0xb1] sm:$0xff] }
 0x24d   : > { %v7918_v3 = vadd.f32 %v1407_v12, %v1175_v25  ;;  %v9864_v12 = vld [vmem:[#allocation68_spill] sm:$0xff] }
 0x24e   : > { %v7920_v6 = vpop.f32.mrf.mxu0 }
 0x24f   : > { %9857 = vst [vmem:[#allocation58_spill] sm:$0xff] %v7918_v3  ;;  %5990 = vmatmul.msk.f32.gmra.mxu2 %vm255_vm1, %v2027_v11  ;;  %v2029_v3 = vld [vmem:[#allocation2 + $0xc0] sm:$0xff] }
 0x250   : > { %9858 = vst [vmem:[#allocation55_spill] sm:$0xff] %v7920_v6  ;;  %6024 = vmatmul.msk.f32.gmra.mxu3 %vm255_vm1, %v2305_v38 }
 0x251   : > { %6057 = vmatmul.msk.f32.gmra.mxu0 %vm255_vm1, %v9859_v31  ;;  %v9865_v31 = vld [vmem:[#allocation65_spill] sm:$0xff] }
 0x252   : > { %v1132_v17 = vpop.f32.mrf.mxu2 }
 0x253   : > { %v1410_v21 = vpop.f32.mrf.mxu3  ;;  %v1176_v50 = vadd.f32 %v1132_v17, %v9861_v60  ;;  %v7938_v60 = vpop.f32.mrf.mxu1 }
 0x255   : > { %v7929_v62 = vadd.f32 %v1410_v21, %v1176_v50  ;;  %v9868_v21 = vld [vmem:[#allocation70_spill] sm:$0xff] }
 0x256   : > { %v7931_v25 = vpop.f32.mrf.mxu0 }
 0x257   : > { %9862 = vst [vmem:[#allocation57_spill] sm:$0xff] %v7929_v62  ;;  %5991 = vmatmul.msk.f32.gmra.mxu2 %vm255_vm1, %v2028_v13  ;;  %v2308_v62 = vld [vmem:[#allocation2 + $0xc9] sm:$0xff] }
 0x258   : > { %9863 = vst [vmem:[#allocation62_spill] sm:$0xff] %v7931_v25  ;;  %6025 = vmatmul.msk.f32.gmra.mxu3 %vm255_vm1, %v2306_v59  ;;  %v9869_v25 = vld [vmem:[#allocation67_spill] sm:$0xff] }
 0x259   : > { %6058 = vmatmul.msk.f32.gmra.mxu0 %vm255_vm1, %v9864_v12  ;;  %v2974_v12 = vld [vmem:[#allocation3] sm:$0xff] }
 0x25a   : > { %v1135_v11 = vpop.f32.mrf.mxu2  ;;  %6081 = vmatmul.msk.f32.vlgmr.msra.gmra.mxu1 %vm255_vm1, %v2974_v12 }
 0x25b   : > { %v1413_v38 = vpop.f32.mrf.mxu3  ;;  %v1177_v6 = vadd.f32 %v1135_v11, %v9865_v31  ;;  %v2030_v31 = vld [vmem:[#allocation2 + $0xc8] sm:$0xff] }
 0x25d   : > { %v7940_v17 = vadd.f32 %v1413_v38, %v1177_v6 }
 0x25e   : > { %v7942_v50 = vpop.f32.mrf.mxu0 }
 0x25f   : > { %9866 = vst [vmem:[#allocation59_spill] sm:$0xff] %v7940_v17  ;;  %5992 = vmatmul.msk.f32.gmra.mxu2 %vm255_vm1, %v2029_v3  ;;  %v9873_v3 = vld [vmem:[#allocation72_spill] sm:$0xff]  ;;  %v2310_v17 = vld [vmem:[#allocation2 + $0xe1] sm:$0xff] }
 0x260   : > { %9867 = vst [vmem:[#allocation64_spill] sm:$0xff] %v7942_v50  ;;  %6026 = vmatmul.msk.f32.gmra.mxu3 %vm255_vm1, %v2307_v15  ;;  %v7954_v50 = vpop.f32.mrf.mxu1 }
 0x261   : > { %6059 = vmatmul.msk.f32.gmra.mxu0 %vm255_vm1, %v9868_v21  ;;  %9872 = vst [vmem:[#allocation63_spill] sm:$0xff] %v7954_v50 }
 0x262   : > { %v1138_v13 = vpop.f32.mrf.mxu2 }
 0x263   : > { %v1416_v59 = vpop.f32.mrf.mxu3  ;;  %v1178_v11 = vadd.f32 %v1138_v13, %v9869_v25  ;;  %v2975_v25 = vld [vmem:[#allocation3 + $0x8] sm:$0xff]  ;;  %v9874_v13 = vld [vmem:[#allocation69_spill] sm:$0xff] }
 0x264   : > { %6082 = vmatmul.msk.f32.gmra.mxu1 %vm255_vm1, %v2975_v25  ;;  %v2032_v25 = vld [vmem:[#allocation2 + $0xe0] sm:$0xff] }
 0x265   : > { %v7950_v6 = vadd.f32 %v1416_v59, %v1178_v11  ;;  %v2031_v59 = vld [vmem:[#allocation2 + $0xd8] sm:$0xff] }
 0x266   : > { %v7952_v38 = vpop.f32.mrf.mxu0  ;;  %v2309_v11 = vld [vmem:[#allocation2 + $0xd9] sm:$0xff] }
 0x267   : > { %9870 = vst [vmem:[#allocation61_spill] sm:$0xff] %v7950_v6  ;;  %5993 = vmatmul.msk.f32.gmra.mxu2 %vm255_vm1, %v2030_v31 }
 0x268   : > { %9871 = vst [vmem:[#allocation66_spill] sm:$0xff] %v7952_v38  ;;  %6027 = vmatmul.msk.f32.gmra.mxu3 %vm255_vm1, %v2308_v62  ;;  %v7970_v62 = vpop.f32.mrf.mxu1 }
 0x269   : > { %6060 = vmatmul.msk.f32.gmra.mxu0 %vm255_vm1, %v9873_v3 }
 0x26a   : > { %v1141_v15 = vpop.f32.mrf.mxu2 }
 0x26b   : > { %v1419_v21 = vpop.f32.mrf.mxu3  ;;  %v1179_v12 = vadd.f32 %v1141_v15, %v9874_v13  ;;  %v9877_v15 = vld [vmem:[#allocation71_spill] sm:$0xff] }
 0x26d   : > { %v7962_v6 = vadd.f32 %v1419_v21, %v1179_v12 }
 0x26e   : > { %v7964_v38 = vpop.f32.mrf.mxu0 }
 0x26f   : > { %9875 = vst [vmem:[#allocation68_spill] sm:$0xff] %v7962_v6  ;;  %5994 = vmatmul.msk.f32.gmra.mxu2 %vm255_vm1, %v2031_v59 }
 0x270   : > { %9876 = vst [vmem:[#allocation65_spill] sm:$0xff] %v7964_v38  ;;  %6028 = vmatmul.msk.f32.gmra.mxu3 %vm255_vm1, %v2309_v11  ;;  %v7981_v59 = vpop.f32.mrf.mxu1  ;;  %v9879_v11 = vld [vmem:[#allocation73_spill] sm:$0xff] }
 0x271   : > { %6061 = vmatmul.msk.f32.gmra.mxu0 %vm255_vm1, %v7522_v8 }
 0x272   : > { %v1144_v31 = vpop.f32.mrf.mxu2 }
 0x273   : > { %v1422_v3 = vpop.f32.mrf.mxu3  ;;  %v1180_v13 = vadd.f32 %v1144_v31, %v9877_v15  ;;  %v2033_v31 = vld [vmem:[#allocation2 + $0xf0] sm:$0xff] }
 0x274   : > { %v2311_v15 = vld [vmem:[#allocation2 + $0xf1] sm:$0xff] }
 0x275   : > { %v7973_v50 = vadd.f32 %v1422_v3, %v1180_v13 }
 0x276   : > { %v7975_v21 = vpop.f32.mrf.mxu0 }
 0x277   : > { %9878 = vst [vmem:[#allocation70_spill] sm:$0xff] %v7975_v21  ;;  %5995 = vmatmul.msk.f32.gmra.mxu2 %vm255_vm1, %v2032_v25  ;;  %v2034_v25 = vld [vmem:[#allocation2 + $0xf8] sm:$0xff] }
 0x278   : > { %6029 = vmatmul.msk.f32.gmra.mxu3 %vm255_vm1, %v2310_v17  ;;  %v2312_v21 = vld [vmem:[#allocation2 + $0xf9] sm:$0xff] }
 0x279   : > { %6062 = vmatmul.msk.f32.gmra.mxu0 %vm255_vm1, %v7535_v32 }
 0x27a   : > { %v1147_v8 = vpop.f32.mrf.mxu2 }
 0x27b   : > { %v1425_v12 = vpop.f32.mrf.mxu3  ;;  %v1181_v38 = vadd.f32 %v1147_v8, %v9879_v11  ;;  %v7993_v8 = vpop.f32.mrf.mxu1 }
 0x27d   : > { %v7984_v6 = vadd.f32 %v1425_v12, %v1181_v38 }
 0x27e   : > { %v7986_v3 = vpop.f32.mrf.mxu0 }
 0x27f   : > { %9880 = vst [vmem:[#allocation67_spill] sm:$0xff] %v7984_v6  ;;  %5996 = vmatmul.msk.f32.gmra.mxu2 %vm255_vm1, %v2033_v31 }
 0x280   : > { %9881 = vst [vmem:[#allocation72_spill] sm:$0xff] %v7986_v3  ;;  %6030 = vmatmul.msk.f32.gmra.mxu3 %vm255_vm1, %v2311_v15  ;;  %v2313_v3 = vld [vmem:[#allocation2 + $0x109] sm:$0xff] }
 0x281   : > { %6063 = vmatmul.msk.f32.gmra.mxu0 %vm255_vm1, %v7550_v27 }
 0x282   : > { %v2167_v32 = vpop.f32.mrf.mxu2 }
 0x283   : > { %v2445_v17 = vpop.f32.mrf.mxu3  ;;  %v2263_v13 = vadd.f32 %v2167_v32, %v7546_v9  ;;  %v2035_v32 = vld [vmem:[#allocation2 + $0x108] sm:$0xff] }
 0x285   : > { %v2541_v11 = vadd.f32 %v2445_v17, %v2263_v13  ;;  %v8001_v13 = vpop.f32.mrf.mxu1 }
 0x286   : > { %v2723_v38 = vpop.f32.mrf.mxu0 }
 0x287   : > { %v2819_v12 = vadd.f32 %v2723_v38, %v2541_v11  ;;  %5997 = vmatmul.msk.f32.gmra.mxu2 %vm255_vm1, %v2034_v25 }
 0x288   : > { %6031 = vmatmul.msk.f32.gmra.mxu3 %vm255_vm1, %v2312_v21 }
 0x289   : > { %6064 = vmatmul.msk.f32.gmra.mxu0 %vm255_vm1, %v7565_v33  ;;  %v2851_v31 = vmax.f32 %v2819_v12, 0.0  ;;  %v2314_v12 = vld [vmem:[#allocation2 + $0x111] sm:$0xff] }
 0x28a   : > { %v2170_v27 = vpop.f32.mrf.mxu2 }
 0x28b   : > { %v2448_v15 = vpop.f32.mrf.mxu3  ;;  %2938 = vst.msk [vmem:[#allocation3 + $0x19] sm:$0xff] %vm255_vm1, %v2851_v31  ;;  %v2264_v9 = vadd.f32 %v2170_v27, %v7561_v49 }
 0x28d   : > { %v2542_v6 = vadd.f32 %v2448_v15, %v2264_v9 }
 0x28e   : > { %v2726_v17 = vpop.f32.mrf.mxu0 }
 0x28f   : > { %v2820_v11 = vadd.f32 %v2726_v17, %v2542_v6  ;;  %5998 = vmatmul.msk.f32.gmra.mxu2 %vm255_vm1, %v2035_v32  ;;  %v2036_v6 = vld [vmem:[#allocation2 + $0x110] sm:$0xff] }
 0x290   : > { %6032 = vmatmul.msk.f32.gmra.mxu3 %vm255_vm1, %v2313_v3 }
 0x291   : > { %6065 = vmatmul.msk.f32.gmra.mxu0 %vm255_vm1, %v7580_v39  ;;  %v2852_v33 = vmax.f32 %v2820_v11, 0.0  ;;  %v8017_v39 = vpop.f32.mrf.mxu1  ;;  %v2037_v11 = vld [vmem:[#allocation2 + $0x120] sm:$0xff] }
 0x292   : > { %v2173_v21 = vpop.f32.mrf.mxu2  ;;  %v8007_v38 = vld [vmem:[#allocation3 + $0x18] sm:$0xff] }
 0x293   : > { %v2451_v25 = vpop.f32.mrf.mxu3  ;;  %2939 = vst.msk [vmem:[#allocation3 + $0x21] sm:$0xff] %vm255_vm1, %v2852_v33  ;;  %v2265_v49 = vadd.f32 %v2173_v21, %v7576_v28  ;;  %6083 = vmatmul.msk.f32.gmra.mxu1 %vm255_vm1, %v8007_v38  ;;  %v2315_v33 = vld [vmem:[#allocation2 + $0x121] sm:$0xff] }
 0x295   : > { %v2543_v31 = vadd.f32 %v2451_v25, %v2265_v49 }
 0x296   : > { %v2729_v27 = vpop.f32.mrf.mxu0 }
 0x297   : > { %v2821_v3 = vadd.f32 %v2729_v27, %v2543_v31  ;;  %5999 = vmatmul.msk.f32.gmra.mxu2 %vm255_vm1, %v2036_v6 }
 0x298   : > { %6033 = vmatmul.msk.f32.gmra.mxu3 %vm255_vm1, %v2314_v12 }
 0x299   : > { %6066 = vmatmul.msk.f32.gmra.mxu0 %vm255_vm1, %v7599_v44  ;;  %v2853_v15 = vmax.f32 %v2821_v3, 0.0  ;;  %v2038_v3 = vld [vmem:[#allocation2 + $0x128] sm:$0xff] }
 0x29a   : > { %v2176_v9 = vpop.f32.mrf.mxu2  ;;  %v8019_v32 = vld [vmem:[#allocation3 + $0x20] sm:$0xff] }
 0x29b   : > { %v2454_v28 = vpop.f32.mrf.mxu3  ;;  %2940 = vst.msk [vmem:[#allocation3 + $0x31] sm:$0xff] %vm255_vm1, %v2853_v15  ;;  %v2266_v17 = vadd.f32 %v2176_v9, %v7591_v43  ;;  %6084 = vmatmul.msk.f32.gmra.mxu1 %vm255_vm1, %v8019_v32  ;;  %v8031_v43 = vpop.f32.mrf.mxu1  ;;  %v2316_v15 = vld [vmem:[#allocation2 + $0x129] sm:$0xff] }
 0x29d   : > { %v2544_v21 = vadd.f32 %v2454_v28, %v2266_v17 }
 0x29e   : > { %v2732_v25 = vpop.f32.mrf.mxu0 }
 0x29f   : > { %v2822_v49 = vadd.f32 %v2732_v25, %v2544_v21  ;;  %6000 = vmatmul.msk.f32.gmra.mxu2 %vm255_vm1, %v2037_v11  ;;  %v2039_v25 = vld [vmem:[#allocation2 + $0x138] sm:$0xff] }
 0x2a0   : > { %6034 = vmatmul.msk.f32.gmra.mxu3 %vm255_vm1, %v2315_v33 }
 0x2a1   : > { %6067 = vmatmul.msk.f32.gmra.mxu0 %vm255_vm1, %v7618_v51  ;;  %v2854_v44 = vmax.f32 %v2822_v49, 0.0  ;;  %v2317_v49 = vld [vmem:[#allocation2 + $0x139] sm:$0xff] }
 0x2a2   : > { %v2179_v6 = vpop.f32.mrf.mxu2  ;;  %v8029_v31 = vld [vmem:[#allocation3 + $0x30] sm:$0xff] }
 0x2a3   : > { %v2457_v12 = vpop.f32.mrf.mxu3  ;;  %2941 = vst.msk [vmem:[#allocation3 + $0x39] sm:$0xff] %vm255_vm1, %v2854_v44  ;;  %v2267_v27 = vadd.f32 %v2179_v6, %v7614_v20  ;;  %6085 = vmatmul.msk.f32.gmra.mxu1 %vm255_vm1, %v8029_v31  ;;  %v8047_v44 = vpop.f32.mrf.mxu1 }
 0x2a5   : > { %v2545_v9 = vadd.f32 %v2457_v12, %v2267_v27 }
 0x2a6   : > { %v2735_v28 = vpop.f32.mrf.mxu0 }
 0x2a7   : > { %v2823_v17 = vadd.f32 %v2735_v28, %v2545_v9  ;;  %6001 = vmatmul.msk.f32.gmra.mxu2 %vm255_vm1, %v2038_v3  ;;  %v2040_v28 = vld [vmem:[#allocation2 + $0x140] sm:$0xff] }
 0x2a8   : > { %6035 = vmatmul.msk.f32.gmra.mxu3 %vm255_vm1, %v2316_v15 }
 0x2a9   : > { %6068 = vmatmul.msk.f32.gmra.mxu0 %vm255_vm1, %v7637_v57  ;;  %v2855_v51 = vmax.f32 %v2823_v17, 0.0  ;;  %v2318_v17 = vld [vmem:[#allocation2 + $0x141] sm:$0xff] }
 0x2aa   : > { %v2182_v11 = vpop.f32.mrf.mxu2  ;;  %v8041_v21 = vld [vmem:[#allocation3 + $0x38] sm:$0xff] }
 0x2ab   : > { %v2460_v33 = vpop.f32.mrf.mxu3  ;;  %2942 = vst.msk [vmem:[#allocation3 + $0x49] sm:$0xff] %vm255_vm1, %v2855_v51  ;;  %v2268_v20 = vadd.f32 %v2182_v11, %v7633_v18  ;;  %6086 = vmatmul.msk.f32.gmra.mxu1 %vm255_vm1, %v8041_v21 }
 0x2ad   : > { %v2546_v6 = vadd.f32 %v2460_v33, %v2268_v20  ;;  %v8059_v33 = vpop.f32.mrf.mxu1 }
 0x2ae   : > { %v2738_v12 = vpop.f32.mrf.mxu0 }
 0x2af   : > { %v2824_v27 = vadd.f32 %v2738_v12, %v2546_v6  ;;  %6002 = vmatmul.msk.f32.gmra.mxu2 %vm255_vm1, %v2039_v25  ;;  %v2041_v12 = vld [vmem:[#allocation2 + $0x150] sm:$0xff] }
 0x2b0   : > { %6036 = vmatmul.msk.f32.gmra.mxu3 %vm255_vm1, %v2317_v49 }
 0x2b1   : > { %6069 = vmatmul.msk.f32.gmra.mxu0 %vm255_vm1, %v7652_v61  ;;  %v2856_v57 = vmax.f32 %v2824_v27, 0.0  ;;  %v2319_v27 = vld [vmem:[#allocation2 + $0x151] sm:$0xff] }
 0x2b2   : > { %v2185_v3 = vpop.f32.mrf.mxu2  ;;  %v8053_v15 = vld [vmem:[#allocation3 + $0x48] sm:$0xff] }
 0x2b3   : > { %v2463_v18 = vpop.f32.mrf.mxu3  ;;  %2943 = vst.msk [vmem:[#allocation3 + $0x51] sm:$0xff] %vm255_vm1, %v2856_v57  ;;  %v2269_v9 = vadd.f32 %v2185_v3, %v7648_v5  ;;  %6087 = vmatmul.msk.f32.gmra.mxu1 %vm255_vm1, %v8053_v15  ;;  %v1714_v57 = vadd.f32 %v7669_v46, %v7667_v22  ;;  %v2042_v46 = vld [vmem:[#allocation2 + $0x158] sm:$0xff] }
 0x2b5   : > { %v2547_v51 = vadd.f32 %v2463_v18, %v2269_v9  ;;  %v8078_v9 = vpop.f32.mrf.mxu1 }
 0x2b6   : > { %v2741_v11 = vpop.f32.mrf.mxu0 }
 0x2b7   : > { %v2825_v20 = vadd.f32 %v2741_v11, %v2547_v51  ;;  %6003 = vmatmul.msk.f32.gmra.mxu2 %vm255_vm1, %v2040_v28 }
 0x2b8   : > { %6037 = vmatmul.msk.f32.gmra.mxu3 %vm255_vm1, %v2318_v17 }
 0x2b9   : > { %6070 = vmatmul.msk.f32.gmra.mxu0 %vm255_vm1, %v7671_v10  ;;  %v2857_v61 = vmax.f32 %v2825_v20, 0.0  ;;  %v2320_v20 = vld [vmem:[#allocation2 + $0x159] sm:$0xff] }
 0x2ba   : > { %v2188_v25 = vpop.f32.mrf.mxu2  ;;  %v8065_v49 = vld [vmem:[#allocation3 + $0x50] sm:$0xff] }
 0x2bb   : > { %v2466_v5 = vpop.f32.mrf.mxu3  ;;  %2944 = vst.msk [vmem:[#allocation3 + $0x61] sm:$0xff] %vm255_vm1, %v2857_v61  ;;  %v2270_v6 = vadd.f32 %v2188_v25, %v7663_v42  ;;  %6088 = vmatmul.msk.f32.gmra.mxu1 %vm255_vm1, %v8065_v49  ;;  %v1992_v42 = vadd.f32 %v7828_v0, %v1714_v57 }
 0x2bd   : > { %v2548_v3 = vadd.f32 %v2466_v5, %v2270_v6 }
 0x2be   : > { %v2744_v18 = vpop.f32.mrf.mxu0 }
 0x2bf   : > { %v2826_v10 = vadd.f32 %v2744_v18, %v2548_v3  ;;  %6004 = vmatmul.msk.f32.gmra.mxu2 %vm255_vm1, %v2041_v12  ;;  %v8094_v3 = vpop.f32.mrf.mxu1  ;;  %v2321_v18 = vld [vmem:[#allocation2 + $0x169] sm:$0xff] }
 0x2c0   : > { %6038 = vmatmul.msk.f32.gmra.mxu3 %vm255_vm1, %v2319_v27 }
 0x2c1   : > { %6071 = vmatmul.msk.f32.gmra.mxu0 %vm255_vm1, %v7693_v35  ;;  %v2858_v28 = vmax.f32 %v2826_v10, 0.0  ;;  %v1715_v35 = vadd.f32 %v7691_v19, %v7689_v24  ;;  %v2043_v19 = vld [vmem:[#allocation2 + $0x168] sm:$0xff] }
 0x2c2   : > { %v2191_v17 = vpop.f32.mrf.mxu2  ;;  %v8080_v11 = vld [vmem:[#allocation3 + $0x60] sm:$0xff] }
 0x2c3   : > { %v2469_v51 = vpop.f32.mrf.mxu3  ;;  %2945 = vst.msk [vmem:[#allocation3 + $0x69] sm:$0xff] %vm255_vm1, %v2858_v28  ;;  %v2271_v22 = vadd.f32 %v2191_v17, %v1992_v42  ;;  %6089 = vmatmul.msk.f32.gmra.mxu1 %vm255_vm1, %v8080_v11  ;;  %v1993_v5 = vadd.f32 %v7843_v34, %v1715_v35  ;;  %v1717_v35 = vadd.f32 %v7730_v63, %v7728_v16 }
 0x2c4   : > { %v1718_v63 = vadd.f32 %v7747_v48, %v7745_v47 }
 0x2c5   : > { %v2549_v61 = vadd.f32 %v2469_v51, %v2271_v22 }
 0x2c6   : > { %v2747_v0 = vpop.f32.mrf.mxu0  ;;  %v1996_v47 = vadd.f32 %v7885_v30, %v1718_v63  ;;  %v2326_v63 = vld [vmem:[#allocation2 + $0x1a1] sm:$0xff] }
 0x2c7   : > { %v2827_v25 = vadd.f32 %v2747_v0, %v2549_v61  ;;  %6005 = vmatmul.msk.f32.gmra.mxu2 %vm255_vm1, %v2042_v46  ;;  %v8113_v61 = vpop.f32.mrf.mxu1 }
 0x2c8   : > { %6039 = vmatmul.msk.f32.gmra.mxu3 %vm255_vm1, %v2320_v20  ;;  %v2322_v20 = vld [vmem:[#allocation2 + $0x171] sm:$0xff] }
 0x2c9   : > { %6072 = vmatmul.msk.f32.gmra.mxu0 %vm255_vm1, %v7715_v52  ;;  %v2859_v6 = vmax.f32 %v2827_v25, 0.0  ;;  %v1716_v52 = vadd.f32 %v7713_v55, %v7711_v7  ;;  %v2044_v55 = vld [vmem:[#allocation2 + $0x170] sm:$0xff]  ;;  %v1995_v25 = vadd.f32 %v7873_v4, %v1717_v35  ;;  %v6147_v4 = vld [vmem:[%s9653_s3 + $0x8] sm:$0xf] }
 0x2ca   : > { %v2194_v12 = vpop.f32.mrf.mxu2  ;;  %v8092_v57 = vld [vmem:[#allocation3 + $0x68] sm:$0xff]  ;;  %6148 = vmatpush.msk.msrb.mxu3 %vm477_vm0, %v6147_v4 }
 0x2cb   : > { %v2472_v27 = vpop.f32.mrf.mxu3  ;;  %2946 = vst.msk [vmem:[#allocation3 + $0x79] sm:$0xff] %vm255_vm1, %v2859_v6  ;;  %v2272_v24 = vadd.f32 %v2194_v12, %v1993_v5  ;;  %6090 = vmatmul.msk.f32.gmra.mxu1 %vm255_vm1, %v8092_v57  ;;  %v1994_v28 = vadd.f32 %v7858_v56, %v1716_v52 }
 0x2cd   : > { %v2550_v10 = vadd.f32 %v2472_v27, %v2272_v24 }
 0x2ce   : > { %v2750_v34 = vpop.f32.mrf.mxu0 }
 0x2cf   : > { %v2828_v42 = vadd.f32 %v2750_v34, %v2550_v10  ;;  %6006 = vmatmul.msk.f32.gmra.mxu2 %vm255_vm1, %v2043_v19 }
 0x2d0   : > { %6040 = vmatmul.msk.f32.gmra.mxu3 %vm255_vm1, %v2321_v18  ;;  %v8135_v18 = vpop.f32.mrf.mxu1 }
 0x2d1   : > { %6073 = vmatmul.msk.f32.gmra.mxu0 %vm255_vm1, %v7732_v58  ;;  %v2860_v17 = vmax.f32 %v2828_v42, 0.0 }
 0x2d2   : > { %v2197_v51 = vpop.f32.mrf.mxu2  ;;  %v8106_v46 = vld [vmem:[#allocation3 + $0x78] sm:$0xff] }
 0x2d3   : > { %v2475_v22 = vpop.f32.mrf.mxu3  ;;  %2947 = vst.msk [vmem:[#allocation3 + $0x81] sm:$0xff] %vm255_vm1, %v2860_v17  ;;  %v2273_v7 = vadd.f32 %v2197_v51, %v1994_v28  ;;  %6091 = vmatmul.msk.f32.gmra.mxu1 %vm255_vm1, %v8106_v46 }
 0x2d5   : > { %v2551_v58 = vadd.f32 %v2475_v22, %v2273_v7 }
 0x2d6   : > { %v2753_v56 = vpop.f32.mrf.mxu0 }
 0x2d7   : > { %v2829_v0 = vadd.f32 %v2753_v56, %v2551_v58  ;;  %6007 = vmatmul.msk.f32.gmra.mxu2 %vm255_vm1, %v2044_v55  ;;  %v2047_v55 = vld [vmem:[#allocation2 + $0x198] sm:$0xff]  ;;  %v9882_v56 = vld [vmem:[#allocation53_spill] sm:$0xff] }
 0x2d8   : > { %6041 = vmatmul.msk.f32.gmra.mxu3 %vm255_vm1, %v2322_v20  ;;  %v8161_v22 = vpop.f32.mrf.mxu1  ;;  %v2325_v20 = vld [vmem:[#allocation2 + $0x199] sm:$0xff] }
 0x2d9   : > { %6074 = vmatmul.msk.f32.gmra.mxu0 %vm255_vm1, %v7749_v29  ;;  %v2861_v5 = vmax.f32 %v2829_v0, 0.0  ;;  %v6113_v29 = vld [vmem:[%s9653_s3 + $0x4] sm:$0xf] }
 0x2da   : > { %v2200_v6 = vpop.f32.mrf.mxu2  ;;  %v8120_v27 = vld [vmem:[#allocation3 + $0x80] sm:$0xff]  ;;  %6114 = vmatpush.msk.msrb.mxu2 %vm477_vm0, %v6113_v29 }
 0x2db   : > { %v2478_v12 = vpop.f32.mrf.mxu3  ;;  %2948 = vst.msk [vmem:[#allocation3 + $0x91] sm:$0xff] %vm255_vm1, %v2861_v5  ;;  %v2274_v16 = vadd.f32 %v2200_v6, %v1995_v25  ;;  %6092 = vmatmul.msk.f32.gmra.mxu1 %vm255_vm1, %v8120_v27 }
 0x2dd   : > { %v2552_v24 = vadd.f32 %v2478_v12, %v2274_v16  ;;  %v2048_v16 = vld [vmem:[#allocation2 + $0x1a0] sm:$0xff] }
 0x2de   : > { %v2756_v19 = vpop.f32.mrf.mxu0 }
 0x2df   : > { %v2830_v52 = vadd.f32 %v2756_v19, %v2552_v24  ;;  %6008 = vmatmul.msk.f32.gmra.mxu2 %vm255_vm1, %v7760_v54  ;;  %v1719_v54 = vadd.f32 %v7766_v40, %v7764_v45  ;;  %v9883_v24 = vld [vmem:[#allocation37_spill] sm:$0xff]  ;;  %v9884_v19 = vld [vmem:[#allocation39_spill] sm:$0xff] }
 0x2e0   : > { %6042 = vmatmul.msk.f32.gmra.mxu3 %vm255_vm1, %v7787_v14 }
 0x2e1   : > { %6075 = vmatmul.msk.f32.gmra.mxu0 %vm255_vm1, %v7768_v36  ;;  %v2862_v48 = vmax.f32 %v2830_v52, 0.0  ;;  %v6181_v36 = vld [vmem:[%s9653_s3 + $0xc] sm:$0xf]  ;;  %v1997_v30 = vadd.f32 %v7900_v37, %v1719_v54  ;;  %v2603_v52 = vld [vmem:[#allocation2 + $0x19a] sm:$0xff] }
 0x2e2   : > { %v2203_v10 = vpop.f32.mrf.mxu2  ;;  %v8144_v42 = vld [vmem:[#allocation3 + $0x90] sm:$0xff]  ;;  %6182 = vmatpush.msk.msrb.mxu0 %vm477_vm0, %v6181_v36  ;;  %v3529_v36 = vld [vmem:[#allocation3 + $0x2] sm:$0xff] }
 0x2e3   : > { %v2481_v34 = vpop.f32.mrf.mxu3  ;;  %2949 = vst.msk [vmem:[#allocation3 + $0x99] sm:$0xff] %vm255_vm1, %v2862_v48  ;;  %v2275_v28 = vadd.f32 %v2203_v10, %v1996_v47  ;;  %6093 = vmatmul.msk.f32.gmra.mxu1 %vm255_vm1, %v8144_v42  ;;  %v9885_v48 = vld [vmem:[#allocation60_spill] sm:$0xff] }
 0x2e5   : > { %v2553_v14 = vadd.f32 %v2481_v34, %v2275_v28 }
 0x2e6   : > { %v2759_v17 = vpop.f32.mrf.mxu0 }
 0x2e7   : > { %v2831_v51 = vadd.f32 %v2759_v17, %v2553_v14  ;;  %6009 = vmatmul.msk.f32.gmra.mxu2 %vm255_vm1, %v7779_v23 }
 0x2e8   : > { %6043 = vmatmul.msk.f32.gmra.mxu3 %vm255_vm1, %v7806_v1 }
 0x2e9   : > { %6076 = vmatmul.msk.f32.gmra.mxu0 %vm255_vm1, %v7789_v2  ;;  %v2863_v45 = vmax.f32 %v2831_v51, 0.0  ;;  %v1720_v2 = vadd.f32 %v7785_v41, %v7783_v26  ;;  %v8181_v41 = vpop.f32.mrf.mxu1  ;;  %v3251_v51 = vld [vmem:[#allocation3 + $0x1] sm:$0xff] }
 0x2ea   : > { %v2206_v40 = vpop.f32.mrf.mxu2  ;;  %v8164_v23 = vld [vmem:[#allocation3 + $0x98] sm:$0xff] }
 0x2eb   : > { %v2484_v7 = vpop.f32.mrf.mxu3  ;;  %2950 = vst.msk [vmem:[#allocation3 + $0xa9] sm:$0xff] %vm255_vm1, %v2863_v45  ;;  %v2276_v1 = vadd.f32 %v2206_v40, %v1997_v30  ;;  %6094 = vmatmul.msk.f32.gmra.mxu1 %vm255_vm1, %v8164_v23  ;;  %v1998_v0 = vadd.f32 %v9882_v56, %v1720_v2  ;;  %v9886_v45 = vld [vmem:[#allocation38_spill] sm:$0xff]  ;;  %v9887_v40 = vld [vmem:[#allocation41_spill] sm:$0xff] }
 0x2ed   : > { %v2554_v37 = vadd.f32 %v2484_v7, %v2276_v1  ;;  %v1722_v7 = vadd.f32 %v9887_v40, %v9886_v45  ;;  %v8223_v45 = vld [vmem:[#allocation3 + $0x19] sm:$0xff] }
 0x2ee   : > { %v2762_v35 = vpop.f32.mrf.mxu0 }
 0x2ef   : > { %v2832_v58 = vadd.f32 %v2762_v35, %v2554_v37  ;;  %6010 = vmatmul.msk.f32.gmra.mxu2 %vm255_vm1, %v2047_v55  ;;  %v2000_v37 = vadd.f32 %v7938_v60, %v1722_v7 }
 0x2f0   : > { %6044 = vmatmul.msk.f32.gmra.mxu3 %vm255_vm1, %v2325_v20  ;;  %v2604_v20 = vld [vmem:[#allocation2 + $0x1a2] sm:$0xff] }
 0x2f1   : > { %6077 = vmatmul.msk.f32.gmra.mxu0 %vm255_vm1, %v7808_v53  ;;  %v2864_v25 = vmax.f32 %v2832_v58, 0.0  ;;  %v1721_v53 = vadd.f32 %v9884_v19, %v9883_v24  ;;  %v8194_v30 = vpop.f32.mrf.mxu1 }
 0x2f2   : > { %v2209_v5 = vpop.f32.mrf.mxu2  ;;  %v8176_v12 = vld [vmem:[#allocation3 + $0xa8] sm:$0xff] }
 0x2f3   : > { %v2487_v6 = vpop.f32.mrf.mxu3  ;;  %2951 = vst.msk [vmem:[#allocation3 + $0xb1] sm:$0xff] %vm255_vm1, %v2864_v25  ;;  %v2277_v26 = vadd.f32 %v2209_v5, %v1998_v0  ;;  %6095 = vmatmul.msk.f32.gmra.mxu1 %vm255_vm1, %v8176_v12  ;;  %v1999_v10 = vadd.f32 %v9885_v48, %v1721_v53  ;;  %v3252_v5 = vld [vmem:[#allocation3 + $0x9] sm:$0xff] }
 0x2f5   : > { %v2555_v29 = vadd.f32 %v2487_v6, %v2277_v26  ;;  %v3530_v6 = vld [vmem:[#allocation3 + $0xa] sm:$0xff] }
 0x2f6   : > { %v2765_v4 = vpop.f32.mrf.mxu0  ;;  %v9888_v26 = vld [vmem:[#allocation40_spill] sm:$0xff] }
 0x2f7   : > { %v2833_v47 = vadd.f32 %v2765_v4, %v2555_v29  ;;  %6011 = vmatmul.msk.f32.gmra.mxu2 %vm255_vm1, %v2048_v16  ;;  %v9889_v16 = vld [vmem:[#allocation43_spill] sm:$0xff] }
 0x2f8   : > { %6045 = vmatmul.msk.f32.gmra.mxu3 %vm255_vm1, %v2326_v63  ;;  %v1723_v63 = vadd.f32 %v9889_v16, %v9888_v26  ;;  %v9890_v29 = vld [vmem:[#allocation63_spill] sm:$0xff] }
 0x2f9   : > { %6078 = vmatmul.msk.f32.gmra.mxu0 %vm255_vm1, %v2603_v52  ;;  %v2865_v34 = vmax.f32 %v2833_v47, 0.0  ;;  %v8209_v53 = vpop.f32.mrf.mxu1  ;;  %v8243_v26 = vld [vmem:[#allocation3 + $0x21] sm:$0xff] }
 0x2fa   : > { %v2212_v28 = vpop.f32.mrf.mxu2  ;;  %v8189_v14 = vld [vmem:[#allocation3 + $0xb0] sm:$0xff]  ;;  %v2001_v4 = vadd.f32 %v9890_v29, %v1723_v63 }
 0x2fb   : > { %v2490_v54 = vpop.f32.mrf.mxu3  ;;  %2952 = vst.msk [vmem:[#allocation3 + $0xc1] sm:$0xff] %vm255_vm1, %v2865_v34  ;;  %v2278_v17 = vadd.f32 %v2212_v28, %v1999_v10  ;;  %6096 = vmatmul.msk.f32.gmra.mxu1 %vm255_vm1, %v8189_v14  ;;  %v9891_v28 = vld [vmem:[#allocation42_spill] sm:$0xff] }
 0x2fd   : > { %v2556_v1 = vadd.f32 %v2490_v54, %v2278_v17  ;;  %v9892_v54 = vld [vmem:[#allocation44_spill] sm:$0xff] }
 0x2fe   : > { %v2768_v55 = vpop.f32.mrf.mxu0  ;;  %v1724_v17 = vadd.f32 %v9892_v54, %v9891_v28  ;;  %v8263_v54 = vld [vmem:[#allocation3 + $0x31] sm:$0xff] }
 0x2ff   : > { %v2834_v2 = vadd.f32 %v2768_v55, %v2556_v1  ;;  %6115 = vmatmul.msk.f32.vlgmr.msrb.gmra.mxu2 %vm255_vm1, %v3251_v51 }
 0x300   : > { %6149 = vmatmul.msk.f32.vlgmr.msrb.gmra.mxu3 %vm255_vm1, %v3529_v36  ;;  %v2002_v1 = vadd.f32 %v7970_v62, %v1724_v17 }
 0x301   : > { %6079 = vmatmul.msk.f32.gmra.mxu0 %vm255_vm1, %v2604_v20  ;;  %v2866_v35 = vmax.f32 %v2834_v2, 0.0 }
 0x302   : > { %v2215_v58 = vpop.f32.mrf.mxu2  ;;  %v8202_v0 = vld [vmem:[#allocation3 + $0xc0] sm:$0xff] }
 0x303   : > { %v2493_v56 = vpop.f32.mrf.mxu3  ;;  %2953 = vst.msk [vmem:[#allocation3 + $0xc9] sm:$0xff] %vm255_vm1, %v2866_v35  ;;  %v2279_v25 = vadd.f32 %v2215_v58, %v2000_v37  ;;  %6097 = vmatmul.msk.f32.gmra.mxu1 %vm255_vm1, %v8202_v0  ;;  %v9893_v58 = vld [vmem:[#allocation74_spill] sm:$0xff] }
 0x305   : > { %v2557_v24 = vadd.f32 %v2493_v56, %v2279_v25  ;;  %v9894_v56 = vld [vmem:[#allocation75_spill] sm:$0xff] }
 0x306   : > { %v2771_v19 = vpop.f32.mrf.mxu0  ;;  %v1725_v25 = vadd.f32 %v9894_v56, %v9893_v58 }
 0x307   : > { %v2835_v60 = vadd.f32 %v2771_v19, %v2557_v24  ;;  %6116 = vmatmul.msk.f32.gmra.mxu2 %vm255_vm1, %v3252_v5 }
 0x308   : > { %6150 = vmatmul.msk.f32.gmra.mxu3 %vm255_vm1, %v3530_v6  ;;  %v2003_v63 = vadd.f32 %v7981_v59, %v1725_v25 }
 0x309   : > { %6183 = vmatmul.msk.f32.vlgmr.msrb.gmra.mxu0 %vm255_vm1, %v8007_v38  ;;  %v2867_v52 = vmax.f32 %v2835_v60, 0.0  ;;  %v8225_v38 = vld [vmem:[#allocation3 + $0x1a] sm:$0xff] }
 0x30a   : > { %v2218_v47 = vpop.f32.mrf.mxu2  ;;  %v8216_v10 = vld [vmem:[#allocation3 + $0xc8] sm:$0xff] }
 0x30b   : > { %v2496_v48 = vpop.f32.mrf.mxu3  ;;  %2954 = vst.msk [vmem:[#allocation3 + $0xd9] sm:$0xff] %vm255_vm1, %v2867_v52  ;;  %v2280_v34 = vadd.f32 %v2218_v47, %v2001_v4  ;;  %6098 = vmatmul.msk.f32.gmra.mxu1 %vm255_vm1, %v8216_v10  ;;  %v9895_v52 = vld [vmem:[#allocation45_spill] sm:$0xff]  ;;  %v9896_v47 = vld [vmem:[#allocation48_spill] sm:$0xff] }
 0x30d   : > { %v2558_v51 = vadd.f32 %v2496_v48, %v2280_v34  ;;  %v1726_v48 = vadd.f32 %v9896_v47, %v9895_v52  ;;  %v9899_v47 = vld [vmem:[#allocation47_spill] sm:$0xff] }
 0x30e   : > { %v2774_v36 = vpop.f32.mrf.mxu0 }
 0x30f   : > { %v2836_v40 = vadd.f32 %v2774_v36, %v2558_v51  ;;  %6117 = vmatmul.msk.f32.gmra.mxu2 %vm255_vm1, %v8223_v45  ;;  %v2004_v51 = vadd.f32 %v7993_v8, %v1726_v48  ;;  %v6215_v8 = vld [vmem:[%s9653_s3 + $0x10] sm:$0xf]  ;;  %v9900_v48 = vld [vmem:[#allocation52_spill] sm:$0xff] }
 0x310   : > { %6151 = vmatmul.msk.f32.gmra.mxu3 %vm255_vm1, %v8225_v38  ;;  %v8231_v7 = vpop.f32.mrf.mxu1  ;;  %6216 = vmatpush.msk.msrb.mxu1 %vm477_vm0, %v6215_v8 }
 0x311   : > { %6184 = vmatmul.msk.f32.gmra.mxu0 %vm255_vm1, %v8019_v32  ;;  %v2868_v55 = vmax.f32 %v2836_v40, 0.0  ;;  %v8245_v32 = vld [vmem:[#allocation3 + $0x22] sm:$0xff] }
 0x312   : > { %v2221_v20 = vpop.f32.mrf.mxu2  ;;  %v8236_v37 = vld [vmem:[#allocation3 + $0xd8] sm:$0xff] }
 0x313   : > { %v2499_v2 = vpop.f32.mrf.mxu3  ;;  %2955 = vst.msk [vmem:[#allocation3 + $0xe1] sm:$0xff] %vm255_vm1, %v2868_v55  ;;  %v2281_v35 = vadd.f32 %v2221_v20, %v2002_v1  ;;  %6099 = vmatmul.msk.f32.gmra.mxu1 %vm255_vm1, %v8236_v37 }
 0x315   : > { %v2559_v5 = vadd.f32 %v2499_v2, %v2281_v35  ;;  %v9897_v2 = vld [vmem:[#allocation46_spill] sm:$0xff] }
 0x316   : > { %v2777_v6 = vpop.f32.mrf.mxu0  ;;  %v9898_v35 = vld [vmem:[#allocation50_spill] sm:$0xff] }
 0x317   : > { %v2837_v62 = vadd.f32 %v2777_v6, %v2559_v5  ;;  %6118 = vmatmul.msk.f32.gmra.mxu2 %vm255_vm1, %v8243_v26  ;;  %v1727_v58 = vadd.f32 %v9898_v35, %v9897_v2  ;;  %v8288_v5 = vld [vmem:[#allocation3 + $0x3a] sm:$0xff] }
 0x318   : > { %6152 = vmatmul.msk.f32.gmra.mxu3 %vm255_vm1, %v8245_v32  ;;  %v8251_v16 = vpop.f32.mrf.mxu1 }
 0x319   : > { %6185 = vmatmul.msk.f32.gmra.mxu0 %vm255_vm1, %v8029_v31  ;;  %v2869_v24 = vmax.f32 %v2837_v62, 0.0  ;;  %v8265_v31 = vld [vmem:[#allocation3 + $0x32] sm:$0xff] }
 0x31a   : > { %v2224_v19 = vpop.f32.mrf.mxu2  ;;  %v8256_v29 = vld [vmem:[#allocation3 + $0xe0] sm:$0xff] }
 0x31b   : > { %v2502_v60 = vpop.f32.mrf.mxu3  ;;  %2956 = vst.msk [vmem:[#allocation3 + $0xf1] sm:$0xff] %vm255_vm1, %v2869_v24  ;;  %v2282_v4 = vadd.f32 %v2224_v19, %v2003_v63  ;;  %6100 = vmatmul.msk.f32.gmra.mxu1 %vm255_vm1, %v8256_v29  ;;  %v2005_v63 = vadd.f32 %v8001_v13, %v1727_v58 }
 0x31d   : > { %v2560_v34 = vadd.f32 %v2502_v60, %v2282_v4 }
 0x31e   : > { %v2780_v28 = vpop.f32.mrf.mxu0 }
 0x31f   : > { %v2838_v59 = vadd.f32 %v2780_v28, %v2560_v34  ;;  %6119 = vmatmul.msk.f32.gmra.mxu2 %vm255_vm1, %v8263_v54  ;;  %v1728_v34 = vadd.f32 %v9900_v48, %v9899_v47 }
 0x320   : > { %6153 = vmatmul.msk.f32.gmra.mxu3 %vm255_vm1, %v8265_v31  ;;  %v8271_v17 = vpop.f32.mrf.mxu1 }
 0x321   : > { %6186 = vmatmul.msk.f32.gmra.mxu0 %vm255_vm1, %v8041_v21  ;;  %v2870_v36 = vmax.f32 %v2838_v59, 0.0  ;;  %v8286_v21 = vld [vmem:[#allocation3 + $0x39] sm:$0xff] }
 0x322   : > { %v2227_v40 = vpop.f32.mrf.mxu2  ;;  %v8276_v55 = vld [vmem:[#allocation3 + $0xf0] sm:$0xff] }
 0x323   : > { %v2505_v1 = vpop.f32.mrf.mxu3  ;;  %2957 = vst.msk [vmem:[#allocation3 + $0xf9] sm:$0xff] %vm255_vm1, %v2870_v36  ;;  %v2283_v20 = vadd.f32 %v2227_v40, %v2004_v51  ;;  %6101 = vmatmul.msk.f32.gmra.mxu1 %vm255_vm1, %v8276_v55  ;;  %v8307_v51 = vld [vmem:[#allocation3 + $0x49] sm:$0xff]  ;;  %v2006_v40 = vadd.f32 %v8017_v39, %v1728_v34 }
 0x325   : > { %v2561_v56 = vadd.f32 %v2505_v1, %v2283_v20 }
 0x326   : > { %v2783_v25 = vpop.f32.mrf.mxu0 }
 0x327   : > { %v2839_v6 = vadd.f32 %v2783_v25, %v2561_v56  ;;  %6120 = vmatmul.msk.f32.gmra.mxu2 %vm255_vm1, %v8286_v21  ;;  %v9901_v56 = vld [vmem:[#allocation49_spill] sm:$0xff]  ;;  %v9902_v25 = vld [vmem:[#allocation54_spill] sm:$0xff] }
 0x328   : > { %6154 = vmatmul.msk.f32.gmra.mxu3 %vm255_vm1, %v8288_v5  ;;  %v8295_v62 = vpop.f32.mrf.mxu1  ;;  %v1729_v8 = vadd.f32 %v9902_v25, %v9901_v56 }
 0x329   : > { %6187 = vmatmul.msk.f32.gmra.mxu0 %vm255_vm1, %v8053_v15  ;;  %v2871_v24 = vmax.f32 %v2839_v6, 0.0  ;;  %v8309_v15 = vld [vmem:[#allocation3 + $0x4a] sm:$0xff] }
 0x32a   : > { %v2230_v19 = vpop.f32.mrf.mxu2  ;;  %v8300_v4 = vld [vmem:[#allocation3 + $0xf8] sm:$0xff] }
 0x32b   : > { %v2508_v60 = vpop.f32.mrf.mxu3  ;;  %2958 = vst.msk [vmem:[#allocation3 + $0x109] sm:$0xff] %vm255_vm1, %v2871_v24  ;;  %v2284_v52 = vadd.f32 %v2230_v19, %v2005_v63  ;;  %6102 = vmatmul.msk.f32.gmra.mxu1 %vm255_vm1, %v8300_v4  ;;  %v8327_v24 = vld [vmem:[#allocation3 + $0x51] sm:$0xff] }
 0x32d   : > { %v2562_v28 = vadd.f32 %v2508_v60, %v2284_v52  ;;  %v2007_v60 = vadd.f32 %v8031_v43, %v1729_v8 }
 0x32e   : > { %v2786_v59 = vpop.f32.mrf.mxu0 }
 0x32f   : > { %v2840_v13 = vadd.f32 %v2786_v59, %v2562_v28  ;;  %6121 = vmatmul.msk.f32.gmra.mxu2 %vm255_vm1, %v8307_v51  ;;  %v9904_v59 = vld [vmem:[#allocation51_spill] sm:$0xff] }
 0x330   : > { %6155 = vmatmul.msk.f32.gmra.mxu3 %vm255_vm1, %v8309_v15  ;;  %v8315_v36 = vpop.f32.mrf.mxu1 }
 0x331   : > { %6188 = vmatmul.msk.f32.gmra.mxu0 %vm255_vm1, %v8065_v49  ;;  %v2872_v1 = vmax.f32 %v2840_v13, 0.0  ;;  %v8329_v49 = vld [vmem:[#allocation3 + $0x52] sm:$0xff]  ;;  %v9905_v13 = vld [vmem:[#allocation56_spill] sm:$0xff] }
 0x332   : > { %v2233_v20 = vpop.f32.mrf.mxu2  ;;  %v8320_v35 = vld [vmem:[#allocation3 + $0x108] sm:$0xff]  ;;  %9903 = vst [vmem:[#allocation69_spill] sm:$0xff] %v8329_v49 }
 0x333   : > { %v2511_v2 = vpop.f32.mrf.mxu3  ;;  %2959 = vst.msk [vmem:[#allocation3 + $0x111] sm:$0xff] %vm255_vm1, %v2872_v1  ;;  %v2285_v58 = vadd.f32 %v2233_v20, %v2006_v40  ;;  %6103 = vmatmul.msk.f32.gmra.mxu1 %vm255_vm1, %v8320_v35  ;;  %v1730_v40 = vadd.f32 %v9905_v13, %v9904_v59  ;;  %v8367_v59 = vld [vmem:[#allocation3 + $0x69] sm:$0xff] }
 0x335   : > { %v2563_v6 = vadd.f32 %v2511_v2, %v2285_v58  ;;  %v8347_v2 = vld [vmem:[#allocation3 + $0x61] sm:$0xff]  ;;  %v2008_v56 = vadd.f32 %v8047_v44, %v1730_v40 }
 0x336   : > { %v2789_v63 = vpop.f32.mrf.mxu0 }
 0x337   : > { %v2841_v39 = vadd.f32 %v2789_v63, %v2563_v6  ;;  %6122 = vmatmul.msk.f32.gmra.mxu2 %vm255_vm1, %v8327_v24 }
 0x338   : > { %6156 = vmatmul.msk.f32.gmra.mxu3 %vm255_vm1, %v8329_v49  ;;  %v8335_v19 = vpop.f32.mrf.mxu1  ;;  %v8487_v49 = vld [vmem:[#allocation3 + $0xb1] sm:$0xff] }
 0x339   : > { %6189 = vmatmul.msk.f32.gmra.mxu0 %vm255_vm1, %v8080_v11  ;;  %v2873_v52 = vmax.f32 %v2841_v39, 0.0  ;;  %v8349_v11 = vld [vmem:[#allocation3 + $0x62] sm:$0xff] }
 0x33a   : > { %v2236_v47 = vpop.f32.mrf.mxu2  ;;  %v8340_v34 = vld [vmem:[#allocation3 + $0x110] sm:$0xff]  ;;  %9906 = vst [vmem:[#allocation71_spill] sm:$0xff] %v8349_v11 }
 0x33b   : > { %v2514_v48 = vpop.f32.mrf.mxu3  ;;  %2960 = vst.msk [vmem:[#allocation3 + $0x121] sm:$0xff] %vm255_vm1, %v2873_v52  ;;  %v2286_v28 = vadd.f32 %v2236_v47, %v2007_v60  ;;  %6104 = vmatmul.msk.f32.gmra.mxu1 %vm255_vm1, %v8340_v34  ;;  %v9907_v60 = vld [vmem:[#allocation58_spill] sm:$0xff]  ;;  %v9908_v52 = vld [vmem:[#allocation55_spill] sm:$0xff] }
 0x33c   : > { %v1731_v47 = vadd.f32 %v9908_v52, %v9907_v60 }
 0x33d   : > { %v2564_v1 = vadd.f32 %v2514_v48, %v2286_v28 }
 0x33e   : > { %v2792_v20 = vpop.f32.mrf.mxu0  ;;  %v2009_v40 = vadd.f32 %v8059_v33, %v1731_v47 }
 0x33f   : > { %v2842_v43 = vadd.f32 %v2792_v20, %v2564_v1  ;;  %6123 = vmatmul.msk.f32.gmra.mxu2 %vm255_vm1, %v8347_v2 }
 0x340   : > { %6157 = vmatmul.msk.f32.gmra.mxu3 %vm255_vm1, %v8349_v11  ;;  %v8355_v58 = vpop.f32.mrf.mxu1  ;;  %v8447_v11 = vld [vmem:[#allocation3 + $0x99] sm:$0xff] }
 0x341   : > { %6190 = vmatmul.msk.f32.gmra.mxu0 %vm255_vm1, %v8092_v57  ;;  %v2874_v25 = vmax.f32 %v2842_v43, 0.0  ;;  %v8369_v57 = vld [vmem:[#allocation3 + $0x6a] sm:$0xff] }
 0x342   : > { %v2239_v8 = vpop.f32.mrf.mxu2  ;;  %v8360_v63 = vld [vmem:[#allocation3 + $0x120] sm:$0xff]  ;;  %9909 = vst [vmem:[#allocation73_spill] sm:$0xff] %v8369_v57 }
 0x343   : > { %v2517_v6 = vpop.f32.mrf.mxu3  ;;  %2961 = vst.msk [vmem:[#allocation3 + $0x129] sm:$0xff] %vm255_vm1, %v2874_v25  ;;  %v2287_v39 = vadd.f32 %v2239_v8, %v2008_v56  ;;  %6105 = vmatmul.msk.f32.gmra.mxu1 %vm255_vm1, %v8360_v63  ;;  %v9910_v8 = vld [vmem:[#allocation57_spill] sm:$0xff] }
 0x345   : > { %v2565_v48 = vadd.f32 %v2517_v6, %v2287_v39  ;;  %v9911_v6 = vld [vmem:[#allocation62_spill] sm:$0xff] }
 0x346   : > { %v2795_v28 = vpop.f32.mrf.mxu0  ;;  %v1732_v39 = vadd.f32 %v9911_v6, %v9910_v8  ;;  %v9914_v8 = vld [vmem:[#allocation64_spill] sm:$0xff] }
 0x347   : > { %v2843_v44 = vadd.f32 %v2795_v28, %v2565_v48  ;;  %6124 = vmatmul.msk.f32.gmra.mxu2 %vm255_vm1, %v8367_v59  ;;  %v8387_v48 = vld [vmem:[#allocation3 + $0x79] sm:$0xff] }
 0x348   : > { %6158 = vmatmul.msk.f32.gmra.mxu3 %vm255_vm1, %v8369_v57  ;;  %v8375_v13 = vpop.f32.mrf.mxu1  ;;  %v2010_v28 = vadd.f32 %v8078_v9, %v1732_v39  ;;  %v8427_v57 = vld [vmem:[#allocation3 + $0x91] sm:$0xff] }
 0x349   : > { %6191 = vmatmul.msk.f32.gmra.mxu0 %vm255_vm1, %v8106_v46  ;;  %v2875_v1 = vmax.f32 %v2843_v44, 0.0  ;;  %v8389_v46 = vld [vmem:[#allocation3 + $0x7a] sm:$0xff] }
 0x34a   : > { %v2242_v20 = vpop.f32.mrf.mxu2  ;;  %v8380_v56 = vld [vmem:[#allocation3 + $0x128] sm:$0xff]  ;;  %9912 = vst [vmem:[#allocation53_spill] sm:$0xff] %v8389_v46 }
 0x34b   : > { %v2520_v43 = vpop.f32.mrf.mxu3  ;;  %2962 = vst.msk [vmem:[#allocation3 + $0x139] sm:$0xff] %vm255_vm1, %v2875_v1  ;;  %v2288_v25 = vadd.f32 %v2242_v20, %v2009_v40  ;;  %6106 = vmatmul.msk.f32.gmra.mxu1 %vm255_vm1, %v8380_v56 }
 0x34d   : > { %v2566_v60 = vadd.f32 %v2520_v43, %v2288_v25  ;;  %v9913_v25 = vld [vmem:[#allocation59_spill] sm:$0xff] }
 0x34e   : > { %v2798_v52 = vpop.f32.mrf.mxu0  ;;  %v1733_v6 = vadd.f32 %v9914_v8, %v9913_v25  ;;  %v9916_v25 = vld [vmem:[#allocation61_spill] sm:$0xff]  ;;  %v9917_v8 = vld [vmem:[#allocation66_spill] sm:$0xff] }
 0x34f   : > { %v2844_v33 = vadd.f32 %v2798_v52, %v2566_v60  ;;  %6125 = vmatmul.msk.f32.gmra.mxu2 %vm255_vm1, %v8387_v48 }
 0x350   : > { %6159 = vmatmul.msk.f32.gmra.mxu3 %vm255_vm1, %v8389_v46  ;;  %v8395_v47 = vpop.f32.mrf.mxu1  ;;  %v8407_v46 = vld [vmem:[#allocation3 + $0x81] sm:$0xff] }
 0x351   : > { %6192 = vmatmul.msk.f32.gmra.mxu0 %vm255_vm1, %v8120_v27  ;;  %v2876_v44 = vmax.f32 %v2844_v33, 0.0  ;;  %v8409_v27 = vld [vmem:[#allocation3 + $0x82] sm:$0xff]  ;;  %v2011_v33 = vadd.f32 %v8094_v3, %v1733_v6 }
 0x352   : > { %v2245_v40 = vpop.f32.mrf.mxu2  ;;  %v8400_v20 = vld [vmem:[#allocation3 + $0x138] sm:$0xff]  ;;  %9915 = vst [vmem:[#allocation37_spill] sm:$0xff] %v8409_v27 }
 0x353   : > { %v2523_v1 = vpop.f32.mrf.mxu3  ;;  %2963 = vst.msk [vmem:[#allocation3 + $0x141] sm:$0xff] %vm255_vm1, %v2876_v44  ;;  %v2289_v43 = vadd.f32 %v2245_v40, %v2010_v28  ;;  %6107 = vmatmul.msk.f32.gmra.mxu1 %vm255_vm1, %v8400_v20 }
 0x355   : > { %v2567_v60 = vadd.f32 %v2523_v1, %v2289_v43 }
 0x356   : > { %v2801_v52 = vpop.f32.mrf.mxu0 }
 0x357   : > { %v2845_v9 = vadd.f32 %v2801_v52, %v2567_v60  ;;  %6126 = vmatmul.msk.f32.gmra.mxu2 %vm255_vm1, %v8407_v46  ;;  %v1734_v60 = vadd.f32 %v9917_v8, %v9916_v25  ;;  %v9920_v25 = vld [vmem:[#allocation65_spill] sm:$0xff] }
 0x358   : > { %6160 = vmatmul.msk.f32.gmra.mxu3 %vm255_vm1, %v8409_v27  ;;  %v8415_v39 = vpop.f32.mrf.mxu1 }
 0x359   : > { %6193 = vmatmul.msk.f32.gmra.mxu0 %vm255_vm1, %v8144_v42  ;;  %v2877_v28 = vmax.f32 %v2845_v9, 0.0  ;;  %v8429_v42 = vld [vmem:[#allocation3 + $0x92] sm:$0xff]  ;;  %v2012_v9 = vadd.f32 %v8113_v61, %v1734_v60 }
 0x35a   : > { %v2248_v44 = vpop.f32.mrf.mxu2  ;;  %v8420_v1 = vld [vmem:[#allocation3 + $0x140] sm:$0xff]  ;;  %9918 = vst [vmem:[#allocation39_spill] sm:$0xff] %v8429_v42 }
 0x35b   : > { %v2526_v40 = vpop.f32.mrf.mxu3  ;;  %2964 = vst.msk [vmem:[#allocation3 + $0x151] sm:$0xff] %vm255_vm1, %v2877_v28  ;;  %v2290_v43 = vadd.f32 %v2248_v44, %v2011_v33  ;;  %6108 = vmatmul.msk.f32.gmra.mxu1 %vm255_vm1, %v8420_v1 }
 0x35d   : > { %v2568_v52 = vadd.f32 %v2526_v40, %v2290_v43  ;;  %v9919_v43 = vld [vmem:[#allocation68_spill] sm:$0xff] }
 0x35e   : > { %v2804_v27 = vpop.f32.mrf.mxu0  ;;  %v1735_v8 = vadd.f32 %v9920_v25, %v9919_v43 }
 0x35f   : > { %v2846_v3 = vadd.f32 %v2804_v27, %v2568_v52  ;;  %6127 = vmatmul.msk.f32.gmra.mxu2 %vm255_vm1, %v8427_v57 }
 0x360   : > { %6161 = vmatmul.msk.f32.gmra.mxu3 %vm255_vm1, %v8429_v42  ;;  %v8435_v6 = vpop.f32.mrf.mxu1 }
 0x361   : > { %6194 = vmatmul.msk.f32.gmra.mxu0 %vm255_vm1, %v8164_v23  ;;  %v2878_v33 = vmax.f32 %v2846_v3, 0.0  ;;  %v8449_v23 = vld [vmem:[#allocation3 + $0x9a] sm:$0xff]  ;;  %v2013_v3 = vadd.f32 %v8135_v18, %v1735_v8 }
 0x362   : > { %v2251_v28 = vpop.f32.mrf.mxu2  ;;  %v8440_v40 = vld [vmem:[#allocation3 + $0x150] sm:$0xff]  ;;  %9921 = vst [vmem:[#allocation60_spill] sm:$0xff] %v8449_v23 }
 0x363   : > { %v2529_v44 = vpop.f32.mrf.mxu3  ;;  %2965 = vst.msk [vmem:[#allocation3 + $0x159] sm:$0xff] %vm255_vm1, %v2878_v33  ;;  %v2291_v27 = vadd.f32 %v2251_v28, %v2012_v9  ;;  %6109 = vmatmul.msk.f32.gmra.mxu1 %vm255_vm1, %v8440_v40 }
 0x365   : > { %v2569_v52 = vadd.f32 %v2529_v44, %v2291_v27  ;;  %v9922_v27 = vld [vmem:[#allocation70_spill] sm:$0xff] }
 0x366   : > { %v2807_v42 = vpop.f32.mrf.mxu0  ;;  %v1736_v43 = vadd.f32 %v9922_v27, %v7973_v50  ;;  %v9925_v27 = vld [vmem:[#allocation72_spill] sm:$0xff] }
 0x367   : > { %v2847_v61 = vadd.f32 %v2807_v42, %v2569_v52  ;;  %6128 = vmatmul.msk.f32.gmra.mxu2 %vm255_vm1, %v8447_v11 }
 0x368   : > { %6162 = vmatmul.msk.f32.gmra.mxu3 %vm255_vm1, %v8449_v23  ;;  %v8455_v60 = vpop.f32.mrf.mxu1  ;;  %v8467_v23 = vld [vmem:[#allocation3 + $0xa9] sm:$0xff]  ;;  %v2014_v50 = vadd.f32 %v8161_v22, %v1736_v43 }
 0x369   : > { %6195 = vmatmul.msk.f32.gmra.mxu0 %vm255_vm1, %v8176_v12  ;;  %v2879_v9 = vmax.f32 %v2847_v61, 0.0  ;;  %v8469_v12 = vld [vmem:[#allocation3 + $0xaa] sm:$0xff] }
 0x36a   : > { %v2254_v33 = vpop.f32.mrf.mxu2  ;;  %v8460_v44 = vld [vmem:[#allocation3 + $0x158] sm:$0xff]  ;;  %9923 = vst [vmem:[#allocation38_spill] sm:$0xff] %v8469_v12 }
 0x36b   : > { %v2532_v28 = vpop.f32.mrf.mxu3  ;;  %2966 = vst.msk [vmem:[#allocation3 + $0x169] sm:$0xff] %vm255_vm1, %v2879_v9  ;;  %v2292_v42 = vadd.f32 %v2254_v33, %v2013_v3  ;;  %6110 = vmatmul.msk.f32.gmra.mxu1 %vm255_vm1, %v8460_v44 }
 0x36d   : > { %v2570_v25 = vadd.f32 %v2532_v28, %v2292_v42  ;;  %v9924_v42 = vld [vmem:[#allocation67_spill] sm:$0xff] }
 0x36e   : > { %v2810_v52 = vpop.f32.mrf.mxu0 }
 0x36f   : > { %v2848_v18 = vadd.f32 %v2810_v52, %v2570_v25  ;;  %6129 = vmatmul.msk.f32.gmra.mxu2 %vm255_vm1, %v8467_v23  ;;  %v1737_v25 = vadd.f32 %v9925_v27, %v9924_v42  ;;  %v8510_v27 = vld [vmem:[#allocation3 + $0xc1] sm:$0xff] }
 0x370   : > { %6163 = vmatmul.msk.f32.gmra.mxu3 %vm255_vm1, %v8469_v12  ;;  %v8475_v8 = vpop.f32.mrf.mxu1 }
 0x371   : > { %6196 = vmatmul.msk.f32.gmra.mxu0 %vm255_vm1, %v8189_v14  ;;  %v2880_v61 = vmax.f32 %v2848_v18, 0.0  ;;  %v8489_v14 = vld [vmem:[#allocation3 + $0xb2] sm:$0xff]  ;;  %v2015_v18 = vadd.f32 %v8181_v41, %v1737_v25  ;;  %v8512_v41 = vld [vmem:[#allocation3 + $0xc2] sm:$0xff] }
 0x372   : > { %v2257_v3 = vpop.f32.mrf.mxu2  ;;  %v8480_v33 = vld [vmem:[#allocation3 + $0x168] sm:$0xff]  ;;  %9926 = vst [vmem:[#allocation41_spill] sm:$0xff] %v8512_v41 }
 0x373   : > { %v2535_v9 = vpop.f32.mrf.mxu3  ;;  %2967 = vst.msk [vmem:[#allocation3 + $0x171] sm:$0xff] %vm255_vm1, %v2880_v61  ;;  %v2293_v28 = vadd.f32 %v2257_v3, %v2014_v50  ;;  %6111 = vmatmul.msk.f32.gmra.mxu1 %vm255_vm1, %v8480_v33 }
 0x375   : > { %v2571_v52 = vadd.f32 %v2535_v9, %v2293_v28  ;;  %v8508_v28 = vld [vmem:[%s9654_s4] ss:$0 sm:$0xff] }
 0x376   : > { %v2813_v12 = vpop.f32.mrf.mxu0 }
 0x377   : > { %v2849_v22 = vadd.f32 %v2813_v12, %v2571_v52  ;;  %6130 = vmatmul.msk.f32.gmra.mxu2 %vm255_vm1, %v8487_v49 }
 0x378   : > { %6164 = vmatmul.msk.f32.gmra.mxu3 %vm255_vm1, %v8489_v14  ;;  %v8495_v43 = vpop.f32.mrf.mxu1 }
 0x379   : > { %6197 = vmatmul.msk.f32.gmra.mxu0 %vm255_vm1, %v8202_v0  ;;  %v2881_v50 = vmax.f32 %v2849_v22, 0.0  ;;  %v3219_v22 = vadd.f32 %v8508_v28, %v8194_v30 }
 0x37a   : > { %v2260_v61 = vpop.f32.mrf.mxu2  ;;  %v8500_v9 = vld [vmem:[#allocation3 + $0x170] sm:$0xff] }
 0x37b   : > { %v2538_v3 = vpop.f32.mrf.mxu3  ;;  %2968 = vst.msk [vmem:[#allocation3 + $0x181] sm:$0xff] %vm255_vm1, %v2881_v50  ;;  %v2294_v12 = vadd.f32 %v2260_v61, %v2015_v18  ;;  %6112 = vmatmul.msk.f32.gmra.mxu1 %vm255_vm1, %v8500_v9 }
 0x37d   : > { %v2572_v42 = vadd.f32 %v2538_v3, %v2294_v12 }
 0x37e   : > { %v2816_v0 = vpop.f32.mrf.mxu0 }
 0x37f   : > { %v2850_v25 = vadd.f32 %v2816_v0, %v2572_v42  ;;  %6131 = vmatmul.msk.f32.gmra.mxu2 %vm255_vm1, %v8510_v27  ;;  %v8531_v0 = vld [vmem:[#allocation3 + $0xc9] sm:$0xff] }
 0x380   : > { %6165 = vmatmul.msk.f32.gmra.mxu3 %vm255_vm1, %v8512_v41  ;;  %v8518_v52 = vpop.f32.mrf.mxu1  ;;  %v8533_v41 = vld [vmem:[#allocation3 + $0xca] sm:$0xff] }
 0x381   : > { %6198 = vmatmul.msk.f32.gmra.mxu0 %vm255_vm1, %v8216_v10  ;;  %v2882_v18 = vmax.f32 %v2850_v25, 0.0  ;;  %v3220_v10 = vadd.f32 %v8508_v28, %v8209_v53 }
 0x382   : > { %v3401_v50 = vpop.f32.mrf.mxu2 }
 0x383   : > { %v3679_v61 = vpop.f32.mrf.mxu3  ;;  %2969 = vst.msk [vmem:[#allocation3 + $0x189] sm:$0xff] %vm255_vm1, %v2882_v18  ;;  %v3497_v3 = vadd.f32 %v3401_v50, %v3219_v22  ;;  %6217 = vmatmul.msk.f32.vlgmr.msrb.gmra.mxu1 %vm255_vm1, %v8223_v45 }
 0x385   : > { %v8527_v12 = vadd.f32 %v3679_v61, %v3497_v3  ;;  %v8551_v61 = vld [vmem:[#allocation3 + $0xd9] sm:$0xff] }
 0x386   : > { %v8529_v42 = vpop.f32.mrf.mxu0  ;;  %v8553_v3 = vld [vmem:[#allocation3 + $0xda] sm:$0xff] }
 0x387   : > { %6132 = vmatmul.msk.f32.gmra.mxu2 %vm255_vm1, %v8531_v0  ;;  %9929 = vst [vmem:[#allocation63_spill] sm:$0xff] %v8553_v3 }
 0x388   : > { %6166 = vmatmul.msk.f32.gmra.mxu3 %vm255_vm1, %v8533_v41  ;;  %v8539_v30 = vpop.f32.mrf.mxu1 }
 0x389   : > { %6199 = vmatmul.msk.f32.gmra.mxu0 %vm255_vm1, %v8236_v37  ;;  %v3221_v37 = vadd.f32 %v8508_v28, %v8231_v7 }
 0x38a   : > { %v3404_v45 = vpop.f32.mrf.mxu2 }
 0x38b   : > { %v3682_v25 = vpop.f32.mrf.mxu3  ;;  %v3498_v22 = vadd.f32 %v3404_v45, %v3220_v10  ;;  %6218 = vmatmul.msk.f32.gmra.mxu1 %vm255_vm1, %v8243_v26 }
 0x38d   : > { %v8547_v18 = vadd.f32 %v3682_v25, %v3498_v22 }
 0x38e   : > { %v8549_v50 = vpop.f32.mrf.mxu0 }
 0x38f   : > { %9927 = vst [vmem:[#allocation40_spill] sm:$0xff] %v8547_v18  ;;  %6133 = vmatmul.msk.f32.gmra.mxu2 %vm255_vm1, %v8551_v61  ;;  %v8573_v18 = vld [vmem:[#allocation3 + $0xe2] sm:$0xff] }
 0x390   : > { %9928 = vst [vmem:[#allocation43_spill] sm:$0xff] %v8549_v50  ;;  %6167 = vmatmul.msk.f32.gmra.mxu3 %vm255_vm1, %v8553_v3  ;;  %v8559_v53 = vpop.f32.mrf.mxu1  ;;  %v8571_v50 = vld [vmem:[#allocation3 + $0xe1] sm:$0xff]  ;;  %v8779_v3 = vld [vmem:[#allocation3 + $0x159] sm:$0xff] }
 0x391   : > { %6200 = vmatmul.msk.f32.gmra.mxu0 %vm255_vm1, %v8256_v29  ;;  %9932 = vst [vmem:[#allocation74_spill] sm:$0xff] %v8573_v18  ;;  %v3222_v29 = vadd.f32 %v8508_v28, %v8251_v16 }
 0x392   : > { %v3407_v26 = vpop.f32.mrf.mxu2 }
 0x393   : > { %v3685_v10 = vpop.f32.mrf.mxu3  ;;  %v3499_v45 = vadd.f32 %v3407_v26, %v3221_v37  ;;  %6219 = vmatmul.msk.f32.gmra.mxu1 %vm255_vm1, %v8263_v54 }
 0x395   : > { %v8567_v25 = vadd.f32 %v3685_v10, %v3499_v45 }
 0x396   : > { %v8569_v22 = vpop.f32.mrf.mxu0 }
 0x397   : > { %9930 = vst [vmem:[#allocation42_spill] sm:$0xff] %v8567_v25  ;;  %6134 = vmatmul.msk.f32.gmra.mxu2 %vm255_vm1, %v8571_v50  ;;  %v8591_v25 = vld [vmem:[#allocation3 + $0xf1] sm:$0xff] }
 0x398   : > { %9931 = vst [vmem:[#allocation44_spill] sm:$0xff] %v8569_v22  ;;  %6168 = vmatmul.msk.f32.gmra.mxu3 %vm255_vm1, %v8573_v18  ;;  %v8579_v7 = vpop.f32.mrf.mxu1  ;;  %v8593_v18 = vld [vmem:[#allocation3 + $0xf2] sm:$0xff] }
 0x399   : > { %6201 = vmatmul.msk.f32.gmra.mxu0 %vm255_vm1, %v8276_v55  ;;  %9935 = vst [vmem:[#allocation48_spill] sm:$0xff] %v8593_v18  ;;  %v3223_v55 = vadd.f32 %v8508_v28, %v8271_v17 }
 0x39a   : > { %v3410_v37 = vpop.f32.mrf.mxu2 }
 0x39b   : > { %v3688_v26 = vpop.f32.mrf.mxu3  ;;  %v3500_v10 = vadd.f32 %v3410_v37, %v3222_v29  ;;  %6220 = vmatmul.msk.f32.gmra.mxu1 %vm255_vm1, %v8286_v21 }
 0x39d   : > { %v8587_v45 = vadd.f32 %v3688_v26, %v3500_v10 }
 0x39e   : > { %v8589_v22 = vpop.f32.mrf.mxu0 }
 0x39f   : > { %9933 = vst [vmem:[#allocation75_spill] sm:$0xff] %v8587_v45  ;;  %6135 = vmatmul.msk.f32.gmra.mxu2 %vm255_vm1, %v8591_v25  ;;  %v8611_v45 = vld [vmem:[#allocation3 + $0xf9] sm:$0xff] }
 0x3a0   : > { %9934 = vst [vmem:[#allocation45_spill] sm:$0xff] %v8589_v22  ;;  %6169 = vmatmul.msk.f32.gmra.mxu3 %vm255_vm1, %v8593_v18  ;;  %v8599_v16 = vpop.f32.mrf.mxu1  ;;  %v8613_v18 = vld [vmem:[#allocation3 + $0xfa] sm:$0xff] }
 0x3a1   : > { %6202 = vmatmul.msk.f32.gmra.mxu0 %vm255_vm1, %v8300_v4  ;;  %9938 = vst [vmem:[#allocation47_spill] sm:$0xff] %v8613_v18  ;;  %v3224_v4 = vadd.f32 %v8508_v28, %v8295_v62 }
 0x3a2   : > { %v3413_v29 = vpop.f32.mrf.mxu2 }
 0x3a3   : > { %v3691_v37 = vpop.f32.mrf.mxu3  ;;  %v3501_v26 = vadd.f32 %v3413_v29, %v3223_v55  ;;  %6221 = vmatmul.msk.f32.gmra.mxu1 %vm255_vm1, %v8307_v51 }
 0x3a5   : > { %v8607_v10 = vadd.f32 %v3691_v37, %v3501_v26 }
 0x3a6   : > { %v8609_v22 = vpop.f32.mrf.mxu0 }
 0x3a7   : > { %9936 = vst [vmem:[#allocation46_spill] sm:$0xff] %v8607_v10  ;;  %6136 = vmatmul.msk.f32.gmra.mxu2 %vm255_vm1, %v8611_v45  ;;  %v8631_v10 = vld [vmem:[#allocation3 + $0x109] sm:$0xff] }
 0x3a8   : > { %9937 = vst [vmem:[#allocation50_spill] sm:$0xff] %v8609_v22  ;;  %6170 = vmatmul.msk.f32.gmra.mxu3 %vm255_vm1, %v8613_v18  ;;  %v8619_v17 = vpop.f32.mrf.mxu1  ;;  %v8633_v18 = vld [vmem:[#allocation3 + $0x10a] sm:$0xff] }
 0x3a9   : > { %6203 = vmatmul.msk.f32.gmra.mxu0 %vm255_vm1, %v8320_v35  ;;  %9941 = vst [vmem:[#allocation54_spill] sm:$0xff] %v8633_v18  ;;  %v3225_v35 = vadd.f32 %v8508_v28, %v8315_v36 }
 0x3aa   : > { %v3416_v55 = vpop.f32.mrf.mxu2 }
 0x3ab   : > { %v3694_v29 = vpop.f32.mrf.mxu3  ;;  %v3502_v37 = vadd.f32 %v3416_v55, %v3224_v4  ;;  %6222 = vmatmul.msk.f32.gmra.mxu1 %vm255_vm1, %v8327_v24 }
 0x3ad   : > { %v8627_v26 = vadd.f32 %v3694_v29, %v3502_v37 }
 0x3ae   : > { %v8629_v22 = vpop.f32.mrf.mxu0 }
 0x3af   : > { %9939 = vst [vmem:[#allocation52_spill] sm:$0xff] %v8627_v26  ;;  %6137 = vmatmul.msk.f32.gmra.mxu2 %vm255_vm1, %v8631_v10  ;;  %v8651_v26 = vld [vmem:[#allocation3 + $0x111] sm:$0xff] }
 0x3b0   : > { %9940 = vst [vmem:[#allocation49_spill] sm:$0xff] %v8629_v22  ;;  %6171 = vmatmul.msk.f32.gmra.mxu3 %vm255_vm1, %v8633_v18  ;;  %v8639_v62 = vpop.f32.mrf.mxu1  ;;  %v8653_v18 = vld [vmem:[#allocation3 + $0x112] sm:$0xff] }
 0x3b1   : > { %6204 = vmatmul.msk.f32.gmra.mxu0 %vm255_vm1, %v8340_v34  ;;  %9944 = vst [vmem:[#allocation58_spill] sm:$0xff] %v8653_v18  ;;  %v3226_v34 = vadd.f32 %v8508_v28, %v8335_v19 }
 0x3b2   : > { %v3419_v4 = vpop.f32.mrf.mxu2 }
 0x3b3   : > { %v3697_v55 = vpop.f32.mrf.mxu3  ;;  %v3503_v29 = vadd.f32 %v3419_v4, %v3225_v35  ;;  %6223 = vmatmul.msk.f32.gmra.mxu1 %vm255_vm1, %v8347_v2 }
 0x3b5   : > { %v8647_v37 = vadd.f32 %v3697_v55, %v3503_v29 }
 0x3b6   : > { %v8649_v22 = vpop.f32.mrf.mxu0 }
 0x3b7   : > { %9942 = vst [vmem:[#allocation51_spill] sm:$0xff] %v8647_v37  ;;  %6138 = vmatmul.msk.f32.gmra.mxu2 %vm255_vm1, %v8651_v26  ;;  %v8671_v37 = vld [vmem:[#allocation3 + $0x121] sm:$0xff] }
 0x3b8   : > { %9943 = vst [vmem:[#allocation56_spill] sm:$0xff] %v8649_v22  ;;  %6172 = vmatmul.msk.f32.gmra.mxu3 %vm255_vm1, %v8653_v18  ;;  %v8659_v36 = vpop.f32.mrf.mxu1  ;;  %v8673_v18 = vld [vmem:[#allocation3 + $0x122] sm:$0xff] }
 0x3b9   : > { %6205 = vmatmul.msk.f32.gmra.mxu0 %vm255_vm1, %v8360_v63  ;;  %9947 = vst [vmem:[#allocation62_spill] sm:$0xff] %v8673_v18  ;;  %v3227_v63 = vadd.f32 %v8508_v28, %v8355_v58 }
 0x3ba   : > { %v3422_v35 = vpop.f32.mrf.mxu2 }
 0x3bb   : > { %v3700_v4 = vpop.f32.mrf.mxu3  ;;  %v3504_v55 = vadd.f32 %v3422_v35, %v3226_v34  ;;  %6224 = vmatmul.msk.f32.gmra.mxu1 %vm255_vm1, %v8367_v59 }
 0x3bd   : > { %v8667_v29 = vadd.f32 %v3700_v4, %v3504_v55 }
 0x3be   : > { %v8669_v22 = vpop.f32.mrf.mxu0 }
 0x3bf   : > { %9945 = vst [vmem:[#allocation55_spill] sm:$0xff] %v8667_v29  ;;  %6139 = vmatmul.msk.f32.gmra.mxu2 %vm255_vm1, %v8671_v37  ;;  %v8691_v29 = vld [vmem:[#allocation3 + $0x129] sm:$0xff] }
 0x3c0   : > { %9946 = vst [vmem:[#allocation57_spill] sm:$0xff] %v8669_v22  ;;  %6173 = vmatmul.msk.f32.gmra.mxu3 %vm255_vm1, %v8673_v18  ;;  %v8679_v19 = vpop.f32.mrf.mxu1  ;;  %v8693_v18 = vld [vmem:[#allocation3 + $0x12a] sm:$0xff] }
 0x3c1   : > { %6206 = vmatmul.msk.f32.gmra.mxu0 %vm255_vm1, %v8380_v56  ;;  %9950 = vst [vmem:[#allocation61_spill] sm:$0xff] %v8693_v18  ;;  %v3228_v56 = vadd.f32 %v8508_v28, %v8375_v13 }
 0x3c2   : > { %v3425_v34 = vpop.f32.mrf.mxu2 }
 0x3c3   : > { %v3703_v35 = vpop.f32.mrf.mxu3  ;;  %v3505_v4 = vadd.f32 %v3425_v34, %v3227_v63  ;;  %6225 = vmatmul.msk.f32.gmra.mxu1 %vm255_vm1, %v8387_v48 }
 0x3c5   : > { %v8687_v55 = vadd.f32 %v3703_v35, %v3505_v4 }
 0x3c6   : > { %v8689_v22 = vpop.f32.mrf.mxu0 }
 0x3c7   : > { %9948 = vst [vmem:[#allocation59_spill] sm:$0xff] %v8687_v55  ;;  %6140 = vmatmul.msk.f32.gmra.mxu2 %vm255_vm1, %v8691_v29  ;;  %v8711_v55 = vld [vmem:[#allocation3 + $0x139] sm:$0xff] }
 0x3c8   : > { %9949 = vst [vmem:[#allocation64_spill] sm:$0xff] %v8689_v22  ;;  %6174 = vmatmul.msk.f32.gmra.mxu3 %vm255_vm1, %v8693_v18  ;;  %v8699_v58 = vpop.f32.mrf.mxu1  ;;  %v8713_v18 = vld [vmem:[#allocation3 + $0x13a] sm:$0xff] }
 0x3c9   : > { %6207 = vmatmul.msk.f32.gmra.mxu0 %vm255_vm1, %v8400_v20  ;;  %9953 = vst [vmem:[#allocation65_spill] sm:$0xff] %v8713_v18  ;;  %v3229_v20 = vadd.f32 %v8508_v28, %v8395_v47 }
 0x3ca   : > { %v3428_v63 = vpop.f32.mrf.mxu2 }
 0x3cb   : > { %v3706_v34 = vpop.f32.mrf.mxu3  ;;  %v3506_v35 = vadd.f32 %v3428_v63, %v3228_v56  ;;  %6226 = vmatmul.msk.f32.gmra.mxu1 %vm255_vm1, %v8407_v46 }
 0x3cd   : > { %v8707_v4 = vadd.f32 %v3706_v34, %v3506_v35 }
 0x3ce   : > { %v8709_v22 = vpop.f32.mrf.mxu0 }
 0x3cf   : > { %9951 = vst [vmem:[#allocation66_spill] sm:$0xff] %v8707_v4  ;;  %6141 = vmatmul.msk.f32.gmra.mxu2 %vm255_vm1, %v8711_v55  ;;  %v8731_v4 = vld [vmem:[#allocation3 + $0x141] sm:$0xff] }
 0x3d0   : > { %9952 = vst [vmem:[#allocation68_spill] sm:$0xff] %v8709_v22  ;;  %6175 = vmatmul.msk.f32.gmra.mxu3 %vm255_vm1, %v8713_v18  ;;  %v8719_v13 = vpop.f32.mrf.mxu1  ;;  %v8733_v18 = vld [vmem:[#allocation3 + $0x142] sm:$0xff] }
 0x3d1   : > { %6208 = vmatmul.msk.f32.gmra.mxu0 %vm255_vm1, %v8420_v1  ;;  %9956 = vst [vmem:[#allocation72_spill] sm:$0xff] %v8733_v18  ;;  %v3230_v1 = vadd.f32 %v8508_v28, %v8415_v39  ;;  %v6283_v39 = vld [vmem:[%s9653_s3 + $0x18] sm:$0xf] }
 0x3d2   : > { %v3431_v56 = vpop.f32.mrf.mxu2  ;;  %6284 = vmatpush.msk.msra.mxu3 %vm477_vm0, %v6283_v39 }
 0x3d3   : > { %v3709_v63 = vpop.f32.mrf.mxu3  ;;  %v3507_v34 = vadd.f32 %v3431_v56, %v3229_v20  ;;  %6227 = vmatmul.msk.f32.gmra.mxu1 %vm255_vm1, %v8427_v57 }
 0x3d5   : > { %v8727_v35 = vadd.f32 %v3709_v63, %v3507_v34 }
 0x3d6   : > { %v8729_v22 = vpop.f32.mrf.mxu0 }
 0x3d7   : > { %9954 = vst [vmem:[#allocation70_spill] sm:$0xff] %v8727_v35  ;;  %6142 = vmatmul.msk.f32.gmra.mxu2 %vm255_vm1, %v8731_v4  ;;  %v8751_v35 = vld [vmem:[#allocation3 + $0x151] sm:$0xff] }
 0x3d8   : > { %9955 = vst [vmem:[#allocation67_spill] sm:$0xff] %v8729_v22  ;;  %6176 = vmatmul.msk.f32.gmra.mxu3 %vm255_vm1, %v8733_v18  ;;  %v8739_v47 = vpop.f32.mrf.mxu1  ;;  %v8753_v18 = vld [vmem:[#allocation3 + $0x152] sm:$0xff] }
 0x3d9   : > { %6209 = vmatmul.msk.f32.gmra.mxu0 %vm255_vm1, %v8440_v40  ;;  %9959 = vst [vmem:[#allocation80_spill] sm:$0xff] %v8753_v18  ;;  %v6249_v40 = vld [vmem:[%s9653_s3 + $0x14] sm:$0xf] }
 0x3da   : > { %v3434_v20 = vpop.f32.mrf.mxu2  ;;  %6250 = vmatpush.msk.msra.mxu2 %vm477_vm0, %v6249_v40  ;;  %v3232_v40 = vadd.f32 %v8508_v28, %v8455_v60 }
 0x3db   : > { %v3712_v56 = vpop.f32.mrf.mxu3  ;;  %v3508_v63 = vadd.f32 %v3434_v20, %v3230_v1  ;;  %6228 = vmatmul.msk.f32.gmra.mxu1 %vm255_vm1, %v8447_v11  ;;  %v3231_v20 = vadd.f32 %v8508_v28, %v8435_v6 }
 0x3dd   : > { %v8747_v34 = vadd.f32 %v3712_v56, %v3508_v63 }
 0x3de   : > { %v8749_v22 = vpop.f32.mrf.mxu0 }
 0x3df   : > { %9957 = vst [vmem:[#allocation78_spill] sm:$0xff] %v8747_v34  ;;  %6143 = vmatmul.msk.f32.gmra.mxu2 %vm255_vm1, %v8751_v35 }
 0x3e0   : > { %9958 = vst [vmem:[#allocation79_spill] sm:$0xff] %v8749_v22  ;;  %6177 = vmatmul.msk.f32.gmra.mxu3 %vm255_vm1, %v8753_v18  ;;  %v8765_v1 = vpop.f32.mrf.mxu1 }
 0x3e1   : > { %6210 = vmatmul.msk.f32.gmra.mxu0 %vm255_vm1, %v8460_v44  ;;  %v8781_v44 = vld [vmem:[#allocation3 + $0x15a] sm:$0xff] }
 0x3e2   : > { %v3437_v56 = vpop.f32.mrf.mxu2  ;;  %9962 = vst [vmem:[#allocation83_spill] sm:$0xff] %v8781_v44 }
 0x3e3   : > { %v3715_v63 = vpop.f32.mrf.mxu3  ;;  %v3509_v22 = vadd.f32 %v3437_v56, %v3231_v20  ;;  %6229 = vmatmul.msk.f32.gmra.mxu1 %vm255_vm1, %v8467_v23 }
 0x3e5   : > { %v8775_v34 = vadd.f32 %v3715_v63, %v3509_v22  ;;  %v6317_v22 = vld [vmem:[%s9653_s3 + $0x1c] sm:$0xf] }
 0x3e6   : > { %v8777_v18 = vpop.f32.mrf.mxu0  ;;  %6318 = vmatpush.msk.msra.mxu0 %vm477_vm0, %v6317_v22  ;;  %v3233_v22 = vadd.f32 %v8508_v28, %v8475_v8  ;;  %v8831_v8 = vld [vmem:[#allocation3 + $0x180] sm:$0xff] }
 0x3e7   : > { %9960 = vst [vmem:[#allocation81_spill] sm:$0xff] %v8775_v34  ;;  %6144 = vmatmul.msk.f32.gmra.mxu2 %vm255_vm1, %v8779_v3  ;;  %v8805_v34 = vld [vmem:[#allocation3 + $0x16a] sm:$0xff] }
 0x3e8   : > { %9961 = vst [vmem:[#allocation82_spill] sm:$0xff] %v8777_v18  ;;  %6178 = vmatmul.msk.f32.gmra.mxu3 %vm255_vm1, %v8781_v44  ;;  %v8787_v6 = vpop.f32.mrf.mxu1 }
 0x3e9   : > { %6211 = vmatmul.msk.f32.gmra.mxu0 %vm255_vm1, %v8480_v33  ;;  %v8803_v33 = vld [vmem:[#allocation3 + $0x169] sm:$0xff]  ;;  %9965 = vst [vmem:[#allocation86_spill] sm:$0xff] %v8805_v34 }
 0x3ea   : > { %v3440_v39 = vpop.f32.mrf.mxu2  ;;  %9969 = vst [vmem:[#allocation90_spill] sm:$0xff] %v8831_v8 }
 0x3eb   : > { %v3718_v20 = vpop.f32.mrf.mxu3  ;;  %v3510_v56 = vadd.f32 %v3440_v39, %v3232_v40  ;;  %6230 = vmatmul.msk.f32.gmra.mxu1 %vm255_vm1, %v8487_v49 }
 0x3ed   : > { %v8799_v63 = vadd.f32 %v3718_v20, %v3510_v56 }
 0x3ee   : > { %v8801_v18 = vpop.f32.mrf.mxu0 }
 0x3ef   : > { %9963 = vst [vmem:[#allocation84_spill] sm:$0xff] %v8799_v63  ;;  %6145 = vmatmul.msk.f32.gmra.mxu2 %vm255_vm1, %v8803_v33  ;;  %v8823_v63 = vld [vmem:[#allocation3 + $0x171] sm:$0xff] }
 0x3f0   : > { %9964 = vst [vmem:[#allocation85_spill] sm:$0xff] %v8801_v18  ;;  %6179 = vmatmul.msk.f32.gmra.mxu3 %vm255_vm1, %v8805_v34  ;;  %v8811_v60 = vpop.f32.mrf.mxu1  ;;  %v8825_v34 = vld [vmem:[#allocation3 + $0x172] sm:$0xff] }
 0x3f1   : > { %6212 = vmatmul.msk.f32.gmra.mxu0 %vm255_vm1, %v8500_v9  ;;  %9968 = vst [vmem:[#allocation89_spill] sm:$0xff] %v8825_v34 }
 0x3f2   : > { %v3443_v40 = vpop.f32.mrf.mxu2 }
 0x3f3   : > { %v3721_v39 = vpop.f32.mrf.mxu3  ;;  %v3511_v20 = vadd.f32 %v3443_v40, %v3233_v22  ;;  %6231 = vmatmul.msk.f32.gmra.mxu1 %vm255_vm1, %v8510_v27  ;;  %v3234_v22 = vadd.f32 %v8508_v28, %v8495_v43  ;;  %v3235_v43 = vadd.f32 %v8508_v28, %v8518_v52  ;;  %v3236_v52 = vadd.f32 %v8508_v28, %v8539_v30 }
 0x3f4   : > { %v3237_v30 = vadd.f32 %v8508_v28, %v8559_v53  ;;  %v3238_v53 = vadd.f32 %v8508_v28, %v8579_v7  ;;  %v3239_v7 = vadd.f32 %v8508_v28, %v8599_v16 }
 0x3f5   : > { %v8819_v56 = vadd.f32 %v3721_v39, %v3511_v20 }
 0x3f6   : > { %v8821_v18 = vpop.f32.mrf.mxu0 }
 0x3f7   : > { %9966 = vst [vmem:[#allocation87_spill] sm:$0xff] %v8819_v56  ;;  %6146 = vmatmul.msk.f32.gmra.mxu2 %vm255_vm1, %v8823_v63 }
 0x3f8   : > { %9967 = vst [vmem:[#allocation88_spill] sm:$0xff] %v8821_v18  ;;  %6180 = vmatmul.msk.f32.gmra.mxu3 %vm255_vm1, %v8825_v34  ;;  %v8833_v9 = vpop.f32.mrf.mxu1  ;;  %v4642_v34 = vld [vmem:[#allocation3 + $0x30] sm:$0xff] }
 0x3f9   : > { %6213 = vmatmul.msk.f32.gmra.mxu0 %vm255_vm1, %v8831_v8  ;;  %v8848_v8 = vld [vmem:[#allocation3 + $0x188] sm:$0xff] }
 0x3fa   : > { %v3446_v40 = vpop.f32.mrf.mxu2 }
 0x3fb   : > { %v3724_v39 = vpop.f32.mrf.mxu3  ;;  %v3512_v20 = vadd.f32 %v3446_v40, %v3234_v22  ;;  %6232 = vmatmul.msk.f32.gmra.mxu1 %vm255_vm1, %v8531_v0 }
 0x3fd   : > { %v8841_v18 = vadd.f32 %v3724_v39, %v3512_v20 }
 0x3fe   : > { %v8843_v56 = vpop.f32.mrf.mxu0 }
 0x3ff   : > { %9970 = vst [vmem:[#allocation91_spill] sm:$0xff] %v8841_v18  ;;  %6251 = vmatmul.msk.f32.vlgmr.msra.gmra.mxu2 %vm255_vm1, %v8225_v38 }
 0x400   : > { %9971 = vst [vmem:[#allocation92_spill] sm:$0xff] %v8843_v56  ;;  %6285 = vmatmul.msk.f32.vlgmr.msra.gmra.mxu3 %vm255_vm1, %v4642_v34  ;;  %v8850_v44 = vpop.f32.mrf.mxu1  ;;  %v4643_v34 = vld [vmem:[#allocation3 + $0x38] sm:$0xff] }
 0x401   : > { %6214 = vmatmul.msk.f32.gmra.mxu0 %vm255_vm1, %v8848_v8 }
 0x402   : > { %v3449_v22 = vpop.f32.mrf.mxu2 }
 0x403   : > { %v3727_v40 = vpop.f32.mrf.mxu3  ;;  %v3513_v39 = vadd.f32 %v3449_v22, %v3235_v43  ;;  %6233 = vmatmul.msk.f32.gmra.mxu1 %vm255_vm1, %v8551_v61 }
 0x405   : > { %v8858_v20 = vadd.f32 %v3727_v40, %v3513_v39 }
 0x406   : > { %v8860_v38 = vpop.f32.mrf.mxu0 }
 0x407   : > { %6252 = vmatmul.msk.f32.gmra.mxu2 %vm255_vm1, %v8245_v32  ;;  %v4644_v32 = vld [vmem:[#allocation3 + $0x48] sm:$0xff] }
 0x408   : > { %6286 = vmatmul.msk.f32.gmra.mxu3 %vm255_vm1, %v4643_v34  ;;  %v8865_v56 = vpop.f32.mrf.mxu1 }
 0x409   : > { %6319 = vmatmul.msk.f32.vlgmr.msra.gmra.mxu0 %vm255_vm1, %v8263_v54 }
 0x40a   : > { %v3452_v43 = vpop.f32.mrf.mxu2 }
 0x40b   : > { %v3730_v22 = vpop.f32.mrf.mxu3  ;;  %v3514_v40 = vadd.f32 %v3452_v43, %v3236_v52  ;;  %6234 = vmatmul.msk.f32.gmra.mxu1 %vm255_vm1, %v8571_v50 }
 0x40d   : > { %v8873_v39 = vadd.f32 %v3730_v22, %v3514_v40 }
 0x40e   : > { %v8875_v18 = vpop.f32.mrf.mxu0 }
 0x40f   : > { %6253 = vmatmul.msk.f32.gmra.mxu2 %vm255_vm1, %v8265_v31  ;;  %v4645_v31 = vld [vmem:[#allocation3 + $0x50] sm:$0xff] }
 0x410   : > { %6287 = vmatmul.msk.f32.gmra.mxu3 %vm255_vm1, %v4644_v32  ;;  %v8880_v54 = vpop.f32.mrf.mxu1 }
 0x411   : > { %6320 = vmatmul.msk.f32.gmra.mxu0 %vm255_vm1, %v8286_v21 }
 0x412   : > { %v3455_v34 = vpop.f32.mrf.mxu2 }
 0x413   : > { %v3733_v52 = vpop.f32.mrf.mxu3  ;;  %v3515_v43 = vadd.f32 %v3455_v34, %v3237_v30  ;;  %6235 = vmatmul.msk.f32.gmra.mxu1 %vm255_vm1, %v8591_v25 }
 0x415   : > { %v8888_v22 = vadd.f32 %v3733_v52, %v3515_v43 }
 0x416   : > { %v8890_v40 = vpop.f32.mrf.mxu0 }
 0x417   : > { %6254 = vmatmul.msk.f32.gmra.mxu2 %vm255_vm1, %v8288_v5  ;;  %v4646_v5 = vld [vmem:[#allocation3 + $0x60] sm:$0xff] }
 0x418   : > { %6288 = vmatmul.msk.f32.gmra.mxu3 %vm255_vm1, %v4645_v31  ;;  %v8895_v21 = vpop.f32.mrf.mxu1 }
 0x419   : > { %6321 = vmatmul.msk.f32.gmra.mxu0 %vm255_vm1, %v8307_v51 }
 0x41a   : > { %v3458_v32 = vpop.f32.mrf.mxu2 }
 0x41b   : > { %v3736_v30 = vpop.f32.mrf.mxu3  ;;  %v3516_v34 = vadd.f32 %v3458_v32, %v3238_v53  ;;  %6236 = vmatmul.msk.f32.gmra.mxu1 %vm255_vm1, %v8611_v45 }
 0x41d   : > { %v8903_v52 = vadd.f32 %v3736_v30, %v3516_v34 }
 0x41e   : > { %v8905_v43 = vpop.f32.mrf.mxu0 }
 0x41f   : > { %6255 = vmatmul.msk.f32.gmra.mxu2 %vm255_vm1, %v8309_v15  ;;  %v6351_v15 = vld [vmem:[%s9653_s3 + $0x20] sm:$0xf] }
 0x420   : > { %6289 = vmatmul.msk.f32.gmra.mxu3 %vm255_vm1, %v4646_v5  ;;  %v8910_v51 = vpop.f32.mrf.mxu1  ;;  %v4647_v5 = vld [vmem:[#allocation3 + $0x68] sm:$0xff]  ;;  %6352 = vmatpush.msk.msra.mxu1 %vm477_vm0, %v6351_v15 }
 0x421   : > { %6322 = vmatmul.msk.f32.gmra.mxu0 %vm255_vm1, %v8327_v24  ;;  %v9973_v24 = vld [vmem:[#allocation69_spill] sm:$0xff] }
 0x422   : > { %v3461_v31 = vpop.f32.mrf.mxu2 }
 0x423   : > { %v3739_v53 = vpop.f32.mrf.mxu3  ;;  %v3517_v32 = vadd.f32 %v3461_v31, %v3239_v7  ;;  %6237 = vmatmul.msk.f32.gmra.mxu1 %vm255_vm1, %v8631_v10  ;;  %v3240_v7 = vadd.f32 %v8508_v28, %v8619_v17  ;;  %v3241_v17 = vadd.f32 %v8508_v28, %v8639_v62  ;;  %v3242_v62 = vadd.f32 %v8508_v28, %v8659_v36 }
 0x424   : > { %v3243_v36 = vadd.f32 %v8508_v28, %v8679_v19  ;;  %v3244_v19 = vadd.f32 %v8508_v28, %v8699_v58  ;;  %v3245_v58 = vadd.f32 %v8508_v28, %v8719_v13  ;;  %v3246_v13 = vadd.f32 %v8508_v28, %v8739_v47 }
 0x425   : > { %v8918_v30 = vadd.f32 %v3739_v53, %v3517_v32  ;;  %v3247_v47 = vadd.f32 %v8508_v28, %v8765_v1  ;;  %v3248_v1 = vadd.f32 %v8508_v28, %v8787_v6  ;;  %v3249_v6 = vadd.f32 %v8508_v28, %v8811_v60 }
 0x426   : > { %v8920_v34 = vpop.f32.mrf.mxu0  ;;  %v3250_v60 = vadd.f32 %v8508_v28, %v8833_v9 }
 0x427   : > { %9972 = vst [vmem:[#allocation93_spill] sm:$0xff] %v8920_v34  ;;  %6256 = vmatmul.msk.f32.gmra.mxu2 %vm255_vm1, %v9973_v24  ;;  %v4648_v24 = vld [vmem:[#allocation3 + $0x78] sm:$0xff] }
 0x428   : > { %6290 = vmatmul.msk.f32.gmra.mxu3 %vm255_vm1, %v4647_v5  ;;  %v8929_v16 = vpop.f32.mrf.mxu1  ;;  %v9975_v5 = vld [vmem:[#allocation71_spill] sm:$0xff] }
 0x429   : > { %6323 = vmatmul.msk.f32.gmra.mxu0 %vm255_vm1, %v8347_v2 }
 0x42a   : > { %v3464_v31 = vpop.f32.mrf.mxu2 }
 0x42b   : > { %v3742_v53 = vpop.f32.mrf.mxu3  ;;  %v3518_v32 = vadd.f32 %v3464_v31, %v3240_v7  ;;  %6238 = vmatmul.msk.f32.gmra.mxu1 %vm255_vm1, %v8651_v26 }
 0x42d   : > { %v8937_v15 = vadd.f32 %v3742_v53, %v3518_v32 }
 0x42e   : > { %v8939_v34 = vpop.f32.mrf.mxu0 }
 0x42f   : > { %9974 = vst [vmem:[#allocation69_spill] sm:$0xff] %v8939_v34  ;;  %6257 = vmatmul.msk.f32.gmra.mxu2 %vm255_vm1, %v9975_v5  ;;  %v4649_v5 = vld [vmem:[#allocation3 + $0x80] sm:$0xff] }
 0x430   : > { %6291 = vmatmul.msk.f32.gmra.mxu3 %vm255_vm1, %v4648_v24  ;;  %v8944_v2 = vpop.f32.mrf.mxu1  ;;  %v9977_v24 = vld [vmem:[#allocation73_spill] sm:$0xff] }
 0x431   : > { %6324 = vmatmul.msk.f32.gmra.mxu0 %vm255_vm1, %v8367_v59 }
 0x432   : > { %v3467_v7 = vpop.f32.mrf.mxu2 }
 0x433   : > { %v3745_v31 = vpop.f32.mrf.mxu3  ;;  %v3519_v53 = vadd.f32 %v3467_v7, %v3241_v17  ;;  %6239 = vmatmul.msk.f32.gmra.mxu1 %vm255_vm1, %v8671_v37 }
 0x435   : > { %v8952_v32 = vadd.f32 %v3745_v31, %v3519_v53 }
 0x436   : > { %v8954_v34 = vpop.f32.mrf.mxu0 }
 0x437   : > { %9976 = vst [vmem:[#allocation71_spill] sm:$0xff] %v8954_v34  ;;  %6258 = vmatmul.msk.f32.gmra.mxu2 %vm255_vm1, %v9977_v24  ;;  %v4650_v24 = vld [vmem:[#allocation3 + $0x90] sm:$0xff] }
 0x438   : > { %6292 = vmatmul.msk.f32.gmra.mxu3 %vm255_vm1, %v4649_v5  ;;  %v8959_v59 = vpop.f32.mrf.mxu1  ;;  %v9979_v5 = vld [vmem:[#allocation53_spill] sm:$0xff] }
 0x439   : > { %6325 = vmatmul.msk.f32.gmra.mxu0 %vm255_vm1, %v8387_v48 }
 0x43a   : > { %v3470_v17 = vpop.f32.mrf.mxu2 }
 0x43b   : > { %v3748_v7 = vpop.f32.mrf.mxu3  ;;  %v3520_v31 = vadd.f32 %v3470_v17, %v3242_v62  ;;  %6240 = vmatmul.msk.f32.gmra.mxu1 %vm255_vm1, %v8691_v29 }
 0x43d   : > { %v8967_v53 = vadd.f32 %v3748_v7, %v3520_v31 }
 0x43e   : > { %v8969_v34 = vpop.f32.mrf.mxu0 }
 0x43f   : > { %9978 = vst [vmem:[#allocation73_spill] sm:$0xff] %v8969_v34  ;;  %6259 = vmatmul.msk.f32.gmra.mxu2 %vm255_vm1, %v9979_v5  ;;  %v4651_v5 = vld [vmem:[#allocation3 + $0x98] sm:$0xff] }
 0x440   : > { %6293 = vmatmul.msk.f32.gmra.mxu3 %vm255_vm1, %v4650_v24  ;;  %v8974_v48 = vpop.f32.mrf.mxu1  ;;  %v9981_v24 = vld [vmem:[#allocation37_spill] sm:$0xff] }
 0x441   : > { %6326 = vmatmul.msk.f32.gmra.mxu0 %vm255_vm1, %v8407_v46 }
 0x442   : > { %v3473_v62 = vpop.f32.mrf.mxu2 }
 0x443   : > { %v3751_v17 = vpop.f32.mrf.mxu3  ;;  %v3521_v7 = vadd.f32 %v3473_v62, %v3243_v36  ;;  %6241 = vmatmul.msk.f32.gmra.mxu1 %vm255_vm1, %v8711_v55 }
 0x445   : > { %v8982_v31 = vadd.f32 %v3751_v17, %v3521_v7 }
 0x446   : > { %v8984_v34 = vpop.f32.mrf.mxu0 }
 0x447   : > { %9980 = vst [vmem:[#allocation53_spill] sm:$0xff] %v8984_v34  ;;  %6260 = vmatmul.msk.f32.gmra.mxu2 %vm255_vm1, %v9981_v24  ;;  %v4652_v24 = vld [vmem:[#allocation3 + $0xa8] sm:$0xff] }
 0x448   : > { %6294 = vmatmul.msk.f32.gmra.mxu3 %vm255_vm1, %v4651_v5  ;;  %v8989_v46 = vpop.f32.mrf.mxu1  ;;  %v9983_v5 = vld [vmem:[#allocation39_spill] sm:$0xff] }
 0x449   : > { %6327 = vmatmul.msk.f32.gmra.mxu0 %vm255_vm1, %v8427_v57 }
 0x44a   : > { %v3476_v36 = vpop.f32.mrf.mxu2 }
 0x44b   : > { %v3754_v62 = vpop.f32.mrf.mxu3  ;;  %v3522_v17 = vadd.f32 %v3476_v36, %v3244_v19  ;;  %6242 = vmatmul.msk.f32.gmra.mxu1 %vm255_vm1, %v8731_v4 }
 0x44d   : > { %v8997_v7 = vadd.f32 %v3754_v62, %v3522_v17 }
 0x44e   : > { %v8999_v34 = vpop.f32.mrf.mxu0 }
 0x44f   : > { %9982 = vst [vmem:[#allocation37_spill] sm:$0xff] %v8999_v34  ;;  %6261 = vmatmul.msk.f32.gmra.mxu2 %vm255_vm1, %v9983_v5  ;;  %v4653_v5 = vld [vmem:[#allocation3 + $0xb0] sm:$0xff] }
 0x450   : > { %6295 = vmatmul.msk.f32.gmra.mxu3 %vm255_vm1, %v4652_v24  ;;  %v9004_v57 = vpop.f32.mrf.mxu1  ;;  %v9986_v24 = vld [vmem:[#allocation60_spill] sm:$0xff] }
 0x451   : > { %6328 = vmatmul.msk.f32.gmra.mxu0 %vm255_vm1, %v8447_v11 }
 0x452   : > { %v3479_v19 = vpop.f32.mrf.mxu2 }
 0x453   : > { %v3757_v36 = vpop.f32.mrf.mxu3  ;;  %v3523_v62 = vadd.f32 %v3479_v19, %v3245_v58  ;;  %6243 = vmatmul.msk.f32.gmra.mxu1 %vm255_vm1, %v8751_v35 }
 0x455   : > { %v9012_v17 = vadd.f32 %v3757_v36, %v3523_v62 }
 0x456   : > { %v9014_v34 = vpop.f32.mrf.mxu0 }
 0x457   : > { %9984 = vst [vmem:[#allocation39_spill] sm:$0xff] %v9012_v17  ;;  %6262 = vmatmul.msk.f32.gmra.mxu2 %vm255_vm1, %v9986_v24  ;;  %v4654_v24 = vld [vmem:[#allocation3 + $0xc0] sm:$0xff] }
 0x458   : > { %9985 = vst [vmem:[#allocation94_spill] sm:$0xff] %v9014_v34  ;;  %6296 = vmatmul.msk.f32.gmra.mxu3 %vm255_vm1, %v4653_v5  ;;  %v9019_v11 = vpop.f32.mrf.mxu1  ;;  %v9989_v5 = vld [vmem:[#allocation38_spill] sm:$0xff] }
 0x459   : > { %6329 = vmatmul.msk.f32.gmra.mxu0 %vm255_vm1, %v8467_v23 }
 0x45a   : > { %v3482_v58 = vpop.f32.mrf.mxu2 }
 0x45b   : > { %v3760_v19 = vpop.f32.mrf.mxu3  ;;  %v3524_v36 = vadd.f32 %v3482_v58, %v3246_v13  ;;  %6244 = vmatmul.msk.f32.gmra.mxu1 %vm255_vm1, %v8779_v3 }
 0x45d   : > { %v9027_v62 = vadd.f32 %v3760_v19, %v3524_v36 }
 0x45e   : > { %v9029_v34 = vpop.f32.mrf.mxu0 }
 0x45f   : > { %9987 = vst [vmem:[#allocation60_spill] sm:$0xff] %v9027_v62  ;;  %6263 = vmatmul.msk.f32.gmra.mxu2 %vm255_vm1, %v9989_v5  ;;  %v4655_v5 = vld [vmem:[#allocation3 + $0xc8] sm:$0xff] }
 0x460   : > { %9988 = vst [vmem:[#allocation95_spill] sm:$0xff] %v9029_v34  ;;  %6297 = vmatmul.msk.f32.gmra.mxu3 %vm255_vm1, %v4654_v24  ;;  %v9034_v23 = vpop.f32.mrf.mxu1 }
 0x461   : > { %6330 = vmatmul.msk.f32.gmra.mxu0 %vm255_vm1, %v8487_v49 }
 0x462   : > { %v3485_v13 = vpop.f32.mrf.mxu2 }
 0x463   : > { %v3763_v58 = vpop.f32.mrf.mxu3  ;;  %v3525_v19 = vadd.f32 %v3485_v13, %v3247_v47  ;;  %6245 = vmatmul.msk.f32.gmra.mxu1 %vm255_vm1, %v8803_v33 }
 0x465   : > { %v9042_v36 = vadd.f32 %v3763_v58, %v3525_v19 }
 0x466   : > { %v9044_v17 = vpop.f32.mrf.mxu0 }
 0x467   : > { %9990 = vst [vmem:[#allocation38_spill] sm:$0xff] %v9042_v36  ;;  %6264 = vmatmul.msk.f32.gmra.mxu2 %vm255_vm1, %v8489_v14  ;;  %v4656_v14 = vld [vmem:[#allocation3 + $0xd8] sm:$0xff] }
 0x468   : > { %9991 = vst [vmem:[#allocation96_spill] sm:$0xff] %v9044_v17  ;;  %6298 = vmatmul.msk.f32.gmra.mxu3 %vm255_vm1, %v4655_v5  ;;  %v9049_v49 = vpop.f32.mrf.mxu1  ;;  %v9994_v5 = vld [vmem:[#allocation41_spill] sm:$0xff]  ;;  %v4053_v17 = vadd.f32 %v8529_v42, %v8527_v12  ;;  %v4659_v42 = vld [vmem:[#allocation3 + $0xf8] sm:$0xff] }
 0x469   : > { %6331 = vmatmul.msk.f32.gmra.mxu0 %vm255_vm1, %v8510_v27 }
 0x46a   : > { %v3488_v24 = vpop.f32.mrf.mxu2  ;;  %v4331_v9 = vadd.f32 %v8850_v44, %v4053_v17 }
 0x46b   : > { %v3766_v47 = vpop.f32.mrf.mxu3  ;;  %v3526_v13 = vadd.f32 %v3488_v24, %v3248_v1  ;;  %6246 = vmatmul.msk.f32.gmra.mxu1 %vm255_vm1, %v8823_v63 }
 0x46d   : > { %v9057_v58 = vadd.f32 %v3766_v47, %v3526_v13  ;;  %v9070_v47 = vld [vmem:[#allocation3 + $0x181] sm:$0xff] }
 0x46e   : > { %v9059_v19 = vpop.f32.mrf.mxu0 }
 0x46f   : > { %9992 = vst [vmem:[#allocation97_spill] sm:$0xff] %v9057_v58  ;;  %6265 = vmatmul.msk.f32.gmra.mxu2 %vm255_vm1, %v9994_v5  ;;  %v10004_v58 = vld [vmem:[#allocation74_spill] sm:$0xff] }
 0x470   : > { %9993 = vst [vmem:[#allocation98_spill] sm:$0xff] %v9059_v19  ;;  %6299 = vmatmul.msk.f32.gmra.mxu3 %vm255_vm1, %v4656_v14  ;;  %v9064_v27 = vpop.f32.mrf.mxu1  ;;  %v4657_v14 = vld [vmem:[#allocation3 + $0xe0] sm:$0xff] }
 0x471   : > { %6332 = vmatmul.msk.f32.gmra.mxu0 %vm255_vm1, %v8531_v0 }
 0x472   : > { %v3491_v1 = vpop.f32.mrf.mxu2 }
 0x473   : > { %v3769_v24 = vpop.f32.mrf.mxu3  ;;  %v3527_v13 = vadd.f32 %v3491_v1, %v3249_v6  ;;  %6247 = vmatmul.msk.f32.gmra.mxu1 %vm255_vm1, %v9070_v47 }
 0x475   : > { %v9074_v34 = vadd.f32 %v3769_v24, %v3527_v13  ;;  %v9087_v24 = vld [vmem:[#allocation3 + $0x189] sm:$0xff] }
 0x476   : > { %v9076_v5 = vpop.f32.mrf.mxu0 }
 0x477   : > { %9995 = vst [vmem:[#allocation41_spill] sm:$0xff] %v9074_v34  ;;  %6266 = vmatmul.msk.f32.gmra.mxu2 %vm255_vm1, %v8533_v41  ;;  %v10024_v34 = vld [vmem:[#allocation58_spill] sm:$0xff] }
 0x478   : > { %9996 = vst [vmem:[#allocation99_spill] sm:$0xff] %v9076_v5  ;;  %6300 = vmatmul.msk.f32.gmra.mxu3 %vm255_vm1, %v4657_v14  ;;  %v9081_v0 = vpop.f32.mrf.mxu1  ;;  %v4658_v14 = vld [vmem:[#allocation3 + $0xf0] sm:$0xff]  ;;  %v10019_v5 = vld [vmem:[#allocation54_spill] sm:$0xff] }
 0x479   : > { %6333 = vmatmul.msk.f32.gmra.mxu0 %vm255_vm1, %v8551_v61  ;;  %v9999_v61 = vld [vmem:[#allocation63_spill] sm:$0xff] }
 0x47a   : > { %v3494_v6 = vpop.f32.mrf.mxu2 }
 0x47b   : > { %v3772_v1 = vpop.f32.mrf.mxu3  ;;  %v3528_v13 = vadd.f32 %v3494_v6, %v3250_v60  ;;  %6248 = vmatmul.msk.f32.gmra.mxu1 %vm255_vm1, %v9087_v24 }
 0x47d   : > { %v9091_v62 = vadd.f32 %v3772_v1, %v3528_v13  ;;  %v5198_v1 = vld [vmem:[#allocation3 + $0x32] sm:$0xff] }
 0x47e   : > { %v9093_v41 = vpop.f32.mrf.mxu0 }
 0x47f   : > { %9997 = vst [vmem:[#allocation100_spill] sm:$0xff] %v9091_v62  ;;  %6267 = vmatmul.msk.f32.gmra.mxu2 %vm255_vm1, %v9999_v61  ;;  %v10002_v61 = vld [vmem:[#allocation40_spill] sm:$0xff]  ;;  %v10014_v62 = vld [vmem:[#allocation47_spill] sm:$0xff] }
 0x480   : > { %9998 = vst [vmem:[#allocation101_spill] sm:$0xff] %v9093_v41  ;;  %6301 = vmatmul.msk.f32.gmra.mxu3 %vm255_vm1, %v4658_v14  ;;  %v9100_v28 = vpop.f32.mrf.mxu1  ;;  %v10003_v14 = vld [vmem:[#allocation43_spill] sm:$0xff]  ;;  %v10009_v41 = vld [vmem:[#allocation48_spill] sm:$0xff] }
 0x481   : > { %6334 = vmatmul.msk.f32.gmra.mxu0 %vm255_vm1, %v8571_v50  ;;  %v4054_v19 = vadd.f32 %v10003_v14, %v10002_v61  ;;  %v10007_v61 = vld [vmem:[#allocation42_spill] sm:$0xff] }
 0x482   : > { %v4513_v60 = vpop.f32.mrf.mxu2 }
 0x483   : > { %v4792_v6 = vpop.f32.mrf.mxu3  ;;  %v4609_v13 = vadd.f32 %v4513_v60, %v4331_v9  ;;  %6353 = vmatmul.msk.f32.vlgmr.msra.gmra.mxu1 %vm255_vm1, %v5198_v1  ;;  %v4332_v44 = vadd.f32 %v8865_v56, %v4054_v19  ;;  %v5199_v60 = vld [vmem:[#allocation3 + $0x3a] sm:$0xff] }
 0x485   : > { %v9106_v36 = vadd.f32 %v4792_v6, %v4609_v13 }
 0x486   : > { %v9108_v12 = vpop.f32.mrf.mxu0 }
 0x487   : > { %10000 = vst [vmem:[#allocation63_spill] sm:$0xff] %v9106_v36  ;;  %6268 = vmatmul.msk.f32.gmra.mxu2 %vm255_vm1, %v10004_v58  ;;  %v4660_v58 = vld [vmem:[#allocation3 + $0x108] sm:$0xff]  ;;  %v10034_v36 = vld [vmem:[#allocation61_spill] sm:$0xff] }
 0x488   : > { %10001 = vst [vmem:[#allocation102_spill] sm:$0xff] %v9108_v12  ;;  %6302 = vmatmul.msk.f32.gmra.mxu3 %vm255_vm1, %v4659_v42  ;;  %v9115_v50 = vpop.f32.mrf.mxu1  ;;  %v10008_v42 = vld [vmem:[#allocation44_spill] sm:$0xff]  ;;  %v10029_v12 = vld [vmem:[#allocation62_spill] sm:$0xff] }
 0x489   : > { %6335 = vmatmul.msk.f32.gmra.mxu0 %vm255_vm1, %v8591_v25  ;;  %v4055_v14 = vadd.f32 %v10008_v42, %v10007_v61  ;;  %v10012_v61 = vld [vmem:[#allocation75_spill] sm:$0xff] }
 0x48a   : > { %v4516_v17 = vpop.f32.mrf.mxu2 }
 0x48b   : > { %v4795_v9 = vpop.f32.mrf.mxu3  ;;  %v4610_v6 = vadd.f32 %v4516_v17, %v4332_v44  ;;  %6354 = vmatmul.msk.f32.gmra.mxu1 %vm255_vm1, %v5199_v60  ;;  %v4333_v56 = vadd.f32 %v8880_v54, %v4055_v14  ;;  %v5200_v17 = vld [vmem:[#allocation3 + $0x4a] sm:$0xff] }
 0x48d   : > { %v9121_v1 = vadd.f32 %v4795_v9, %v4610_v6 }
 0x48e   : > { %v9123_v13 = vpop.f32.mrf.mxu0 }
 0x48f   : > { %10005 = vst [vmem:[#allocation40_spill] sm:$0xff] %v9121_v1  ;;  %6269 = vmatmul.msk.f32.gmra.mxu2 %vm255_vm1, %v10009_v41  ;;  %v4661_v41 = vld [vmem:[#allocation3 + $0x110] sm:$0xff] }
 0x490   : > { %10006 = vst [vmem:[#allocation43_spill] sm:$0xff] %v9123_v13  ;;  %6303 = vmatmul.msk.f32.gmra.mxu3 %vm255_vm1, %v4660_v58  ;;  %v9130_v25 = vpop.f32.mrf.mxu1  ;;  %v10013_v58 = vld [vmem:[#allocation45_spill] sm:$0xff] }
 0x491   : > { %6336 = vmatmul.msk.f32.gmra.mxu0 %vm255_vm1, %v8611_v45  ;;  %v4056_v42 = vadd.f32 %v10013_v58, %v10012_v61  ;;  %v10017_v61 = vld [vmem:[#allocation46_spill] sm:$0xff]  ;;  %v10039_v13 = vld [vmem:[#allocation65_spill] sm:$0xff] }
 0x492   : > { %v4519_v19 = vpop.f32.mrf.mxu2 }
 0x493   : > { %v4798_v44 = vpop.f32.mrf.mxu3  ;;  %v4611_v9 = vadd.f32 %v4519_v19, %v4333_v56  ;;  %6355 = vmatmul.msk.f32.gmra.mxu1 %vm255_vm1, %v5200_v17  ;;  %v4334_v54 = vadd.f32 %v8895_v21, %v4056_v42  ;;  %v5201_v19 = vld [vmem:[#allocation3 + $0x52] sm:$0xff] }
 0x495   : > { %v9136_v60 = vadd.f32 %v4798_v44, %v4611_v9 }
 0x496   : > { %v9138_v6 = vpop.f32.mrf.mxu0 }
 0x497   : > { %10010 = vst [vmem:[#allocation74_spill] sm:$0xff] %v9136_v60  ;;  %6270 = vmatmul.msk.f32.gmra.mxu2 %vm255_vm1, %v10014_v62  ;;  %v4662_v62 = vld [vmem:[#allocation3 + $0x120] sm:$0xff] }
 0x498   : > { %10011 = vst [vmem:[#allocation42_spill] sm:$0xff] %v9138_v6  ;;  %6304 = vmatmul.msk.f32.gmra.mxu3 %vm255_vm1, %v4661_v41  ;;  %v9145_v45 = vpop.f32.mrf.mxu1  ;;  %v10018_v41 = vld [vmem:[#allocation50_spill] sm:$0xff]  ;;  %v10042_v6 = vld [vmem:[#allocation72_spill] sm:$0xff] }
 0x499   : > { %6337 = vmatmul.msk.f32.gmra.mxu0 %vm255_vm1, %v8631_v10  ;;  %v4057_v58 = vadd.f32 %v10018_v41, %v10017_v61  ;;  %v10022_v61 = vld [vmem:[#allocation52_spill] sm:$0xff]  ;;  %v4950_v60 = vld [vmem:[#allocation3 + $0x199] sm:$0xff] }
 0x49a   : > { %v4522_v14 = vpop.f32.mrf.mxu2 }
 0x49b   : > { %v4801_v56 = vpop.f32.mrf.mxu3  ;;  %v4612_v44 = vadd.f32 %v4522_v14, %v4334_v54  ;;  %6356 = vmatmul.msk.f32.gmra.mxu1 %vm255_vm1, %v5201_v19  ;;  %v4335_v21 = vadd.f32 %v8910_v51, %v4057_v58  ;;  %v5202_v14 = vld [vmem:[#allocation3 + $0x62] sm:$0xff] }
 0x49d   : > { %v9151_v17 = vadd.f32 %v4801_v56, %v4612_v44 }
 0x49e   : > { %v9153_v9 = vpop.f32.mrf.mxu0 }
 0x49f   : > { %10015 = vst [vmem:[#allocation44_spill] sm:$0xff] %v9151_v17  ;;  %6271 = vmatmul.msk.f32.gmra.mxu2 %vm255_vm1, %v10019_v5  ;;  %v4663_v5 = vld [vmem:[#allocation3 + $0x128] sm:$0xff] }
 0x4a0   : > { %10016 = vst [vmem:[#allocation48_spill] sm:$0xff] %v9153_v9  ;;  %6305 = vmatmul.msk.f32.gmra.mxu3 %vm255_vm1, %v4662_v62  ;;  %v9160_v10 = vpop.f32.mrf.mxu1  ;;  %v10023_v62 = vld [vmem:[#allocation49_spill] sm:$0xff] }
 0x4a1   : > { %6338 = vmatmul.msk.f32.gmra.mxu0 %vm255_vm1, %v8651_v26  ;;  %v4058_v41 = vadd.f32 %v10023_v62, %v10022_v61  ;;  %v10027_v61 = vld [vmem:[#allocation51_spill] sm:$0xff]  ;;  %v9315_v9 = vld [vmem:[#allocation3 + $0x18a] sm:$0xff] }
 0x4a2   : > { %v4525_v42 = vpop.f32.mrf.mxu2 }
 0x4a3   : > { %v4804_v54 = vpop.f32.mrf.mxu3  ;;  %v4613_v56 = vadd.f32 %v4525_v42, %v4335_v21  ;;  %6357 = vmatmul.msk.f32.gmra.mxu1 %vm255_vm1, %v5202_v14  ;;  %v4336_v51 = vadd.f32 %v8929_v16, %v4058_v41  ;;  %v5203_v42 = vld [vmem:[#allocation3 + $0x6a] sm:$0xff] }
 0x4a5   : > { %v9166_v19 = vadd.f32 %v4804_v54, %v4613_v56 }
 0x4a6   : > { %v9168_v44 = vpop.f32.mrf.mxu0 }
 0x4a7   : > { %10020 = vst [vmem:[#allocation75_spill] sm:$0xff] %v9166_v19  ;;  %6272 = vmatmul.msk.f32.gmra.mxu2 %vm255_vm1, %v10024_v34  ;;  %v4664_v34 = vld [vmem:[#allocation3 + $0x138] sm:$0xff]  ;;  %v4069_v19 = vadd.f32 %v8860_v38, %v8858_v20 }
 0x4a8   : > { %10021 = vst [vmem:[#allocation45_spill] sm:$0xff] %v9168_v44  ;;  %6306 = vmatmul.msk.f32.gmra.mxu3 %vm255_vm1, %v4663_v5  ;;  %v9175_v26 = vpop.f32.mrf.mxu1  ;;  %v10028_v5 = vld [vmem:[#allocation56_spill] sm:$0xff] }
 0x4a9   : > { %6339 = vmatmul.msk.f32.gmra.mxu0 %vm255_vm1, %v8671_v37  ;;  %v4059_v62 = vadd.f32 %v10028_v5, %v10027_v61  ;;  %v10032_v61 = vld [vmem:[#allocation55_spill] sm:$0xff] }
 0x4aa   : > { %v4528_v58 = vpop.f32.mrf.mxu2  ;;  %v4951_v44 = vld [vmem:[#allocation3 + $0x1a1] sm:$0xff] }
 0x4ab   : > { %v4807_v21 = vpop.f32.mrf.mxu3  ;;  %v4614_v54 = vadd.f32 %v4528_v58, %v4336_v51  ;;  %6358 = vmatmul.msk.f32.gmra.mxu1 %vm255_vm1, %v5203_v42  ;;  %v4337_v16 = vadd.f32 %v8944_v2, %v4059_v62  ;;  %v5204_v58 = vld [vmem:[#allocation3 + $0x7a] sm:$0xff] }
 0x4ad   : > { %v9181_v14 = vadd.f32 %v4807_v21, %v4614_v54 }
 0x4ae   : > { %v9183_v56 = vpop.f32.mrf.mxu0 }
 0x4af   : > { %10025 = vst [vmem:[#allocation47_spill] sm:$0xff] %v9181_v14  ;;  %6273 = vmatmul.msk.f32.gmra.mxu2 %vm255_vm1, %v10029_v12  ;;  %v4665_v12 = vld [vmem:[#allocation3 + $0x140] sm:$0xff]  ;;  %v5214_v14 = vld [vmem:[#allocation3 + $0xf2] sm:$0xff] }
 0x4b0   : > { %10026 = vst [vmem:[#allocation46_spill] sm:$0xff] %v9183_v56  ;;  %6307 = vmatmul.msk.f32.gmra.mxu3 %vm255_vm1, %v4664_v34  ;;  %v9190_v37 = vpop.f32.mrf.mxu1  ;;  %v10033_v34 = vld [vmem:[#allocation57_spill] sm:$0xff] }
 0x4b1   : > { %6340 = vmatmul.msk.f32.gmra.mxu0 %vm255_vm1, %v8691_v29  ;;  %v4060_v5 = vadd.f32 %v10033_v34, %v10032_v61  ;;  %v10037_v61 = vld [vmem:[#allocation59_spill] sm:$0xff] }
 0x4b2   : > { %v4531_v41 = vpop.f32.mrf.mxu2 }
 0x4b3   : > { %v4810_v51 = vpop.f32.mrf.mxu3  ;;  %v4615_v21 = vadd.f32 %v4531_v41, %v4337_v16  ;;  %6359 = vmatmul.msk.f32.gmra.mxu1 %vm255_vm1, %v5204_v58  ;;  %v4338_v2 = vadd.f32 %v8959_v59, %v4060_v5  ;;  %v5205_v41 = vld [vmem:[#allocation3 + $0x82] sm:$0xff] }
 0x4b5   : > { %v9196_v42 = vadd.f32 %v4810_v51, %v4615_v21 }
 0x4b6   : > { %v9198_v54 = vpop.f32.mrf.mxu0 }
 0x4b7   : > { %10030 = vst [vmem:[#allocation50_spill] sm:$0xff] %v9196_v42  ;;  %6274 = vmatmul.msk.f32.gmra.mxu2 %vm255_vm1, %v10034_v36  ;;  %v4666_v36 = vld [vmem:[#allocation3 + $0x150] sm:$0xff] }
 0x4b8   : > { %10031 = vst [vmem:[#allocation54_spill] sm:$0xff] %v9198_v54  ;;  %6308 = vmatmul.msk.f32.gmra.mxu3 %vm255_vm1, %v4665_v12  ;;  %v9205_v29 = vpop.f32.mrf.mxu1  ;;  %v10038_v12 = vld [vmem:[#allocation64_spill] sm:$0xff] }
 0x4b9   : > { %6341 = vmatmul.msk.f32.gmra.mxu0 %vm255_vm1, %v8711_v55  ;;  %v4061_v34 = vadd.f32 %v10038_v12, %v10037_v61  ;;  %v4667_v61 = vld [vmem:[#allocation3 + $0x158] sm:$0xff] }
 0x4ba   : > { %v4534_v62 = vpop.f32.mrf.mxu2  ;;  %v10040_v12 = vld [vmem:[#allocation66_spill] sm:$0xff] }
 0x4bb   : > { %v4813_v16 = vpop.f32.mrf.mxu3  ;;  %v4616_v51 = vadd.f32 %v4534_v62, %v4338_v2  ;;  %6360 = vmatmul.msk.f32.gmra.mxu1 %vm255_vm1, %v5205_v41  ;;  %v4339_v59 = vadd.f32 %v8974_v48, %v4061_v34  ;;  %v5206_v62 = vld [vmem:[#allocation3 + $0x92] sm:$0xff] }
 0x4bd   : > { %v9211_v58 = vadd.f32 %v4813_v16, %v4616_v51 }
 0x4be   : > { %v9213_v21 = vpop.f32.mrf.mxu0 }
 0x4bf   : > { %10035 = vst [vmem:[#allocation52_spill] sm:$0xff] %v9211_v58  ;;  %6275 = vmatmul.msk.f32.gmra.mxu2 %vm255_vm1, %v10039_v13  ;;  %v10041_v13 = vld [vmem:[#allocation68_spill] sm:$0xff] }
 0x4c0   : > { %10036 = vst [vmem:[#allocation49_spill] sm:$0xff] %v9213_v21  ;;  %6309 = vmatmul.msk.f32.gmra.mxu3 %vm255_vm1, %v4666_v36  ;;  %v9220_v55 = vpop.f32.mrf.mxu1  ;;  %v4062_v1 = vadd.f32 %v10041_v13, %v10040_v12  ;;  %v4669_v13 = vld [vmem:[#allocation3 + $0x170] sm:$0xff]  ;;  %v4070_v21 = vadd.f32 %v8875_v18, %v8873_v39 }
 0x4c1   : > { %6342 = vmatmul.msk.f32.gmra.mxu0 %vm255_vm1, %v8731_v4 }
 0x4c2   : > { %v4537_v5 = vpop.f32.mrf.mxu2  ;;  %v4340_v48 = vadd.f32 %v8989_v46, %v4062_v1  ;;  %v5208_v1 = vld [vmem:[#allocation3 + $0xaa] sm:$0xff]  ;;  %v4348_v38 = vadd.f32 %v9115_v50, %v4070_v21 }
 0x4c3   : > { %v4816_v2 = vpop.f32.mrf.mxu3  ;;  %v4617_v16 = vadd.f32 %v4537_v5, %v4339_v59  ;;  %6361 = vmatmul.msk.f32.gmra.mxu1 %vm255_vm1, %v5206_v62  ;;  %v5207_v5 = vld [vmem:[#allocation3 + $0x9a] sm:$0xff]  ;;  %v5216_v50 = vld [vmem:[#allocation3 + $0x10a] sm:$0xff] }
 0x4c5   : > { %v4896_v41 = vadd.f32 %v4816_v2, %v4617_v16 }
 0x4c6   : > { %v5094_v51 = vpop.f32.mrf.mxu0 }
 0x4c7   : > { %v9228_v36 = vadd.f32 %v5094_v51, %v4896_v41  ;;  %6276 = vmatmul.msk.f32.gmra.mxu2 %vm255_vm1, %v10042_v6  ;;  %v4668_v41 = vld [vmem:[#allocation3 + $0x168] sm:$0xff] }
 0x4c8   : > { %6310 = vmatmul.msk.f32.gmra.mxu3 %vm255_vm1, %v4667_v61  ;;  %v9233_v4 = vpop.f32.mrf.mxu1  ;;  %v10043_v6 = vld [vmem:[#allocation80_spill] sm:$0xff] }
 0x4c9   : > { %6343 = vmatmul.msk.f32.gmra.mxu0 %vm255_vm1, %v8751_v35 }
 0x4ca   : > { %v4540_v34 = vpop.f32.mrf.mxu2 }
 0x4cb   : > { %v4819_v59 = vpop.f32.mrf.mxu3  ;;  %v4618_v2 = vadd.f32 %v4540_v34, %v4340_v48  ;;  %6362 = vmatmul.msk.f32.gmra.mxu1 %vm255_vm1, %v5207_v5  ;;  %v10045_v48 = vld [vmem:[#allocation83_spill] sm:$0xff]  ;;  %v5209_v5 = vld [vmem:[#allocation3 + $0xb2] sm:$0xff] }
 0x4cd   : > { %v4897_v62 = vadd.f32 %v4819_v59, %v4618_v2 }
 0x4ce   : > { %v5097_v16 = vpop.f32.mrf.mxu0 }
 0x4cf   : > { %v9239_v51 = vadd.f32 %v5097_v16, %v4897_v62  ;;  %6277 = vmatmul.msk.f32.gmra.mxu2 %vm255_vm1, %v10043_v6  ;;  %v10047_v62 = vld [vmem:[#allocation86_spill] sm:$0xff] }
 0x4d0   : > { %6311 = vmatmul.msk.f32.gmra.mxu3 %vm255_vm1, %v4668_v41  ;;  %v9244_v61 = vpop.f32.mrf.mxu1  ;;  %v10048_v16 = vld [vmem:[#allocation90_spill] sm:$0xff] }
 0x4d1   : > { %10044 = vst [vmem:[#allocation58_spill] sm:$0xff] %v9244_v61  ;;  %6344 = vmatmul.msk.f32.gmra.mxu0 %vm255_vm1, %v8779_v3 }
 0x4d2   : > { %v9248_v35 = vpop.f32.mrf.mxu2 }
 0x4d3   : > { %v9250_v46 = vpop.f32.mrf.mxu3  ;;  %6363 = vmatmul.msk.f32.gmra.mxu1 %vm255_vm1, %v5208_v1  ;;  %v5210_v1 = vld [vmem:[#allocation3 + $0xc2] sm:$0xff] }
 0x4d6   : > { %v9253_v12 = vpop.f32.mrf.mxu0 }
 0x4d7   : > { %6278 = vmatmul.msk.f32.gmra.mxu2 %vm255_vm1, %v10045_v48  ;;  %v10050_v48 = vld [vmem:[#allocation89_spill] sm:$0xff] }
 0x4d8   : > { %6312 = vmatmul.msk.f32.gmra.mxu3 %vm255_vm1, %v4669_v13  ;;  %v9258_v34 = vpop.f32.mrf.mxu1 }
 0x4d9   : > { %10046 = vst [vmem:[#allocation51_spill] sm:$0xff] %v9258_v34  ;;  %6345 = vmatmul.msk.f32.gmra.mxu0 %vm255_vm1, %v8803_v33  ;;  %v9299_v34 = vld [vmem:[#allocation3 + $0x182] sm:$0xff] }
 0x4da   : > { %v9262_v3 = vpop.f32.mrf.mxu2 }
 0x4db   : > { %v9264_v59 = vpop.f32.mrf.mxu3  ;;  %6364 = vmatmul.msk.f32.gmra.mxu1 %vm255_vm1, %v5209_v5 }
 0x4de   : > { %v9267_v2 = vpop.f32.mrf.mxu0 }
 0x4df   : > { %6279 = vmatmul.msk.f32.gmra.mxu2 %vm255_vm1, %v10047_v62 }
 0x4e0   : > { %6313 = vmatmul.msk.f32.gmra.mxu3 %vm255_vm1, %v10048_v16  ;;  %v9273_v41 = vpop.f32.mrf.mxu1  ;;  %v5211_v16 = vld [vmem:[#allocation3 + $0xca] sm:$0xff] }
 0x4e1   : > { %10049 = vst [vmem:[#allocation56_spill] sm:$0xff] %v9273_v41  ;;  %6346 = vmatmul.msk.f32.gmra.mxu0 %vm255_vm1, %v8823_v63  ;;  %v4673_v41 = vld [vmem:[#allocation3 + $0x1a0] sm:$0xff] }
 0x4e2   : > { %v9277_v33 = vpop.f32.mrf.mxu2 }
 0x4e3   : > { %v9279_v6 = vpop.f32.mrf.mxu3  ;;  %6365 = vmatmul.msk.f32.gmra.mxu1 %vm255_vm1, %v5210_v1  ;;  %v4672_v1 = vld [vmem:[#allocation3 + $0x198] sm:$0xff] }
 0x4e6   : > { %v9282_v13 = vpop.f32.mrf.mxu0 }
 0x4e7   : > { %6280 = vmatmul.msk.f32.gmra.mxu2 %vm255_vm1, %v10050_v48 }
 0x4e8   : > { %6314 = vmatmul.msk.f32.gmra.mxu3 %vm255_vm1, %v8848_v8  ;;  %v9288_v5 = vpop.f32.mrf.mxu1 }
 0x4e9   : > { %10051 = vst [vmem:[#allocation62_spill] sm:$0xff] %v9288_v5  ;;  %6347 = vmatmul.msk.f32.gmra.mxu0 %vm255_vm1, %v9070_v47 }
 0x4ea   : > { %v9292_v63 = vpop.f32.mrf.mxu2 }
 0x4eb   : > { %v9294_v62 = vpop.f32.mrf.mxu3  ;;  %6366 = vmatmul.msk.f32.gmra.mxu1 %vm255_vm1, %v5211_v16  ;;  %v5212_v16 = vld [vmem:[#allocation3 + $0xda] sm:$0xff] }
 0x4ee   : > { %v9297_v61 = vpop.f32.mrf.mxu0 }
 0x4ef   : > { %6281 = vmatmul.msk.f32.gmra.mxu2 %vm255_vm1, %v9299_v34 }
 0x4f0   : > { %6315 = vmatmul.msk.f32.gmra.mxu3 %vm255_vm1, %v4672_v1  ;;  %v9304_v8 = vpop.f32.mrf.mxu1 }
 0x4f1   : > { %10052 = vst [vmem:[#allocation55_spill] sm:$0xff] %v9304_v8  ;;  %6348 = vmatmul.msk.f32.gmra.mxu0 %vm255_vm1, %v9087_v24 }
 0x4f2   : > { %v9308_v47 = vpop.f32.mrf.mxu2 }
 0x4f3   : > { %v9310_v48 = vpop.f32.mrf.mxu3  ;;  %6367 = vmatmul.msk.f32.gmra.mxu1 %vm255_vm1, %v5212_v16  ;;  %v5213_v16 = vld [vmem:[#allocation3 + $0xe2] sm:$0xff] }
 0x4f6   : > { %v9313_v5 = vpop.f32.mrf.mxu0 }
 0x4f7   : > { %6282 = vmatmul.msk.f32.gmra.mxu2 %vm255_vm1, %v9315_v9 }
 0x4f8   : > { %6316 = vmatmul.msk.f32.gmra.mxu3 %vm255_vm1, %v4673_v41  ;;  %v9320_v1 = vpop.f32.mrf.mxu1  ;;  %v4347_v41 = vadd.f32 %v9100_v28, %v4069_v19  ;;  %v5215_v28 = vld [vmem:[#allocation3 + $0xfa] sm:$0xff] }
 0x4f9   : > { %10053 = vst [vmem:[#allocation57_spill] sm:$0xff] %v9320_v1  ;;  %6349 = vmatmul.msk.f32.gmra.mxu0 %vm255_vm1, %v4950_v60 }
 0x4fa   : > { %v9323_v24 = vpop.f32.mrf.mxu2 }
 0x4fb   : > { %v9325_v8 = vpop.f32.mrf.mxu3  ;;  %6368 = vmatmul.msk.f32.gmra.mxu1 %vm255_vm1, %v5213_v16 }
 0x4fe   : > { %v9328_v17 = vpop.f32.mrf.mxu0 }
 0x500   : > { %v9332_v56 = vpop.f32.mrf.mxu1 }
 0x501   : > { %10054 = vst [vmem:[#allocation61_spill] sm:$0xff] %v9332_v56  ;;  %6350 = vmatmul.msk.f32.gmra.mxu0 %vm255_vm1, %v4951_v44 }
 0x502   : > { %v4561_v60 = vpop.f32.mrf.mxu2 }
 0x503   : > { %v4840_v1 = vpop.f32.mrf.mxu3  ;;  %v4625_v54 = vadd.f32 %v4561_v60, %v4347_v41  ;;  %6369 = vmatmul.msk.f32.gmra.mxu1 %vm255_vm1, %v5214_v14  ;;  %v4071_v14 = vadd.f32 %v8890_v40, %v8888_v22 }
 0x505   : > { %v4904_v42 = vadd.f32 %v4840_v1, %v4625_v54  ;;  %v4349_v39 = vadd.f32 %v9130_v25, %v4071_v14  ;;  %v5217_v25 = vld [vmem:[#allocation3 + $0x112] sm:$0xff] }
 0x506   : > { %v5118_v16 = vpop.f32.mrf.mxu0 }
 0x507   : > { %v9339_v58 = vadd.f32 %v5118_v16, %v4904_v42 }
 0x508   : > { %v9341_v20 = vpop.f32.mrf.mxu1 }
 0x50a   : > { %v4564_v44 = vpop.f32.mrf.mxu2 }
 0x50b   : > { %v4843_v56 = vpop.f32.mrf.mxu3  ;;  %v4626_v19 = vadd.f32 %v4564_v44, %v4348_v38  ;;  %6370 = vmatmul.msk.f32.gmra.mxu1 %vm255_vm1, %v5215_v28 }
 0x50d   : > { %v4905_v41 = vadd.f32 %v4843_v56, %v4626_v19  ;;  %v4072_v56 = vadd.f32 %v8905_v43, %v8903_v52 }
 0x50e   : > { %v5121_v60 = vpop.f32.mrf.mxu0 }
 0x50f   : > { %v9347_v54 = vadd.f32 %v5121_v60, %v4905_v41  ;;  %v4350_v40 = vadd.f32 %v9145_v45, %v4072_v56  ;;  %v5218_v45 = vld [vmem:[#allocation3 + $0x122] sm:$0xff] }
 0x510   : > { %v9349_v18 = vpop.f32.mrf.mxu1 }
 0x512   : > { %v4567_v42 = vpop.f32.mrf.mxu2 }
 0x513   : > { %v4846_v1 = vpop.f32.mrf.mxu3  ;;  %v4627_v21 = vadd.f32 %v4567_v42, %v4349_v39  ;;  %6371 = vmatmul.msk.f32.gmra.mxu1 %vm255_vm1, %v5216_v50  ;;  %v10055_v39 = vld [vmem:[#allocation93_spill] sm:$0xff] }
 0x514   : > { %v4073_v42 = vadd.f32 %v10055_v39, %v8918_v30 }
 0x515   : > { %v4906_v16 = vadd.f32 %v4846_v1, %v4627_v21 }
 0x516   : > { %v5124_v38 = vpop.f32.mrf.mxu0  ;;  %v4351_v43 = vadd.f32 %v9160_v10, %v4073_v42  ;;  %v5219_v10 = vld [vmem:[#allocation3 + $0x12a] sm:$0xff] }
 0x517   : > { %v9355_v44 = vadd.f32 %v5124_v38, %v4906_v16 }
 0x518   : > { %v9357_v22 = vpop.f32.mrf.mxu1 }
 0x51a   : > { %v4570_v28 = vpop.f32.mrf.mxu2 }
 0x51b   : > { %v4849_v19 = vpop.f32.mrf.mxu3  ;;  %v4628_v41 = vadd.f32 %v4570_v28, %v4350_v40  ;;  %6372 = vmatmul.msk.f32.gmra.mxu1 %vm255_vm1, %v5217_v25  ;;  %v10056_v40 = vld [vmem:[#allocation69_spill] sm:$0xff] }
 0x51c   : > { %v4074_v28 = vadd.f32 %v10056_v40, %v8937_v15 }
 0x51d   : > { %v4907_v60 = vadd.f32 %v4849_v19, %v4628_v41 }
 0x51e   : > { %v5127_v14 = vpop.f32.mrf.mxu0  ;;  %v4352_v25 = vadd.f32 %v9175_v26, %v4074_v28  ;;  %v5220_v26 = vld [vmem:[#allocation3 + $0x13a] sm:$0xff] }
 0x51f   : > { %v9363_v1 = vadd.f32 %v5127_v14, %v4907_v60 }
 0x520   : > { %v9365_v52 = vpop.f32.mrf.mxu1 }
 0x522   : > { %v4573_v50 = vpop.f32.mrf.mxu2 }
 0x523   : > { %v4852_v21 = vpop.f32.mrf.mxu3  ;;  %v4629_v16 = vadd.f32 %v4573_v50, %v4351_v43  ;;  %6373 = vmatmul.msk.f32.gmra.mxu1 %vm255_vm1, %v5218_v45  ;;  %v10057_v43 = vld [vmem:[#allocation71_spill] sm:$0xff] }
 0x524   : > { %v4075_v50 = vadd.f32 %v10057_v43, %v8952_v32 }
 0x525   : > { %v4908_v38 = vadd.f32 %v4852_v21, %v4629_v16 }
 0x526   : > { %v5130_v56 = vpop.f32.mrf.mxu0  ;;  %v4353_v45 = vadd.f32 %v9190_v37, %v4075_v50  ;;  %v5221_v37 = vld [vmem:[#allocation3 + $0x142] sm:$0xff] }
 0x527   : > { %v9371_v19 = vadd.f32 %v5130_v56, %v4908_v38 }
 0x528   : > { %v9373_v30 = vpop.f32.mrf.mxu1 }
 0x52a   : > { %v4576_v41 = vpop.f32.mrf.mxu2 }
 0x52b   : > { %v4855_v60 = vpop.f32.mrf.mxu3  ;;  %v4630_v14 = vadd.f32 %v4576_v41, %v4352_v25  ;;  %6374 = vmatmul.msk.f32.gmra.mxu1 %vm255_vm1, %v5219_v10  ;;  %v10058_v25 = vld [vmem:[#allocation73_spill] sm:$0xff] }
 0x52c   : > { %v4076_v41 = vadd.f32 %v10058_v25, %v8967_v53 }
 0x52d   : > { %v4909_v39 = vadd.f32 %v4855_v60, %v4630_v14 }
 0x52e   : > { %v5133_v42 = vpop.f32.mrf.mxu0  ;;  %v4354_v10 = vadd.f32 %v9205_v29, %v4076_v41 }
 0x52f   : > { %v9379_v21 = vadd.f32 %v5133_v42, %v4909_v39 }
 0x530   : > { %v9381_v15 = vpop.f32.mrf.mxu1 }
 0x532   : > { %v4579_v16 = vpop.f32.mrf.mxu2 }
 0x533   : > { %v4858_v38 = vpop.f32.mrf.mxu3  ;;  %v4631_v56 = vadd.f32 %v4579_v16, %v4353_v45  ;;  %6375 = vmatmul.msk.f32.gmra.mxu1 %vm255_vm1, %v5220_v26  ;;  %v10059_v45 = vld [vmem:[#allocation53_spill] sm:$0xff] }
 0x534   : > { %v4077_v16 = vadd.f32 %v10059_v45, %v8982_v31 }
 0x535   : > { %v4910_v40 = vadd.f32 %v4858_v38, %v4631_v56 }
 0x536   : > { %v5136_v28 = vpop.f32.mrf.mxu0  ;;  %v4355_v26 = vadd.f32 %v9220_v55, %v4077_v16 }
 0x537   : > { %v9387_v60 = vadd.f32 %v5136_v28, %v4910_v40  ;;  %v5222_v28 = vld [vmem:[#allocation3 + $0x152] sm:$0xff] }
 0x538   : > { %v9389_v32 = vpop.f32.mrf.mxu1 }
 0x53a   : > { %v4582_v14 = vpop.f32.mrf.mxu2 }
 0x53b   : > { %v4861_v39 = vpop.f32.mrf.mxu3  ;;  %v4632_v42 = vadd.f32 %v4582_v14, %v4354_v10  ;;  %6376 = vmatmul.msk.f32.gmra.mxu1 %vm255_vm1, %v5221_v37  ;;  %v10060_v14 = vld [vmem:[#allocation37_spill] sm:$0xff] }
 0x53d   : > { %v4911_v43 = vadd.f32 %v4861_v39, %v4632_v42  ;;  %v4078_v39 = vadd.f32 %v10060_v14, %v8997_v7  ;;  %v5224_v7 = vld [vmem:[#allocation3 + $0x16a] sm:$0xff]  ;;  %v10063_v14 = vld [vmem:[#allocation91_spill] sm:$0xff] }
 0x53e   : > { %v5139_v50 = vpop.f32.mrf.mxu0 }
 0x53f   : > { %v9395_v38 = vadd.f32 %v5139_v50, %v4911_v43  ;;  %v4356_v42 = vadd.f32 %v9233_v4, %v4078_v39  ;;  %v5223_v43 = vld [vmem:[#allocation3 + $0x15a] sm:$0xff]  ;;  %v5225_v4 = vld [vmem:[#allocation3 + $0x172] sm:$0xff]  ;;  %v10064_v39 = vld [vmem:[#allocation92_spill] sm:$0xff] }
 0x540   : > { %v5372_v53 = vpop.f32.mrf.mxu1 }
 0x541   : > { %v9399_v56 = vadd.f32 %v5372_v53, %v9228_v36 }
 0x542   : > { %v4585_v29 = vpop.f32.mrf.mxu2 }
 0x543   : > { %v4864_v40 = vpop.f32.mrf.mxu3  ;;  %v4633_v25 = vadd.f32 %v4585_v29, %v4355_v26  ;;  %6377 = vmatmul.msk.f32.gmra.mxu1 %vm255_vm1, %v5222_v28 }
 0x545   : > { %v4912_v41 = vadd.f32 %v4864_v40, %v4633_v25  ;;  %v10061_v25 = vld [vmem:[#allocation87_spill] sm:$0xff] }
 0x546   : > { %v5142_v10 = vpop.f32.mrf.mxu0 }
 0x547   : > { %v9404_v31 = vadd.f32 %v5142_v10, %v4912_v41  ;;  %v10062_v41 = vld [vmem:[#allocation88_spill] sm:$0xff] }
 0x548   : > { %v5375_v37 = vpop.f32.mrf.mxu1  ;;  %v4067_v10 = vadd.f32 %v10062_v41, %v10061_v25  ;;  %v10067_v25 = vld [vmem:[#allocation81_spill] sm:$0xff]  ;;  %v10068_v41 = vld [vmem:[#allocation82_spill] sm:$0xff] }
 0x549   : > { %v9408_v55 = vadd.f32 %v5375_v37, %v9239_v51  ;;  %v4068_v37 = vadd.f32 %v10064_v39, %v10063_v14  ;;  %v4065_v14 = vadd.f32 %v10068_v41, %v10067_v25  ;;  %v10070_v39 = vld [vmem:[#allocation79_spill] sm:$0xff] }
 0x54a   : > { %v4588_v36 = vpop.f32.mrf.mxu2  ;;  %v10074_v25 = vld [vmem:[#allocation7_spill] sm:$0xff] }
 0x54b   : > { %v4634_v50 = vadd.f32 %v4588_v36, %v4356_v42  ;;  %6378 = vmatmul.msk.f32.gmra.mxu1 %vm255_vm1, %v5223_v43  ;;  %v4867_v45 = vpop.f32.mrf.mxu3  ;;  %v4345_v42 = vadd.f32 %v9064_v27, %v4067_v10  ;;  %v4346_v36 = vadd.f32 %v9081_v0, %v4068_v37  ;;  %v10065_v43 = vld [vmem:[#allocation84_spill] sm:$0xff]  ;;  %v4343_v10 = vadd.f32 %v9034_v23, %v4065_v14 }
 0x54d   : > { %v4913_v16 = vadd.f32 %v4867_v45, %v4634_v50  ;;  %v10066_v50 = vld [vmem:[#allocation85_spill] sm:$0xff]  ;;  %v4621_v37 = vadd.f32 %v9277_v33, %v4343_v10 }
 0x54e   : > { %v5145_v53 = vpop.f32.mrf.mxu0  ;;  %v4066_v45 = vadd.f32 %v10066_v50, %v10065_v43  ;;  %v5229_v43 = vld [vmem:[#allocation3 + $0x1a2] sm:$0xff] }
 0x54f   : > { %v9411_v26 = vadd.f32 %v5145_v53, %v4913_v16  ;;  %v4623_v16 = vadd.f32 %v9308_v47, %v4345_v42  ;;  %v10069_v47 = vld [vmem:[#allocation78_spill] sm:$0xff] }
 0x550   : > { %v9413_v29 = vpop.f32.mrf.mxu1 }
 0x551   : > { %v4902_v27 = vadd.f32 %v9310_v48, %v4623_v16  ;;  %v10072_v16 = vld [vmem:[#allocation67_spill] sm:$0xff] }
 0x553   : > { %6379 = vmatmul.msk.f32.gmra.mxu1 %vm255_vm1, %v5224_v7  ;;  %v5228_v7 = vld [vmem:[#allocation3 + $0x19a] sm:$0xff]  ;;  %v5180_v42 = vadd.f32 %v9313_v5, %v4902_v27 }
 0x558   : > { %v5381_v40 = vpop.f32.mrf.mxu1 }
 0x55b   : > { %6380 = vmatmul.msk.f32.gmra.mxu1 %vm255_vm1, %v5225_v4  ;;  %v4344_v4 = vadd.f32 %v9049_v49, %v4066_v45  ;;  %v10071_v45 = vld [vmem:[#allocation70_spill] sm:$0xff] }
 0x55c   : > { %v4063_v23 = vadd.f32 %v10072_v16, %v10071_v45  ;;  %v10082_v45 = vld [vmem:[#allocation26_spill] sm:$0xff] }
 0x55d   : > { %v5484_v16 = vadd.f32 %v9399_v56, %v10082_v45  ;;  %v10103_v45 = vld [vmem:[#allocation61_spill] sm:$0xff] }
 0x560   : > { %v5384_v51 = vpop.f32.mrf.mxu1 }
 0x563   : > { %6381 = vmatmul.msk.f32.gmra.mxu1 %vm255_vm1, %v9299_v34  ;;  %v4624_v34 = vadd.f32 %v9323_v24, %v4346_v36  ;;  %v4064_v24 = vadd.f32 %v10070_v39, %v10069_v47 }
 0x565   : > { %v4903_v0 = vadd.f32 %v9325_v8, %v4624_v34  ;;  %v4342_v48 = vadd.f32 %v9019_v11, %v4064_v24 }
 0x567   : > { %v5181_v36 = vadd.f32 %v9328_v17, %v4903_v0  ;;  %v4620_v34 = vadd.f32 %v9262_v3, %v4342_v48  ;;  %v4341_v17 = vadd.f32 %v9004_v57, %v4063_v23  ;;  %v10080_v48 = vld [vmem:[#allocation52_spill] sm:$0xff] }
 0x568   : > { %v5387_v28 = vpop.f32.mrf.mxu1 }
 0x569   : > { %v4619_v41 = vadd.f32 %v9248_v35, %v4341_v17  ;;  %v4899_v14 = vadd.f32 %v9264_v59, %v4620_v34  ;;  %v10076_v59 = vld [vmem:[#allocation34_spill] sm:$0xff]  ;;  %v5516_v17 = vmax.f32 %v5484_v16, 0.0 }
 0x56a   : > { %v10083_v34 = vld [vmem:[#allocation50_spill] sm:$0xff] }
 0x56b   : > { %6382 = vmatmul.msk.f32.gmra.mxu1 %vm255_vm1, %v9315_v9  ;;  %v4622_v9 = vadd.f32 %v9292_v63, %v4344_v4  ;;  %v4898_v57 = vadd.f32 %v9250_v46, %v4619_v41 }
 0x56d   : > { %v4901_v49 = vadd.f32 %v9294_v62, %v4622_v9  ;;  %v10073_v62 = vld [vmem:[#allocation8_spill] sm:$0xff]  ;;  %v5176_v39 = vadd.f32 %v9253_v12, %v4898_v57 }
 0x56e   : > { %v10075_v9 = vld [vmem:[#allocation36_spill] sm:$0xff] }
 0x56f   : > { %v5179_v33 = vadd.f32 %v9297_v61, %v4901_v49  ;;  %v5454_v24 = vadd.f32 %v9413_v29, %v5176_v39  ;;  %v10079_v12 = vld [vmem:[#allocation28_spill] sm:$0xff] }
 0x570   : > { %v5390_v53 = vpop.f32.mrf.mxu1 }
 0x571   : > { %v5458_v8 = vadd.f32 %v5390_v53, %v5180_v42  ;;  %v5457_v5 = vadd.f32 %v5387_v28, %v5179_v33  ;;  %v5177_v28 = vadd.f32 %v9267_v2, %v4899_v14  ;;  %v10078_v2 = vld [vmem:[#allocation30_spill] sm:$0xff] }
 0x573   : > { %6383 = vmatmul.msk.f32.gmra.mxu1 %vm255_vm1, %v5228_v7  ;;  %v4900_v7 = vadd.f32 %v9279_v6, %v4621_v37  ;;  %v5490_v11 = vadd.f32 %v5458_v8, %v10074_v25  ;;  %v5489_v27 = vadd.f32 %v5457_v5, %v10075_v9  ;;  %v5455_v35 = vadd.f32 %v5381_v40, %v5177_v28  ;;  %v10077_v37 = vld [vmem:[#allocation32_spill] sm:$0xff]  ;;  %v10081_v8 = vld [vmem:[#allocation49_spill] sm:$0xff]  ;;  %v10086_v25 = vld [vmem:[#allocation47_spill] sm:$0xff] }
 0x574   : > { %v5486_v40 = vadd.f32 %v5454_v24, %v10078_v2  ;;  %v10092_v28 = vld [vmem:[#allocation44_spill] sm:$0xff]  ;;  %v10096_v24 = vld [vmem:[#allocation42_spill] sm:$0xff] }
 0x575   : > { %v5178_v3 = vadd.f32 %v9282_v13, %v4900_v7  ;;  %v5522_v0 = vmax.f32 %v5490_v11, 0.0  ;;  %v5521_v13 = vmax.f32 %v5489_v27, 0.0  ;;  %v10084_v7 = vld [vmem:[#allocation54_spill] sm:$0xff] }
 0x576   : > { %v5172_v33 = vadd.f32 %v10084_v7, %v10083_v34 }
 0x577   : > { %v5456_v61 = vadd.f32 %v5384_v51, %v5178_v3  ;;  %v10089_v3 = vld [vmem:[#allocation75_spill] sm:$0xff] }
 0x578   : > { %v5393_v63 = vpop.f32.mrf.mxu1 }
 0x579   : > { %v5459_v50 = vadd.f32 %v5393_v63, %v5181_v36  ;;  %v5488_v47 = vadd.f32 %v5456_v61, %v10076_v59  ;;  %v5485_v63 = vadd.f32 %v9408_v55, %v10079_v12 }
 0x57b   : > { %v5491_v4 = vadd.f32 %v5459_v50, %v10073_v62  ;;  %6384 = vmatmul.msk.f32.gmra.mxu1 %vm255_vm1, %v5229_v43  ;;  %v5520_v49 = vmax.f32 %v5488_v47, 0.0  ;;  %v5518_v43 = vmax.f32 %v5486_v40, 0.0  ;;  %v5173_v50 = vadd.f32 %v10081_v8, %v10080_v48  ;;  %v10085_v62 = vld [vmem:[#allocation24_spill] sm:$0xff]  ;;  %v10094_v47 = vld [vmem:[#allocation18_spill] sm:$0xff]  ;;  %v10101_v8 = vld [vmem:[#allocation63_spill] sm:$0xff] }
 0x57c   : > { %v5517_v23 = vmax.f32 %v5485_v63, 0.0  ;;  %v10100_v63 = vld [vmem:[#allocation14_spill] sm:$0xff] }
 0x57d   : > { %v5523_v53 = vmax.f32 %v5491_v4, 0.0 }
 0x57f   : > { %6386 = vmatpush.xpose.msk.msrb.mxu2 %vm255_vm1, %v5523_v53  ;;  %v10088_v53 = vld [vmem:[#allocation22_spill] sm:$0xff] }
 0x580   : > { %v5396_v6 = vpop.f32.mrf.mxu1 }
 0x581   : > { %v9461_v10 = vadd.f32 %v5396_v6, %v9339_v58  ;;  %v5487_v58 = vadd.f32 %v5455_v35, %v10077_v37  ;;  %v10090_v6 = vld [vmem:[#allocation45_spill] sm:$0xff]  ;;  %v10093_v35 = vld [vmem:[#allocation48_spill] sm:$0xff] }
 0x582   : > { %v5170_v61 = vadd.f32 %v10090_v6, %v10089_v3 }
 0x583   : > { %6387 = vmatpush.xpose.msk.msrb.mxu2 %vm255_vm1, %v5522_v0  ;;  %v5519_v42 = vmax.f32 %v5487_v58, 0.0 }
 0x584   : > { %v5448_v9 = vadd.f32 %v9365_v52, %v5170_v61 }
 0x587   : > { %6388 = vmatpush.xpose.msk.msrb.mxu2 %vm255_vm1, %v5521_v13  ;;  %v5480_v13 = vadd.f32 %v5448_v9, %v10094_v47  ;;  %v10106_v47 = vld [vmem:[#allocation41_spill] sm:$0xff] }
 0x588   : > { %v5399_v51 = vpop.f32.mrf.mxu1 }
 0x589   : > { %v9472_v46 = vadd.f32 %v5399_v51, %v9347_v54  ;;  %v5451_v54 = vadd.f32 %v9389_v32, %v5173_v50  ;;  %v10087_v32 = vld [vmem:[#allocation46_spill] sm:$0xff]  ;;  %v5512_v2 = vmax.f32 %v5480_v13, 0.0  ;;  %v10107_v13 = vld [vmem:[#allocation99_spill] sm:$0xff] }
 0x58a   : > { %v5171_v11 = vadd.f32 %v10087_v32, %v10086_v25  ;;  %v10095_v51 = vld [vmem:[#allocation74_spill] sm:$0xff]  ;;  %v9542_v25 = vpop.f32.mrf.mxu3 }
 0x58b   : > { %6389 = vmatpush.xpose.msk.msrb.mxu2 %vm255_vm1, %v5520_v49  ;;  %v5483_v4 = vadd.f32 %v5451_v54, %v10085_v62  ;;  %v5168_v37 = vadd.f32 %v10096_v24, %v10095_v51  ;;  %v10102_v50 = vld [vmem:[#allocation102_spill] sm:$0xff]  ;;  %v10109_v51 = vld [vmem:[#allocation101_spill] sm:$0xff] }
 0x58c   : > { %v5449_v56 = vadd.f32 %v9373_v30, %v5171_v11  ;;  %v5169_v30 = vadd.f32 %v10093_v35, %v10092_v28  ;;  %v5166_v54 = vadd.f32 %v10102_v50, %v10101_v8  ;;  %v9547_v11 = vpop.f32.mrf.mxu0  ;;  %v10115_v50 = vld [vmem:[#allocation38_spill] sm:$0xff] }
 0x58d   : > { %v5515_v14 = vmax.f32 %v5483_v4, 0.0  ;;  %v5446_v58 = vadd.f32 %v9349_v18, %v5168_v37 }
 0x58e   : > { %v5447_v59 = vadd.f32 %v9357_v22, %v5169_v30  ;;  %v5444_v16 = vadd.f32 %v10103_v45, %v5166_v54  ;;  %v10116_v54 = vld [vmem:[#allocation96_spill] sm:$0xff] }
 0x58f   : > { %6390 = vmatpush.xpose.msk.msrb.mxu2 %vm255_vm1, %v5519_v42  ;;  %v10098_v42 = vld [vmem:[#allocation40_spill] sm:$0xff] }
 0x590   : > { %v5402_v36 = vpop.f32.mrf.mxu1 }
 0x591   : > { %v9480_v29 = vadd.f32 %v5402_v36, %v9355_v44  ;;  %v5450_v44 = vadd.f32 %v9381_v15, %v5172_v33  ;;  %v10099_v36 = vld [vmem:[#allocation43_spill] sm:$0xff] }
 0x592   : > { %v5167_v22 = vadd.f32 %v10099_v36, %v10098_v42  ;;  %v10113_v42 = vld [vmem:[#allocation98_spill] sm:$0xff] }
 0x593   : > { %6391 = vmatpush.xpose.msk.msrb.mxu2 %vm255_vm1, %v5518_v43  ;;  %v5482_v41 = vadd.f32 %v5450_v44, %v10088_v53  ;;  %v5478_v43 = vadd.f32 %v5446_v58, %v10100_v63 }
 0x594   : > { %v5445_v12 = vadd.f32 %v9341_v20, %v5167_v22  ;;  %v10105_v20 = vld [vmem:[#allocation10_spill] sm:$0xff]  ;;  %v5151_v3 = vpop.f32.mrf.mxu0 }
 0x595   : > { %v5514_v0 = vmax.f32 %v5482_v41, 0.0  ;;  %v5510_v34 = vmax.f32 %v5478_v43, 0.0  ;;  %v5476_v33 = vadd.f32 %v5444_v16, %v10105_v20 }
 0x597   : > { %6392 = vmatpush.xpose.msk.msrb.mxu2 %vm255_vm1, %v5517_v23  ;;  %v5508_v62 = vmax.f32 %v5476_v33, 0.0  ;;  %v10118_v33 = vld [vmem:[#allocation60_spill] sm:$0xff] }
 0x598   : > { %v5405_v55 = vpop.f32.mrf.mxu1 }
 0x599   : > { %v9494_v5 = vadd.f32 %v5405_v55, %v9363_v1  ;;  %v10091_v1 = vld [vmem:[#allocation20_spill] sm:$0xff] }
 0x59a   : > { %v5481_v27 = vadd.f32 %v5449_v56, %v10091_v1 }
 0x59b   : > { %6393 = vmatpush.xpose.msk.msrb.mxu2 %vm255_vm1, %v5516_v17  ;;  %v4591_v17 = vpop.f32.mrf.mxu2 }
 0x59c   : > { %v5513_v39 = vmax.f32 %v5481_v27, 0.0 }
 0x59f   : > { %6394 = vmatpush.xpose.msk.msrb.mxu2 %vm255_vm1, %v5515_v14  ;;  %v4873_v14 = vpop.f32.mrf.mxu3 }
 0x5a0   : > { %v5408_v15 = vpop.f32.mrf.mxu1 }
 0x5a1   : > { %v9507_v57 = vadd.f32 %v5408_v15, %v9371_v19  ;;  %v10097_v19 = vld [vmem:[#allocation16_spill] sm:$0xff]  ;;  %v5154_v15 = vpop.f32.mrf.mxu0 }
 0x5a2   : > { %v5479_v49 = vadd.f32 %v5447_v59, %v10097_v19  ;;  %v10111_v19 = vld [vmem:[#allocation57_spill] sm:$0xff] }
 0x5a3   : > { %6395 = vmatpush.xpose.msk.msrb.mxu2 %vm255_vm1, %v5514_v0  ;;  %v4594_v56 = vpop.f32.mrf.mxu2 }
 0x5a4   : > { %v5511_v48 = vmax.f32 %v5479_v49, 0.0 }
 0x5a7   : > { %6396 = vmatpush.xpose.msk.msrb.mxu2 %vm255_vm1, %v5513_v39  ;;  %v4876_v61 = vpop.f32.mrf.mxu3  ;;  %v4083_v39 = vadd.f32 %v10107_v13, %v10106_v47  ;;  %v10120_v13 = vld [vmem:[#allocation51_spill] sm:$0xff] }
 0x5a8   : > { %v5411_v52 = vpop.f32.mrf.mxu1 }
 0x5a9   : > { %v9520_v40 = vadd.f32 %v5411_v52, %v9379_v21  ;;  %v10104_v21 = vld [vmem:[#allocation12_spill] sm:$0xff]  ;;  %v5157_v0 = vpop.f32.mrf.mxu0  ;;  %v10110_v52 = vld [vmem:[#allocation55_spill] sm:$0xff] }
 0x5aa   : > { %v5477_v23 = vadd.f32 %v5445_v12, %v10104_v21  ;;  %v4361_v58 = vadd.f32 %v10110_v52, %v4083_v39 }
 0x5ab   : > { %6397 = vmatpush.xpose.msk.msrb.mxu2 %vm255_vm1, %v5512_v2  ;;  %v10112_v2 = vld [vmem:[#allocation97_spill] sm:$0xff] }
 0x5ac   : > { %v5509_v55 = vmax.f32 %v5477_v23, 0.0  ;;  %v4082_v36 = vadd.f32 %v10113_v42, %v10112_v2  ;;  %v10124_v2 = vld [vmem:[#allocation58_spill] sm:$0xff] }
 0x5af   : > { %6398 = vmatpush.xpose.msk.msrb.mxu2 %vm255_vm1, %v5511_v48  ;;  %v4879_v27 = vpop.f32.mrf.mxu3  ;;  %v10114_v48 = vld [vmem:[#allocation62_spill] sm:$0xff] }
 0x5b0   : > { %v5414_v18 = vpop.f32.mrf.mxu1  ;;  %v4360_v8 = vadd.f32 %v10114_v48, %v4082_v36  ;;  %v10126_v48 = vld [vmem:[#allocation35_spill] sm:$0xff] }
 0x5b1   : > { %v9533_v7 = vadd.f32 %v5414_v18, %v9387_v60  ;;  %v5160_v59 = vpop.f32.mrf.mxu0  ;;  %v4081_v18 = vadd.f32 %v10116_v54, %v10115_v50  ;;  %v10127_v54 = vld [vmem:[#allocation33_spill] sm:$0xff] }
 0x5b3   : > { %6399 = vmatpush.xpose.msk.msrb.mxu2 %vm255_vm1, %v5510_v34  ;;  %v10117_v34 = vld [vmem:[#allocation56_spill] sm:$0xff] }
 0x5b4   : > { %v4359_v20 = vadd.f32 %v10117_v34, %v4081_v18 }
 0x5b7   : > { %6400 = vmatpush.xpose.msk.msrb.mxu2 %vm255_vm1, %v5509_v55  ;;  %v4882_v35 = vpop.f32.mrf.mxu3  ;;  %v10119_v55 = vld [vmem:[#allocation95_spill] sm:$0xff] }
 0x5b8   : > { %v5417_v44 = vpop.f32.mrf.mxu1 }
 0x5b9   : > { %v9539_v4 = vadd.f32 %v5417_v44, %v9395_v38  ;;  %v4597_v38 = vpop.f32.mrf.mxu2  ;;  %v5163_v23 = vpop.f32.mrf.mxu0  ;;  %v4080_v44 = vadd.f32 %v10119_v55, %v10118_v33 }
 0x5bb   : > { %6401 = vmatpush.xpose.msk.msrb.mxu2 %vm255_vm1, %v5508_v62  ;;  %v4637_v62 = vadd.f32 %v4597_v38, %v4359_v20  ;;  %v4358_v39 = vadd.f32 %v10120_v13, %v4080_v44  ;;  %v10125_v38 = vld [vmem:[#allocation76_spill] sm:$0xff]  ;;  %v10132_v20 = vld [vmem:[#allocation23_spill] sm:$0xff]  ;;  %v5540_v44 = vlaneseq }
 0x5bc   : > { %v5499_v33 = vadd.f32 %v9539_v4, %v10132_v20  ;;  %v10135_v13 = vld [vmem:[#allocation19_spill] sm:$0xff] }
 0x5bd   : > { %v4916_v52 = vadd.f32 %v4876_v61, %v4637_v62  ;;  %v5541_v62 = vshrl.u32 %v5540_v44, 7  ;;  %v5497_v4 = vadd.f32 %v9520_v40, %v10135_v13 }
 0x5bf   : > { %v4885_v63 = vpop.f32.mrf.mxu3 }
 0x5c0   : > { %v5420_v32 = vpop.f32.mrf.mxu1 }
 0x5c1   : > { %v9545_v60 = vadd.f32 %v5420_v32, %v9404_v31  ;;  %v4600_v9 = vpop.f32.mrf.mxu2 }
 0x5c2   : > { %v4638_v45 = vadd.f32 %v4600_v9, %v4360_v8 }
 0x5c4   : > { %v4917_v32 = vadd.f32 %v4879_v27, %v4638_v45 }
 0x5c8   : > { %v5423_v53 = vpop.f32.mrf.mxu1 }
 0x5c9   : > { %v9550_v41 = vadd.f32 %v5423_v53, %v9411_v26  ;;  %v4603_v31 = vpop.f32.mrf.mxu2  ;;  %v10108_v26 = vld [vmem:[#allocation100_spill] sm:$0xff] }
 0x5ca   : > { %v4084_v24 = vadd.f32 %v10109_v51, %v10108_v26  ;;  %v4639_v22 = vadd.f32 %v4603_v31, %v4361_v58  ;;  %v5195_v58 = vadd.f32 %v5157_v0, %v4917_v32  ;;  %v5543_v32 = vand.u32 127, %v5540_v44 }
 0x5cc   : > { %v4362_v49 = vadd.f32 %v10111_v19, %v4084_v24  ;;  %v4918_v16 = vadd.f32 %v4882_v35, %v4639_v22  ;;  %v10121_v24 = vld [vmem:[#allocation39_spill] sm:$0xff]  ;;  %v4636_v35 = vadd.f32 %v4594_v56, %v4358_v39  ;;  %v10123_v19 = vld [vmem:[#allocation77_spill] sm:$0xff]  ;;  %vm5544_vm3 = vcmp.eq.s32.totalorder %v5541_v62, %v5543_v32 }
 0x5ce   : > { %v5196_v53 = vadd.f32 %v5160_v59, %v4918_v16  ;;  %v10129_v16 = vld [vmem:[#allocation29_spill] sm:$0xff] }
 0x5d0   : > { %v5426_v6 = vpop.f32.mrf.mxu1 }
 0x5d1   : > { %v4606_v37 = vpop.f32.mrf.mxu2 }
 0x5d2   : > { %v4640_v12 = vadd.f32 %v4606_v37, %v4362_v49  ;;  %v10122_v37 = vld [vmem:[#allocation94_spill] sm:$0xff] }
 0x5d3   : > { %v4079_v9 = vadd.f32 %v10122_v37, %v10121_v24  ;;  %v5529_v24 = vmax.f32 %v5497_v4, 0.0 }
 0x5d4   : > { %v4919_v21 = vadd.f32 %v4885_v63, %v4640_v12  ;;  %v4915_v12 = vadd.f32 %v4873_v14, %v4636_v35  ;;  %v5194_v63 = vadd.f32 %v5154_v15, %v4916_v52  ;;  %v10128_v14 = vld [vmem:[#allocation31_spill] sm:$0xff]  ;;  %v10138_v35 = vld [vmem:[#allocation13_spill] sm:$0xff] }
 0x5d5   : > { %v4357_v42 = vadd.f32 %v10124_v2, %v4079_v9  ;;  %v5494_v40 = vadd.f32 %v9480_v29, %v10138_v35 }
 0x5d6   : > { %v5197_v31 = vadd.f32 %v5163_v23, %v4919_v21  ;;  %v5193_v61 = vadd.f32 %v5151_v3, %v4915_v12  ;;  %v10130_v3 = vld [vmem:[#allocation27_spill] sm:$0xff] }
 0x5d7   : > { %v4635_v22 = vadd.f32 %v4591_v17, %v4357_v42 }
 0x5d8   : > { %v5429_v1 = vpop.f32.mrf.mxu1 }
 0x5d9   : > { %v4914_v56 = vadd.f32 %v9542_v25, %v4635_v22  ;;  %v5471_v0 = vadd.f32 %v5429_v1, %v5193_v61  ;;  %v5501_v1 = vadd.f32 %v9550_v41, %v10130_v3 }
 0x5db   : > { %v5192_v45 = vadd.f32 %v9547_v11, %v4914_v56  ;;  %v5503_v15 = vadd.f32 %v5471_v0, %v10128_v14  ;;  %v10131_v11 = vld [vmem:[#allocation25_spill] sm:$0xff] }
 0x5dc   : > { %v5500_v34 = vadd.f32 %v9545_v60, %v10131_v11  ;;  %v10134_v60 = vmov 0.0  }
 0x5dd   : > { %v5470_v17 = vadd.f32 %v5426_v6, %v5192_v45  ;;  %v5535_v25 = vmax.f32 %v5503_v15, 0.0  ;;  %v5533_v6 = vmax.f32 %v5501_v1, 0.0 }
 0x5de   : > { %v5532_v55 = vmax.f32 %v5500_v34, 0.0 }
 0x5df   : > { %v5502_v21 = vadd.f32 %v5470_v17, %v10129_v16 }
 0x5e0   : > { %v5432_v28 = vpop.f32.mrf.mxu1 }
 0x5e1   : > { %v5534_v23 = vmax.f32 %v5502_v21, 0.0 }
 0x5e8   : > { %v5435_v30 = vpop.f32.mrf.mxu1 }
 0x5e9   : > { %v5473_v36 = vadd.f32 %v5435_v30, %v5195_v58  ;;  %v10139_v58 = vld [vmem:[#allocation11_spill] sm:$0xff] }
 0x5eb   : > { %v5505_v8 = vadd.f32 %v5473_v36, %v10126_v48 }
 0x5ed   : > { %v5537_v18 = vmax.f32 %v5505_v8, 0.0 }
 0x5f0   : > { %v5438_v43 = vpop.f32.mrf.mxu1 }
 0x5f1   : > { %v5474_v26 = vadd.f32 %v5438_v43, %v5196_v53  ;;  %v5472_v43 = vadd.f32 %v5432_v28, %v5194_v63  ;;  %v10133_v53 = vld [vmem:[#allocation21_spill] sm:$0xff] }
 0x5f2   : > { %v5498_v41 = vadd.f32 %v9533_v7, %v10133_v53  ;;  %v10137_v7 = vld [vmem:[#allocation15_spill] sm:$0xff] }
 0x5f3   : > { %v5506_v27 = vadd.f32 %v5474_v26, %v10125_v38  ;;  %v5504_v30 = vadd.f32 %v5472_v43, %v10127_v54  ;;  %v10136_v26 = vld [vmem:[#allocation17_spill] sm:$0xff]  ;;  %v5495_v37 = vadd.f32 %v9494_v5, %v10137_v7 }
 0x5f4   : > { %v5530_v39 = vmax.f32 %v5498_v41, 0.0 }
 0x5f5   : > { %v5538_v50 = vmax.f32 %v5506_v27, 0.0  ;;  %v5536_v28 = vmax.f32 %v5504_v30, 0.0  ;;  %v5527_v52 = vmax.f32 %v5495_v37, 0.0 }
 0x5f8   : > { %v5441_v47 = vpop.f32.mrf.mxu1 }
 0x5f9   : > { %v5475_v51 = vadd.f32 %v5441_v47, %v5197_v31  ;;  %v5531_v31 = vmax.f32 %v5499_v33, 0.0  ;;  %v6385_v47 = vsel %vm5544_vm3, 1.0, %v10134_v60 }
 0x5fa   : > { %6402 = vmatmul.msk.f32.vlgmr.msrb.gmra.mxu2 %vm255_vm1, %v6385_v47 }
 0x5fb   : > { %v5507_v49 = vadd.f32 %v5475_v51, %v10123_v19  ;;  %v5496_v51 = vadd.f32 %v9507_v57, %v10136_v26  ;;  %v5493_v57 = vadd.f32 %v9472_v46, %v10139_v58  ;;  %v5526_v19 = vmax.f32 %v5494_v40, 0.0 }
 0x5fd   : > { %v5539_v59 = vmax.f32 %v5507_v49, 0.0  ;;  %v5528_v9 = vmax.f32 %v5496_v51, 0.0  ;;  %v10140_v49 = vld [vmem:[#allocation9_spill] sm:$0xff]  ;;  %v5525_v5 = vmax.f32 %v5493_v57, 0.0 }
 0x5fe   : > { %v5492_v2 = vadd.f32 %v9461_v10, %v10140_v49 }
 0x5ff   : > { %6403 = vmatpush.xpose.msk.msrb.mxu3 %vm255_vm1, %v5539_v59 }
 0x600   : > { %v5524_v42 = vmax.f32 %v5492_v2, 0.0 }
 0x603   : > { %6404 = vmatpush.xpose.msk.msrb.mxu3 %vm255_vm1, %v5538_v50 }
 0x607   : > { %6405 = vmatpush.xpose.msk.msrb.mxu3 %vm255_vm1, %v5537_v18 }
 0x60b   : > { %6406 = vmatpush.xpose.msk.msrb.mxu3 %vm255_vm1, %v5536_v28 }
 0x60f   : > { %6407 = vmatpush.xpose.msk.msrb.mxu3 %vm255_vm1, %v5535_v25 }
 0x613   : > { %6408 = vmatpush.xpose.msk.msrb.mxu3 %vm255_vm1, %v5534_v23 }
 0x617   : > { %6409 = vmatpush.xpose.msk.msrb.mxu3 %vm255_vm1, %v5533_v6 }
 0x61b   : > { %6410 = vmatpush.xpose.msk.msrb.mxu3 %vm255_vm1, %v5532_v55 }
 0x61f   : > { %6411 = vmatpush.xpose.msk.msrb.mxu3 %vm255_vm1, %v5531_v31 }
 0x623   : > { %6412 = vmatpush.xpose.msk.msrb.mxu3 %vm255_vm1, %v5530_v39 }
 0x627   : > { %6413 = vmatpush.xpose.msk.msrb.mxu3 %vm255_vm1, %v5529_v24 }
 0x62b   : > { %6414 = vmatpush.xpose.msk.msrb.mxu3 %vm255_vm1, %v5528_v9 }
 0x62f   : > { %6415 = vmatpush.xpose.msk.msrb.mxu3 %vm255_vm1, %v5527_v52 }
 0x633   : > { %6416 = vmatpush.xpose.msk.msrb.mxu3 %vm255_vm1, %v5526_v19 }
 0x637   : > { %6417 = vmatpush.xpose.msk.msrb.mxu3 %vm255_vm1, %v5525_v5 }
 0x63b   : > { %6418 = vmatpush.xpose.msk.msrb.mxu3 %vm255_vm1, %v5524_v42 }
 0x63e   : > { %6419 = vmatmul.msk.f32.vlgmr.msrb.gmra.mxu3 %vm255_vm1, %v6385_v47 }
 0x67d   : > { %v5663_v46 = vpop.f32.mrf.mxu2 }
 0x6c1   : > { %v5683_v10 = vpop.f32.mrf.mxu3 }
 0x6c2   : > { %v5688_v29 = vrot.slane %v5683_v10, 4 }
 0x6c4   : > { %v5689_v36 = vsel %vm477_vm0, %v5663_v46, %v5688_v29 }
 0x6c5   : > { %5691 = vst [vmem:[%s217_s8] sm:$0xff] %v5689_v36 }
 0x6c6   : > { %6498 = shalt.err (!%p6495_p3)
}
 0x6c7   : > { %6429 = dma.vmem_to_hbm [thread:$0]  (%p6604_p5), %s5707_s9, 128, %s5709_s10, %s5693_s11  }
 0x6c8 PF: > { %p6435_p4 = scmp.ge.s32.totalorder %s6533_s21, 2  ;;  %s5720_s23 = sand.u32 1, %s6521_s18  }
 0x6c9   : > { %s5721_s25 = scalar_lea.sflag [#allocation5], %s5720_s23 }
 0x6ca   : > { %p6432_p7 = pnand %p6435_p4, %p6608_p6 }
 0x6cc   : > { %p6433_p8 = pneg %p6432_p7 }
 0x6ce   : > { %6516 = dma.done.wait (%p6433_p8), %s5721_s25, 128  }
 0x6cf   : > { %6518 = vsyncadd (%p6433_p8), %s5721_s25, 4294967168  ;;  %p15_p9 = scmp.ge.s32.totalorder %s6591_s24, 4   ;;  %s10141_s18 = smov %s6525_s19 }
 0x6d0   : > { %s10142_s19 = smov %s6529_s20  ;;  %s10143_s20 = smov %s6602_s27 }
 0x6d1   : > { %s10144_s21 = smov %s6591_s24  ;;  %17 = sbr.rel (!%p15_p9) target bundleno = 3 (0x3), region = 95 }
 0x6d6   :  { %5727 = vsyncpa [#allocation5], 1 }
 0x6d7   :  { %5729 = vsyncpa [#allocation5 + $0x1], 1 }

</bundles_post_ra>
